<compile_context>
chip_gen: v7x
topology: tpu7x:2x2x1
jax: 0.10.0
libtpu: 0.0.40
codegen_flags: <defaults>
</compile_context>

<pallas_src>
import jax
import jax.numpy as jnp
from jax.experimental import pallas as pl
from jax.experimental.pallas import tpu as pltpu

_LANES = 128                       # lane-dense last dim
_MAX_TILE_BYTES = 2 * 1024 * 1024  # 2 MiB/buffer -> 8 MiB double-buffered in+out
_MIN_KERNEL_ELEMS = 256 * 1024     # below this, pallas_call launch > the VPU work


def _round_up(n: int, m: int) -> int:
    return ((n + m - 1) // m) * m


def _linreg_kernel(w_ref, b_ref, x_ref, o_ref):
    # w_ref / b_ref: shape-(1,) f32 scalars in SMEM; x_ref / o_ref: (tile_r, 128) VMEM tiles.
    w = w_ref[0]
    b = b_ref[0]
    # Compute in f32 (VPU has plenty of slack), store in the stream dtype so the
    # HBM traffic stays narrow for bf16/fp16 inputs.
    o_ref[...] = (x_ref[...].astype(jnp.float32) * w + b).astype(o_ref.dtype)


def linear_regression_forward(
    x: jax.Array, w: jax.Array, b: jax.Array, *, force_kernel: bool = False
) -> jax.Array:
    """Computes w * x + b with scalar w, b (shape (1,)) via a Pallas TPU kernel.

    Works for any x shape/dtype: flattens to a lane-dense (rows, 128) slab,
    pads the tail only to an (8,128) tile boundary, streams it through a
    row-tiled grid (partial last block), and reshapes back.
    """
    orig_shape = x.shape
    n = x.size
    dtype = x.dtype
    itemsize = jnp.dtype(dtype).itemsize

    # PyTorch params are float64; downcast to f32 before they hit SMEM.
    w32 = jnp.asarray(w, jnp.float32).reshape((1,))
    b32 = jnp.asarray(b, jnp.float32).reshape((1,))

    # Tiny-input fast path: a pallas_call launch costs far more than the work.
    if n == 0 or (n < _MIN_KERNEL_ELEMS and not force_kernel):
        return (w32[0] * x + b32[0]).astype(dtype)

    # Sublane multiple: 8 rows for 4-byte, 16 for 2-byte, 32 for 1-byte dtypes.
    sub = max(8, 32 // itemsize)

    rows = pl.cdiv(n, _LANES)
    rows_padded = _round_up(rows, sub)          # pad only to the vreg-tile boundary
    tile_r_cap = _MAX_TILE_BYTES // (_LANES * itemsize)   # 4096 f32 / 8192 bf16 rows
    tile_r = min(tile_r_cap, rows_padded)       # both are multiples of `sub`
    grid_steps = pl.cdiv(rows_padded, tile_r)   # partial last block handled by Pallas

    flat = x.reshape(-1)
    padded_n = rows_padded * _LANES
    if padded_n != n:
        flat = jnp.pad(flat, (0, padded_n - n))   # <= sub*128-1 elems, a few KiB
    x2d = flat.reshape(rows_padded, _LANES)

    out2d = pl.pallas_call(
        _linreg_kernel,
        out_shape=jax.ShapeDtypeStruct((rows_padded, _LANES), dtype),
        grid_spec=pl.GridSpec(
            grid=(grid_steps,),
            in_specs=[
                pl.BlockSpec(memory_space=pltpu.SMEM),               # w (scalar param)
                pl.BlockSpec(memory_space=pltpu.SMEM),               # b (scalar param)
                pl.BlockSpec((tile_r, _LANES), lambda i: (i, 0)),    # x row tile
            ],
            out_specs=pl.BlockSpec((tile_r, _LANES), lambda i: (i, 0)),
        ),
        compiler_params=pltpu.CompilerParams(
            # Independent row tiles; lets megacore-capable parts shard the stream.
            dimension_semantics=("parallel",),
        ),
        cost_estimate=pl.CostEstimate(
            flops=2 * padded_n,
            bytes_accessed=2 * padded_n * itemsize,
            transcendentals=0,
        ),
    )(w32, b32, x2d)

    out_flat = out2d.reshape(-1)
    if padded_n != n:
        out_flat = out_flat[:n]
    return out_flat.reshape(orig_shape)


if __name__ == "__main__":
    key = jax.random.PRNGKey(0)
    kx1, kx2, kx3, kw, kb = jax.random.split(key, 5)

    # Deterministic "randn"-style parameter init (shapes from the module's __init__).
    w = jax.random.normal(kw, (1,), dtype=jnp.float32)
    b = jax.random.normal(kb, (1,), dtype=jnp.float32)

    # Primary input: exercises a multi-step grid with a PARTIAL last tile
    # (5120 rows, tile_r = 4096 -> 2 grid steps, second one ragged).
    x = jax.random.normal(kx1, (5120, 128), dtype=jnp.float32)
    y = jax.block_until_ready(linear_regression_forward(x, w, b))
    y_ref = w[0] * x + b[0]
    assert jnp.allclose(y, y_ref, atol=1e-6, rtol=1e-6), "mismatch vs reference (large)"

    # Non-aligned small input: exercises the flatten/pad/un-pad path.
    x_small = jax.random.normal(kx2, (7, 50), dtype=jnp.float32)
    y_small = jax.block_until_ready(
        linear_regression_forward(x_small, w, b, force_kernel=True)
    )
    y_small_ref = w[0] * x_small + b[0]
    assert jnp.allclose(y_small, y_small_ref, atol=1e-6, rtol=1e-6), (
        "mismatch vs reference (small/unaligned)"
    )

    # bf16 input: stream stays bf16 end-to-end (16-row sublane multiple path).
    x_bf16 = jax.random.normal(kx3, (33, 256), dtype=jnp.bfloat16)
    y_bf16 = jax.block_until_ready(
        linear_regression_forward(x_bf16, w, b, force_kernel=True)
    )
    y_bf16_ref = (w[0] * x_bf16.astype(jnp.float32) + b[0]).astype(jnp.bfloat16)
    assert jnp.allclose(
        y_bf16.astype(jnp.float32), y_bf16_ref.astype(jnp.float32), atol=3e-2, rtol=3e-2
    ), "mismatch vs reference (bf16)"

    print("KERNEL_OK")
</pallas_src>

<mosaic_0001>
module attributes {stable_mosaic.version = 11 : i64} {
  func.func @_linreg_kernel(%arg0: i32, %arg1: memref<1xf32, #tpu.memory_space<smem>>, %arg2: memref<1xf32, #tpu.memory_space<smem>>, %arg3: memref<4096x128xf32, #tpu.memory_space<vmem>>, %arg4: memref<4096x128xf32, #tpu.memory_space<vmem>>) attributes {dimension_semantics = [#tpu.dimension_semantics<parallel>], iteration_bounds = array<i64: 2>, scalar_prefetch = 0 : i64, scratch_operands = 0 : i64, tpu.core_type = #tpu.core_type<tc>, window_params = [{transform_indices = @transform_0, window_bounds = array<i64: 1>}, {transform_indices = @transform_1, window_bounds = array<i64: 1>}, {transform_indices = @transform_2, window_bounds = array<i64: 4096, 128>}, {transform_indices = @transform_3, window_bounds = array<i64: 4096, 128>}]} {
    %c0 = arith.constant 0 : index
    %0 = memref.load %arg1[%c0] : memref<1xf32, #tpu.memory_space<smem>>
    %c0_0 = arith.constant 0 : index
    %1 = memref.load %arg2[%c0_0] : memref<1xf32, #tpu.memory_space<smem>>
    %c0_1 = arith.constant 0 : index
    %c0_2 = arith.constant 0 : index
    %2 = vector.load %arg3[%c0_1, %c0_2] : memref<4096x128xf32, #tpu.memory_space<vmem>>, vector<4096x128xf32>
    %3 = vector.broadcast %0 : f32 to vector<4096x128xf32>
    %4 = arith.mulf %2, %3 : vector<4096x128xf32>
    %5 = vector.broadcast %1 : f32 to vector<4096x128xf32>
    %6 = arith.addf %4, %5 : vector<4096x128xf32>
    %c0_3 = arith.constant 0 : index
    %c0_4 = arith.constant 0 : index
    %7 = vector.load %arg4[%c0_3, %c0_4] : memref<4096x128xf32, #tpu.memory_space<vmem>>, vector<4096x128xf32>
    tpu.vector_store %arg4[%c0_3, %c0_4], %6 {strides = array<i32>} : memref<4096x128xf32, #tpu.memory_space<vmem>>, vector<4096x128xf32>,
    return
  }
  func.func @transform_0(%arg0: i32) -> i32 {
    %c0_i32 = arith.constant 0 : i32
    %c0_i32_0 = arith.constant 0 : i32
    return %c0_i32 : i32
  }
  func.func @transform_1(%arg0: i32) -> i32 {
    %c0_i32 = arith.constant 0 : i32
    %c0_i32_0 = arith.constant 0 : i32
    return %c0_i32 : i32
  }
  func.func @transform_2(%arg0: i32) -> (i32, i32) {
    %c0_i32 = arith.constant 0 : i32
    %c0_i32_0 = arith.constant 0 : i32
    return %arg0, %c0_i32 : i32, i32
  }
  func.func @transform_3(%arg0: i32) -> (i32, i32) {
    %c0_i32 = arith.constant 0 : i32
    %c0_i32_0 = arith.constant 0 : i32
    return %arg0, %c0_i32 : i32, i32
  }
}

</mosaic_0001>

<bundles_post_ra>
// kernel: tpu_custom_call.1
= control target key start
LH: loop header
LB: loop body
LE: loop exit
PB: predicated region body
PF: predicated region fallthrough
CT: control target
= control target key end

     0   :  { %s4778_s0 = inlined_call_operand.<no memory space> [shape: f32[1], index: 0, kind: input, shape index: {}]   ;;  %s4779_s1 = inlined_call_operand.<no memory space> [shape: f32[1], index: 1, kind: input, shape index: {}]   ;;  %s4780_s2 = inlined_call_operand.hbm [shape: f32[5120,128], index: 2, kind: input, shape index: {}]   ;;  %s4781_s3 = inlined_call_operand.hbm [shape: f32[5120,128], index: 3, kind: output, shape index: {}]  }
   0x1   :  { %8 = sst [smem:[#allocation2]] %s4778_s0 }
   0x2   :  { %9 = sst [smem:[#allocation3]] %s4779_s1 }
   0x3   :  { %10 = vsyncpa [#allocation5], 0 }
   0x4   :  { %12 = vsyncpa [#allocation5 + $0x1], 0 }
   0x5   :  { %13 = vsyncpa [#allocation6], 0 }
   0x6   :  { %15 = vsyncpa [#allocation6 + $0x1], 0  ;;  %s2547_s16 = smov 0   ;;  %s2549_s17 = smov 0  }
   0x7   :  { %s2551_s18 = smov 0   ;;  %s2553_s19 = smov 0  }
   0x8 LB: > { %s2568_s0 = sadd.s32 4294967295, %s2513_s19   ;;  %s2352_s1 = sadd.s32 4294967294, %s2513_s19   ;;  %s2513_s19 = sphi %s2553_s19, %s4791_s19   ;;  %s2509_s18 = sphi %s2551_s18, %s4790_s18   ;;  %s2505_s17 = sphi %s2549_s17, %s4789_s17   ;;  %s2501_s16 = sphi %s2547_s16, %s4788_s16  }
   0x9   : > { %s2572_s20 = sadd.s32 1, %s2513_s19   ;;  %s70_s21 = sadd.s32 1, %s2509_s18 }
   0xa   : > { %s67_s22 = ssub.s32 %s2513_s19, %s2572_s20  ;;  %p77_p0 = scmp.ne.s32.totalorder %s2509_s18, %s2505_s17 }
   0xb   : > { %p68_p1 = scmp.eq.s32.totalorder %s67_s22, 0  ;;  %p78_p2 = scmp.eq.s32.totalorder %s2513_s19, 0 }
   0xc   : > { %p83_p3 = scmp.ne.s32.totalorder %s2505_s17, %s2501_s16  ;;  %p84_p4 = scmp.eq.s32.totalorder %s2568_s0, 0 }
   0xd   : > { %s2584_s23 = scalar_select %p68_p1, %s2509_s18, %s70_s21  }
   0xe   : > { %p79_p5 = por %p78_p2, %p77_p0  ;;  %p2586_p6 = por %p84_p4, %p83_p3 }
   0xf   : > { %p107_p7 = scmp.eq.s32.totalorder %s2568_s0, 1  ;;  %p113_p8 = scmp.eq.s32.totalorder %s2352_s1, 1 }
  0x10   : > { %p4782_p11 = scmp.ge.s32.totalorder %s2513_s19, 2 }
  0x11   : > { %p2591_p9 = por %p107_p7, %p77_p0  ;;  %p2595_p10 = por %p113_p8, %p83_p3 }
  0x12   : > { %135 = sbr.rel (%p4782_p11) target bundleno = 60 (0x3c), region = 24 }
  0x13   : > { %s4785_s26 = scalar_select %p2595_p10, 1, 0 }
  0x19   : > { %138 = sbr.rel (!%p79_p5) target bundleno = 60 (0x3c), region = 28  ;;  %s139_s27 = sand.u32 (%p79_p5), 1, %s2509_s18  }
  0x1a   : > { %s2356_s28 = sshll.u32 (%p79_p5), %s2513_s19, 9  ;;  %s2355_s29 = sshll.u32 (%p79_p5), %s139_s27, 12 }
  0x1b   : > { %s145_s30 = ssub.s32 (%p79_p5), 640, %s2356_s28  ;;  %s2607_s6 = scalar_lea.sflag (%p79_p5), [#allocation5], %s139_s27 }
  0x1c   : > { %p146_p12 = scmp.lt.s32.totalorder (%p79_p5), %s145_s30, 512  ;;  %s143_s7 = scalar_lea.vmem (%p79_p5), [#allocation4], %s2355_s29 }
  0x20   : > { %s4793_s30 = smov (!%p146_p12, %s145_s30), 512 }
  0x21   : > { %s2604_s4 = sshll.u32 %s4793_s30, 7 }
  0x22   : > { %s150_s5 = ssub.s32 65536, %s2604_s4 }
  0x23   : > { %151 = vsyncadd %s2607_s6, %s150_s5  ;;  %p2358_p13 = scmp.ne.s32.totalorder %s2604_s4, 0  ;;  %s2374_s8 = sshll.u32 %s2513_s19, 16 }
  0x24   : > { %s2615_s11 = scalar_lea.hbm %s4780_s2, %s2374_s8  ;;  %s156_s12 = sshll.u32 %s143_s7, 4  ;;  %s2617_s12 = int_to_ptr.vmem [resolvable:$true] %s156_s12 }
  0x25   : > { %s2419_s13 = scalar_lea.hbm %s2615_s11, %s2604_s4  ;;  %s2423_s1 = scalar_lea.hbm %s4780_s2, 81920 }
  0x26   : > { %p2420_p0 = scmp.ne.s32.totalorder %s2615_s11, %s2419_s13  ;;  %p2424_p3 = scmp.lt.u32.totalorder %s2615_s11, %s4780_s2 }
  0x27   : > { %p2425_p4 = scmp.lt.u32.totalorder %s2423_s1, %s2419_s13  ;;  %p2427_p7 = scmp.lt.u32.totalorder %s2419_s13, %s2615_s11 }
  0x28   : > { %p2421_p1 = pnand %p2420_p0, %p2358_p13 }
  0x29   : > { %p2426_p5 = por %p2425_p4, %p2424_p3 }
  0x2a   : > { %p2422_p2 = pneg %p2421_p1 }
  0x2b   : > { %p2428_p8 = por %p2427_p7, %p2426_p5 }
  0x2d   : > { %p2429_p12 = pnand %p2428_p8, %p2422_p2 }
  0x2f   : > { %2432 = shalt.err (!%p2429_p12)
}
  0x30   : > { %s2433_s27 = scalar_lea.vmem %s2617_s12, %s2604_s4  ;;  %s2515_s28 = smov [#allocation4]  }
  0x31   : > { %p2434_p0 = scmp.ne.s32.totalorder %s2617_s12, %s2433_s27  ;;  %s2437_s29 = sshll.u32 %s2515_s28, 4  ;;  %s2438_s29 = int_to_ptr.vmem [resolvable:$false] %s2437_s29 }
  0x32   : > { %s2439_s30 = scalar_lea.vmem %s2438_s29, 131072  ;;  %p2440_p10 = scmp.lt.s32.totalorder %s2617_s12, %s2438_s29 }
  0x33   : > { %p2435_p1 = pnand %p2434_p0, %p2358_p13  ;;  %p2441_p3 = scmp.lt.s32.totalorder %s2439_s30, %s2433_s27 }
  0x35   : > { %p2436_p11 = pneg %p2435_p1  ;;  %p2442_p4 = por %p2441_p3, %p2440_p10 }
  0x37   : > { %p2443_p5 = pnand %p2442_p4, %p2436_p11 }
  0x39   : > { %2446 = shalt.err (!%p2443_p5)
}
  0x3a   : > { %s2516_s5 = smov 128   ;;  %s2517_s7 = smov 8  }
  0x3b   : > { %162 = dma.hbm_to_vmem [thread:$0]  (%p2358_p13), %s2615_s11, %s2604_s4, %s2617_s12, %s2607_s6, %s2516_s5, %s2516_s5, %s2517_s7  }
  0x3c PF: > { %p2362_p2 = scmp.ge.s32.totalorder %s2513_s19, 1  ;;  %p164_p7 = scmp.lt.s32.totalorder %s2513_s19, 3 }
  0x3e   : > { %p165_p8 = pnand %p2362_p2, %p164_p7 }
  0x3f   : > { %s2647_s8 = sand.u32 (!%p165_p8), 1, %s2505_s17  }
  0x40   : > { %168 = sbr.rel (%p165_p8) target bundleno = 417 (0x1a1), region = 32  ;;  %s2363_s9 = sshll.u32 (!%p165_p8), %s2647_s8, 12 }
  0x41   : > { %s171_s10 = scalar_lea.sflag (!%p165_p8), [#allocation5], %s2647_s8  ;;  %s2653_s13 = scalar_lea.vmem (!%p165_p8), [#allocation4], %s2363_s9 }
  0x47   : > { %2492 = dma.done.wait (%p2586_p6), %s171_s10, 65536  }
  0x48   : > { %2494 = vsyncadd (%p2586_p6), %s171_s10, 4294901760  ;;  %s207_s4 = sld [smem:[#allocation2]]  ;;  %v209_v0 = vld [vmem:[%s2653_s13] sm:$0xff]  ;;  %v210_v3 = vld [vmem:[%s2653_s13 + $0x8] sm:$0xff]  ;;  %s2692_s24 = scalar_lea.vmem [#allocation7], %s2363_s9 }
  0x49   : > { %s208_s6 = sld [smem:[#allocation3]]  ;;  %v211_v6 = vld [vmem:[%s2653_s13 + $0x10] sm:$0xff]  ;;  %v212_v7 = vld [vmem:[%s2653_s13 + $0x18] sm:$0xff]  ;;  %v213_v8 = vld [vmem:[%s2653_s13 + $0x20] sm:$0xff]  ;;  %s2260_s11 = scalar_lea.sflag [#allocation6], %s2647_s8 }
  0x4a   : > { %v214_v12 = vld [vmem:[%s2653_s13 + $0x28] sm:$0xff]  ;;  %v215_v13 = vld [vmem:[%s2653_s13 + $0x30] sm:$0xff]  ;;  %v216_v14 = vld [vmem:[%s2653_s13 + $0x38] sm:$0xff]  ;;  %s2366_s12 = sshll.u32 (%p2591_p9), %s2568_s0, 9 }
  0x4b   : > { %v217_v19 = vld [vmem:[%s2653_s13 + $0x40] sm:$0xff]  ;;  %v218_v20 = vld [vmem:[%s2653_s13 + $0x48] sm:$0xff]  ;;  %v219_v21 = vld [vmem:[%s2653_s13 + $0x50] sm:$0xff]  ;;  %s2268_s14 = ssub.s32 (%p2591_p9), 640, %s2366_s12 }
  0x4c   : > { %v220_v26 = vld [vmem:[%s2653_s13 + $0x58] sm:$0xff]  ;;  %v221_v27 = vld [vmem:[%s2653_s13 + $0x60] sm:$0xff]  ;;  %v222_v28 = vld [vmem:[%s2653_s13 + $0x68] sm:$0xff]  ;;  %p2269_p6 = scmp.lt.s32.totalorder (%p2591_p9), %s2268_s14, 512 }
  0x4d   : > { %v223_v33 = vld [vmem:[%s2653_s13 + $0x70] sm:$0xff]  ;;  %v224_v34 = vld [vmem:[%s2653_s13 + $0x78] sm:$0xff]  ;;  %v225_v39 = vld [vmem:[%s2653_s13 + $0x80] sm:$0xff] }
  0x4e   : > { %v2660_v1 = vstv %s207_s4  ;;  %v226_v40 = vld [vmem:[%s2653_s13 + $0x88] sm:$0xff]  ;;  %v227_v45 = vld [vmem:[%s2653_s13 + $0x90] sm:$0xff]  ;;  %v228_v46 = vld [vmem:[%s2653_s13 + $0x98] sm:$0xff] }
  0x4f   : > { %v2662_v2 = vstv %s208_s6  ;;  %v722_v4 = vmul.f32 %v2660_v1, %v209_v0  ;;  %v723_v5 = vmul.f32 %v2660_v1, %v210_v3  ;;  %v724_v9 = vmul.f32 %v2660_v1, %v211_v6  ;;  %v229_v47 = vld [vmem:[%s2653_s13 + $0xa0] sm:$0xff]  ;;  %v230_v52 = vld [vmem:[%s2653_s13 + $0xa8] sm:$0xff]  ;;  %v231_v53 = vld [vmem:[%s2653_s13 + $0xb0] sm:$0xff] }
  0x50   : > { %v725_v10 = vmul.f32 %v2660_v1, %v212_v7  ;;  %v726_v11 = vmul.f32 %v2660_v1, %v213_v8  ;;  %v727_v17 = vmul.f32 %v2660_v1, %v214_v12  ;;  %v728_v18 = vmul.f32 %v2660_v1, %v215_v13  ;;  %v232_v58 = vld [vmem:[%s2653_s13 + $0xb8] sm:$0xff]  ;;  %v233_v63 = vld [vmem:[%s2653_s13 + $0xc0] sm:$0xff]  ;;  %v234_v0 = vld [vmem:[%s2653_s13 + $0xc8] sm:$0xff] }
  0x51   : > { %v1235_v15 = vadd.f32 %v2662_v2, %v722_v4  ;;  %v1236_v16 = vadd.f32 %v2662_v2, %v723_v5  ;;  %v1237_v22 = vadd.f32 %v2662_v2, %v724_v9  ;;  %v729_v25 = vmul.f32 %v2660_v1, %v216_v14  ;;  %v235_v7 = vld [vmem:[%s2653_s13 + $0xd0] sm:$0xff]  ;;  %v236_v8 = vld [vmem:[%s2653_s13 + $0xd8] sm:$0xff]  ;;  %v237_v9 = vld [vmem:[%s2653_s13 + $0xe0] sm:$0xff] }
  0x52   : > { %v1238_v23 = vadd.f32 %v2662_v2, %v725_v10  ;;  %v1239_v24 = vadd.f32 %v2662_v2, %v726_v11  ;;  %v1240_v29 = vadd.f32 %v2662_v2, %v727_v17  ;;  %v1241_v30 = vadd.f32 %v2662_v2, %v728_v18  ;;  %v238_v14 = vld [vmem:[%s2653_s13 + $0xe8] sm:$0xff] }
  0x53   : > { %1747 = vst [vmem:[%s2692_s24] sm:$0xff] %v1235_v15  ;;  %1748 = vst [vmem:[%s2692_s24 + $0x8] sm:$0xff] %v1236_v16  ;;  %v730_v31 = vmul.f32 %v2660_v1, %v217_v19  ;;  %v731_v32 = vmul.f32 %v2660_v1, %v218_v20  ;;  %v1242_v35 = vadd.f32 %v2662_v2, %v729_v25  ;;  %v239_v15 = vld [vmem:[%s2653_s13 + $0xf0] sm:$0xff]  ;;  %v240_v20 = vld [vmem:[%s2653_s13 + $0xf8] sm:$0xff] }
  0x54   : > { %1749 = vst [vmem:[%s2692_s24 + $0x10] sm:$0xff] %v1237_v22  ;;  %1750 = vst [vmem:[%s2692_s24 + $0x18] sm:$0xff] %v1238_v23  ;;  %v732_v36 = vmul.f32 %v2660_v1, %v219_v21  ;;  %v733_v37 = vmul.f32 %v2660_v1, %v220_v26  ;;  %v734_v38 = vmul.f32 %v2660_v1, %v221_v27  ;;  %v241_v25 = vld [vmem:[%s2653_s13 + $0x100] sm:$0xff]  ;;  %v242_v26 = vld [vmem:[%s2653_s13 + $0x108] sm:$0xff] }
  0x55   : > { %1751 = vst [vmem:[%s2692_s24 + $0x20] sm:$0xff] %v1239_v24  ;;  %1752 = vst [vmem:[%s2692_s24 + $0x28] sm:$0xff] %v1240_v29  ;;  %v1243_v41 = vadd.f32 %v2662_v2, %v730_v31  ;;  %v1244_v42 = vadd.f32 %v2662_v2, %v731_v32  ;;  %v735_v43 = vmul.f32 %v2660_v1, %v222_v28  ;;  %v243_v31 = vld [vmem:[%s2653_s13 + $0x110] sm:$0xff]  ;;  %v244_v32 = vld [vmem:[%s2653_s13 + $0x118] sm:$0xff] }
  0x56   : > { %1753 = vst [vmem:[%s2692_s24 + $0x30] sm:$0xff] %v1241_v30  ;;  %v736_v44 = vmul.f32 %v2660_v1, %v223_v33  ;;  %1754 = vst [vmem:[%s2692_s24 + $0x38] sm:$0xff] %v1242_v35  ;;  %v1245_v48 = vadd.f32 %v2662_v2, %v732_v36  ;;  %v1246_v49 = vadd.f32 %v2662_v2, %v733_v37  ;;  %v245_v33 = vld [vmem:[%s2653_s13 + $0x120] sm:$0xff] }
  0x57   : > { %v1247_v50 = vadd.f32 %v2662_v2, %v734_v38  ;;  %v737_v51 = vmul.f32 %v2660_v1, %v224_v34  ;;  %1755 = vst [vmem:[%s2692_s24 + $0x40] sm:$0xff] %v1243_v41  ;;  %1756 = vst [vmem:[%s2692_s24 + $0x48] sm:$0xff] %v1244_v42  ;;  %v1248_v54 = vadd.f32 %v2662_v2, %v735_v43  ;;  %v246_v38 = vld [vmem:[%s2653_s13 + $0x128] sm:$0xff] }
  0x58   : > { %v1249_v55 = vadd.f32 %v2662_v2, %v736_v44  ;;  %v738_v56 = vmul.f32 %v2660_v1, %v225_v39  ;;  %v739_v57 = vmul.f32 %v2660_v1, %v226_v40  ;;  %1757 = vst [vmem:[%s2692_s24 + $0x50] sm:$0xff] %v1245_v48  ;;  %1758 = vst [vmem:[%s2692_s24 + $0x58] sm:$0xff] %v1246_v49  ;;  %v247_v39 = vld [vmem:[%s2653_s13 + $0x130] sm:$0xff]  ;;  %v248_v44 = vld [vmem:[%s2653_s13 + $0x138] sm:$0xff] }
  0x59   : > { %1759 = vst [vmem:[%s2692_s24 + $0x60] sm:$0xff] %v1247_v50  ;;  %v1250_v59 = vadd.f32 %v2662_v2, %v737_v51  ;;  %v740_v60 = vmul.f32 %v2660_v1, %v227_v45  ;;  %v741_v61 = vmul.f32 %v2660_v1, %v228_v46  ;;  %v742_v62 = vmul.f32 %v2660_v1, %v229_v47  ;;  %v249_v49 = vld [vmem:[%s2653_s13 + $0x140] sm:$0xff]  ;;  %v250_v50 = vld [vmem:[%s2653_s13 + $0x148] sm:$0xff] }
  0x5a   : > { %1760 = vst [vmem:[%s2692_s24 + $0x68] sm:$0xff] %v1248_v54  ;;  %1761 = vst [vmem:[%s2692_s24 + $0x70] sm:$0xff] %v1249_v55  ;;  %v1251_v3 = vadd.f32 %v2662_v2, %v738_v56  ;;  %v1252_v4 = vadd.f32 %v2662_v2, %v739_v57  ;;  %v743_v5 = vmul.f32 %v2660_v1, %v230_v52  ;;  %v251_v55 = vld [vmem:[%s2653_s13 + $0x150] sm:$0xff]  ;;  %v252_v56 = vld [vmem:[%s2653_s13 + $0x158] sm:$0xff] }
  0x5b   : > { %v744_v6 = vmul.f32 %v2660_v1, %v231_v53  ;;  %1762 = vst [vmem:[%s2692_s24 + $0x78] sm:$0xff] %v1250_v59  ;;  %v1253_v10 = vadd.f32 %v2662_v2, %v740_v60  ;;  %v1254_v11 = vadd.f32 %v2662_v2, %v741_v61  ;;  %v1255_v12 = vadd.f32 %v2662_v2, %v742_v62  ;;  %v253_v57 = vld [vmem:[%s2653_s13 + $0x160] sm:$0xff]  ;;  %v254_v62 = vld [vmem:[%s2653_s13 + $0x168] sm:$0xff] }
  0x5c   : > { %v745_v13 = vmul.f32 %v2660_v1, %v232_v58  ;;  %1763 = vst [vmem:[%s2692_s24 + $0x80] sm:$0xff] %v1251_v3  ;;  %1764 = vst [vmem:[%s2692_s24 + $0x88] sm:$0xff] %v1252_v4  ;;  %v1256_v16 = vadd.f32 %v2662_v2, %v743_v5  ;;  %v746_v18 = vmul.f32 %v2660_v1, %v233_v63  ;;  %v255_v63 = vld [vmem:[%s2653_s13 + $0x170] sm:$0xff] }
  0x5d   : > { %v1257_v17 = vadd.f32 %v2662_v2, %v744_v6  ;;  %v747_v19 = vmul.f32 %v2660_v1, %v234_v0  ;;  %1765 = vst [vmem:[%s2692_s24 + $0x90] sm:$0xff] %v1253_v10  ;;  %1766 = vst [vmem:[%s2692_s24 + $0x98] sm:$0xff] %v1254_v11  ;;  %v748_v22 = vmul.f32 %v2660_v1, %v235_v7  ;;  %v256_v6 = vld [vmem:[%s2653_s13 + $0x178] sm:$0xff]  ;;  %v257_v11 = vld [vmem:[%s2653_s13 + $0x180] sm:$0xff] }
  0x5e   : > { %1767 = vst [vmem:[%s2692_s24 + $0xa0] sm:$0xff] %v1255_v12  ;;  %v1258_v21 = vadd.f32 %v2662_v2, %v745_v13  ;;  %v749_v23 = vmul.f32 %v2660_v1, %v236_v8  ;;  %v750_v24 = vmul.f32 %v2660_v1, %v237_v9  ;;  %1768 = vst [vmem:[%s2692_s24 + $0xa8] sm:$0xff] %v1256_v16  ;;  %v258_v12 = vld [vmem:[%s2653_s13 + $0x188] sm:$0xff] }
  0x5f   : > { %1769 = vst [vmem:[%s2692_s24 + $0xb0] sm:$0xff] %v1257_v17  ;;  %v1259_v27 = vadd.f32 %v2662_v2, %v746_v18  ;;  %v1260_v28 = vadd.f32 %v2662_v2, %v747_v19  ;;  %v751_v29 = vmul.f32 %v2660_v1, %v238_v14  ;;  %v752_v30 = vmul.f32 %v2660_v1, %v239_v15  ;;  %v259_v17 = vld [vmem:[%s2653_s13 + $0x190] sm:$0xff]  ;;  %v260_v18 = vld [vmem:[%s2653_s13 + $0x198] sm:$0xff]  ;;  %v261_v19 = vld [vmem:[%s2653_s13 + $0x1a0] sm:$0xff] }
  0x60   : > { %1770 = vst [vmem:[%s2692_s24 + $0xb8] sm:$0xff] %v1258_v21  ;;  %v1261_v34 = vadd.f32 %v2662_v2, %v748_v22  ;;  %v1262_v35 = vadd.f32 %v2662_v2, %v749_v23  ;;  %v1263_v36 = vadd.f32 %v2662_v2, %v750_v24  ;;  %v753_v37 = vmul.f32 %v2660_v1, %v240_v20  ;;  %v262_v24 = vld [vmem:[%s2653_s13 + $0x1a8] sm:$0xff] }
  0x61   : > { %1771 = vst [vmem:[%s2692_s24 + $0xc0] sm:$0xff] %v1259_v27  ;;  %1772 = vst [vmem:[%s2692_s24 + $0xc8] sm:$0xff] %v1260_v28  ;;  %v1264_v40 = vadd.f32 %v2662_v2, %v751_v29  ;;  %v1265_v41 = vadd.f32 %v2662_v2, %v752_v30  ;;  %v754_v42 = vmul.f32 %v2660_v1, %v241_v25  ;;  %v263_v25 = vld [vmem:[%s2653_s13 + $0x1b0] sm:$0xff]  ;;  %v264_v30 = vld [vmem:[%s2653_s13 + $0x1b8] sm:$0xff] }
  0x62   : > { %v755_v43 = vmul.f32 %v2660_v1, %v242_v26  ;;  %1773 = vst [vmem:[%s2692_s24 + $0xd0] sm:$0xff] %v1261_v34  ;;  %1774 = vst [vmem:[%s2692_s24 + $0xd8] sm:$0xff] %v1262_v35  ;;  %v1266_v45 = vadd.f32 %v2662_v2, %v753_v37  ;;  %v756_v46 = vmul.f32 %v2660_v1, %v243_v31  ;;  %v265_v35 = vld [vmem:[%s2653_s13 + $0x1c0] sm:$0xff] }
  0x63   : > { %1775 = vst [vmem:[%s2692_s24 + $0xe0] sm:$0xff] %v1263_v36  ;;  %v757_v47 = vmul.f32 %v2660_v1, %v244_v32  ;;  %v758_v48 = vmul.f32 %v2660_v1, %v245_v33  ;;  %1776 = vst [vmem:[%s2692_s24 + $0xe8] sm:$0xff] %v1264_v40  ;;  %v1267_v51 = vadd.f32 %v2662_v2, %v754_v42  ;;  %v266_v36 = vld [vmem:[%s2653_s13 + $0x1c8] sm:$0xff]  ;;  %v268_v42 = vld [vmem:[%s2653_s13 + $0x1d8] sm:$0xff] }
  0x64   : > { %1777 = vst [vmem:[%s2692_s24 + $0xf0] sm:$0xff] %v1265_v41  ;;  %v1268_v52 = vadd.f32 %v2662_v2, %v755_v43  ;;  %v759_v53 = vmul.f32 %v2660_v1, %v246_v38  ;;  %v760_v54 = vmul.f32 %v2660_v1, %v247_v39  ;;  %1778 = vst [vmem:[%s2692_s24 + $0xf8] sm:$0xff] %v1266_v45  ;;  %v267_v41 = vld [vmem:[%s2653_s13 + $0x1d0] sm:$0xff]  ;;  %v269_v43 = vld [vmem:[%s2653_s13 + $0x1e0] sm:$0xff] }
  0x65   : > { %v1269_v58 = vadd.f32 %v2662_v2, %v756_v46  ;;  %v1270_v59 = vadd.f32 %v2662_v2, %v757_v47  ;;  %v1271_v60 = vadd.f32 %v2662_v2, %v758_v48  ;;  %v761_v61 = vmul.f32 %v2660_v1, %v248_v44  ;;  %1779 = vst [vmem:[%s2692_s24 + $0x100] sm:$0xff] %v1267_v51  ;;  %v270_v48 = vld [vmem:[%s2653_s13 + $0x1e8] sm:$0xff] }
  0x66   : > { %1780 = vst [vmem:[%s2692_s24 + $0x108] sm:$0xff] %v1268_v52  ;;  %v1272_v0 = vadd.f32 %v2662_v2, %v759_v53  ;;  %v1273_v3 = vadd.f32 %v2662_v2, %v760_v54  ;;  %v762_v4 = vmul.f32 %v2660_v1, %v249_v49  ;;  %v763_v5 = vmul.f32 %v2660_v1, %v250_v50  ;;  %v271_v49 = vld [vmem:[%s2653_s13 + $0x1f0] sm:$0xff]  ;;  %v272_v54 = vld [vmem:[%s2653_s13 + $0x1f8] sm:$0xff] }
  0x67   : > { %1781 = vst [vmem:[%s2692_s24 + $0x110] sm:$0xff] %v1269_v58  ;;  %1782 = vst [vmem:[%s2692_s24 + $0x118] sm:$0xff] %v1270_v59  ;;  %v1274_v7 = vadd.f32 %v2662_v2, %v761_v61  ;;  %v764_v8 = vmul.f32 %v2660_v1, %v251_v55  ;;  %v765_v9 = vmul.f32 %v2660_v1, %v252_v56  ;;  %v273_v59 = vld [vmem:[%s2653_s13 + $0x200] sm:$0xff] }
  0x68   : > { %1783 = vst [vmem:[%s2692_s24 + $0x120] sm:$0xff] %v1271_v60  ;;  %v766_v10 = vmul.f32 %v2660_v1, %v253_v57  ;;  %1784 = vst [vmem:[%s2692_s24 + $0x128] sm:$0xff] %v1272_v0  ;;  %v1275_v13 = vadd.f32 %v2662_v2, %v762_v4  ;;  %v1276_v14 = vadd.f32 %v2662_v2, %v763_v5  ;;  %v274_v60 = vld [vmem:[%s2653_s13 + $0x208] sm:$0xff]  ;;  %v276_v4 = vld [vmem:[%s2653_s13 + $0x218] sm:$0xff] }
  0x69   : > { %1785 = vst [vmem:[%s2692_s24 + $0x130] sm:$0xff] %v1273_v3  ;;  %v767_v15 = vmul.f32 %v2660_v1, %v254_v62  ;;  %v768_v16 = vmul.f32 %v2660_v1, %v255_v63  ;;  %1786 = vst [vmem:[%s2692_s24 + $0x138] sm:$0xff] %v1274_v7  ;;  %v1277_v20 = vadd.f32 %v2662_v2, %v764_v8  ;;  %v275_v3 = vld [vmem:[%s2653_s13 + $0x210] sm:$0xff]  ;;  %v277_v5 = vld [vmem:[%s2653_s13 + $0x220] sm:$0xff] }
  0x6a   : > { %v1278_v21 = vadd.f32 %v2662_v2, %v765_v9  ;;  %v1279_v22 = vadd.f32 %v2662_v2, %v766_v10  ;;  %v769_v23 = vmul.f32 %v2660_v1, %v256_v6  ;;  %1787 = vst [vmem:[%s2692_s24 + $0x140] sm:$0xff] %v1275_v13  ;;  %1788 = vst [vmem:[%s2692_s24 + $0x148] sm:$0xff] %v1276_v14  ;;  %v278_v10 = vld [vmem:[%s2653_s13 + $0x228] sm:$0xff] }
  0x6b   : > { %v1280_v26 = vadd.f32 %v2662_v2, %v767_v15  ;;  %v1281_v27 = vadd.f32 %v2662_v2, %v768_v16  ;;  %v770_v28 = vmul.f32 %v2660_v1, %v257_v11  ;;  %v771_v29 = vmul.f32 %v2660_v1, %v258_v12  ;;  %1789 = vst [vmem:[%s2692_s24 + $0x150] sm:$0xff] %v1277_v20  ;;  %v279_v11 = vld [vmem:[%s2653_s13 + $0x230] sm:$0xff]  ;;  %v280_v16 = vld [vmem:[%s2653_s13 + $0x238] sm:$0xff] }
  0x6c   : > { %1790 = vst [vmem:[%s2692_s24 + $0x158] sm:$0xff] %v1278_v21  ;;  %1791 = vst [vmem:[%s2692_s24 + $0x160] sm:$0xff] %v1279_v22  ;;  %v1282_v31 = vadd.f32 %v2662_v2, %v769_v23  ;;  %v772_v32 = vmul.f32 %v2660_v1, %v259_v17  ;;  %v773_v33 = vmul.f32 %v2660_v1, %v260_v18  ;;  %v281_v21 = vld [vmem:[%s2653_s13 + $0x240] sm:$0xff]  ;;  %v282_v22 = vld [vmem:[%s2653_s13 + $0x248] sm:$0xff] }
  0x6d   : > { %v774_v34 = vmul.f32 %v2660_v1, %v261_v19  ;;  %1792 = vst [vmem:[%s2692_s24 + $0x168] sm:$0xff] %v1280_v26  ;;  %1793 = vst [vmem:[%s2692_s24 + $0x170] sm:$0xff] %v1281_v27  ;;  %v1283_v37 = vadd.f32 %v2662_v2, %v770_v28  ;;  %v1284_v38 = vadd.f32 %v2662_v2, %v771_v29  ;;  %v283_v27 = vld [vmem:[%s2653_s13 + $0x250] sm:$0xff]  ;;  %v284_v28 = vld [vmem:[%s2653_s13 + $0x258] sm:$0xff] }
  0x6e   : > { %v775_v39 = vmul.f32 %v2660_v1, %v262_v24  ;;  %v776_v40 = vmul.f32 %v2660_v1, %v263_v25  ;;  %1794 = vst [vmem:[%s2692_s24 + $0x178] sm:$0xff] %v1282_v31  ;;  %v1285_v44 = vadd.f32 %v2662_v2, %v772_v32  ;;  %v1286_v45 = vadd.f32 %v2662_v2, %v773_v33  ;;  %v285_v29 = vld [vmem:[%s2653_s13 + $0x260] sm:$0xff] }
  0x6f   : > { %v1287_v46 = vadd.f32 %v2662_v2, %v774_v34  ;;  %v777_v47 = vmul.f32 %v2660_v1, %v264_v30  ;;  %1795 = vst [vmem:[%s2692_s24 + $0x180] sm:$0xff] %v1283_v37  ;;  %1796 = vst [vmem:[%s2692_s24 + $0x188] sm:$0xff] %v1284_v38  ;;  %v778_v52 = vmul.f32 %v2660_v1, %v265_v35  ;;  %v286_v34 = vld [vmem:[%s2653_s13 + $0x268] sm:$0xff]  ;;  %v287_v35 = vld [vmem:[%s2653_s13 + $0x270] sm:$0xff] }
  0x70   : > { %v1288_v50 = vadd.f32 %v2662_v2, %v775_v39  ;;  %v1289_v51 = vadd.f32 %v2662_v2, %v776_v40  ;;  %v779_v53 = vmul.f32 %v2660_v1, %v266_v36  ;;  %1797 = vst [vmem:[%s2692_s24 + $0x190] sm:$0xff] %v1285_v44  ;;  %1798 = vst [vmem:[%s2692_s24 + $0x198] sm:$0xff] %v1286_v45  ;;  %v288_v40 = vld [vmem:[%s2653_s13 + $0x278] sm:$0xff]  ;;  %v289_v45 = vld [vmem:[%s2653_s13 + $0x280] sm:$0xff] }
  0x71   : > { %1799 = vst [vmem:[%s2692_s24 + $0x1a0] sm:$0xff] %v1287_v46  ;;  %v1290_v55 = vadd.f32 %v2662_v2, %v777_v47  ;;  %v780_v56 = vmul.f32 %v2660_v1, %v267_v41  ;;  %v781_v57 = vmul.f32 %v2660_v1, %v268_v42  ;;  %v782_v58 = vmul.f32 %v2660_v1, %v269_v43  ;;  %v290_v46 = vld [vmem:[%s2653_s13 + $0x288] sm:$0xff] }
  0x72   : > { %1800 = vst [vmem:[%s2692_s24 + $0x1a8] sm:$0xff] %v1288_v50  ;;  %1801 = vst [vmem:[%s2692_s24 + $0x1b0] sm:$0xff] %v1289_v51  ;;  %v1291_v61 = vadd.f32 %v2662_v2, %v778_v52  ;;  %v1292_v62 = vadd.f32 %v2662_v2, %v779_v53  ;;  %v783_v63 = vmul.f32 %v2660_v1, %v270_v48  ;;  %v291_v51 = vld [vmem:[%s2653_s13 + $0x290] sm:$0xff]  ;;  %v292_v52 = vld [vmem:[%s2653_s13 + $0x298] sm:$0xff] }
  0x73   : > { %v784_v0 = vmul.f32 %v2660_v1, %v271_v49  ;;  %1802 = vst [vmem:[%s2692_s24 + $0x1b8] sm:$0xff] %v1290_v55  ;;  %v1293_v6 = vadd.f32 %v2662_v2, %v780_v56  ;;  %v1294_v7 = vadd.f32 %v2662_v2, %v781_v57  ;;  %v1295_v8 = vadd.f32 %v2662_v2, %v782_v58  ;;  %v293_v53 = vld [vmem:[%s2653_s13 + $0x2a0] sm:$0xff]  ;;  %v294_v58 = vld [vmem:[%s2653_s13 + $0x2a8] sm:$0xff] }
  0x74   : > { %v785_v9 = vmul.f32 %v2660_v1, %v272_v54  ;;  %1803 = vst [vmem:[%s2692_s24 + $0x1c0] sm:$0xff] %v1291_v61  ;;  %1804 = vst [vmem:[%s2692_s24 + $0x1c8] sm:$0xff] %v1292_v62  ;;  %v1296_v12 = vadd.f32 %v2662_v2, %v783_v63  ;;  %v786_v14 = vmul.f32 %v2660_v1, %v273_v59  ;;  %v295_v59 = vld [vmem:[%s2653_s13 + $0x2b0] sm:$0xff] }
  0x75   : > { %v1297_v13 = vadd.f32 %v2662_v2, %v784_v0  ;;  %v787_v15 = vmul.f32 %v2660_v1, %v274_v60  ;;  %1805 = vst [vmem:[%s2692_s24 + $0x1d0] sm:$0xff] %v1293_v6  ;;  %1806 = vst [vmem:[%s2692_s24 + $0x1d8] sm:$0xff] %v1294_v7  ;;  %v788_v18 = vmul.f32 %v2660_v1, %v275_v3  ;;  %v296_v0 = vld [vmem:[%s2653_s13 + $0x2b8] sm:$0xff]  ;;  %v297_v7 = vld [vmem:[%s2653_s13 + $0x2c0] sm:$0xff] }
  0x76   : > { %1807 = vst [vmem:[%s2692_s24 + $0x1e0] sm:$0xff] %v1295_v8  ;;  %v1298_v17 = vadd.f32 %v2662_v2, %v785_v9  ;;  %v789_v19 = vmul.f32 %v2660_v1, %v276_v4  ;;  %v790_v20 = vmul.f32 %v2660_v1, %v277_v5  ;;  %1808 = vst [vmem:[%s2692_s24 + $0x1e8] sm:$0xff] %v1296_v12  ;;  %v298_v8 = vld [vmem:[%s2653_s13 + $0x2c8] sm:$0xff] }
  0x77   : > { %1809 = vst [vmem:[%s2692_s24 + $0x1f0] sm:$0xff] %v1297_v13  ;;  %v1299_v23 = vadd.f32 %v2662_v2, %v786_v14  ;;  %v1300_v24 = vadd.f32 %v2662_v2, %v787_v15  ;;  %v791_v25 = vmul.f32 %v2660_v1, %v278_v10  ;;  %v792_v26 = vmul.f32 %v2660_v1, %v279_v11  ;;  %v299_v13 = vld [vmem:[%s2653_s13 + $0x2d0] sm:$0xff]  ;;  %v300_v14 = vld [vmem:[%s2653_s13 + $0x2d8] sm:$0xff]  ;;  %v301_v15 = vld [vmem:[%s2653_s13 + $0x2e0] sm:$0xff] }
  0x78   : > { %1810 = vst [vmem:[%s2692_s24 + $0x1f8] sm:$0xff] %v1298_v17  ;;  %v1301_v30 = vadd.f32 %v2662_v2, %v788_v18  ;;  %v1302_v31 = vadd.f32 %v2662_v2, %v789_v19  ;;  %v1303_v32 = vadd.f32 %v2662_v2, %v790_v20  ;;  %v793_v33 = vmul.f32 %v2660_v1, %v280_v16  ;;  %v302_v20 = vld [vmem:[%s2653_s13 + $0x2e8] sm:$0xff] }
  0x79   : > { %1811 = vst [vmem:[%s2692_s24 + $0x200] sm:$0xff] %v1299_v23  ;;  %1812 = vst [vmem:[%s2692_s24 + $0x208] sm:$0xff] %v1300_v24  ;;  %v1304_v36 = vadd.f32 %v2662_v2, %v791_v25  ;;  %v1305_v37 = vadd.f32 %v2662_v2, %v792_v26  ;;  %v794_v38 = vmul.f32 %v2660_v1, %v281_v21  ;;  %v303_v21 = vld [vmem:[%s2653_s13 + $0x2f0] sm:$0xff]  ;;  %v304_v26 = vld [vmem:[%s2653_s13 + $0x2f8] sm:$0xff] }
  0x7a   : > { %v795_v39 = vmul.f32 %v2660_v1, %v282_v22  ;;  %1813 = vst [vmem:[%s2692_s24 + $0x210] sm:$0xff] %v1301_v30  ;;  %1814 = vst [vmem:[%s2692_s24 + $0x218] sm:$0xff] %v1302_v31  ;;  %v1306_v41 = vadd.f32 %v2662_v2, %v793_v33  ;;  %v796_v42 = vmul.f32 %v2660_v1, %v283_v27  ;;  %v305_v31 = vld [vmem:[%s2653_s13 + $0x300] sm:$0xff] }
  0x7b   : > { %1815 = vst [vmem:[%s2692_s24 + $0x220] sm:$0xff] %v1303_v32  ;;  %v797_v43 = vmul.f32 %v2660_v1, %v284_v28  ;;  %v798_v44 = vmul.f32 %v2660_v1, %v285_v29  ;;  %1816 = vst [vmem:[%s2692_s24 + $0x228] sm:$0xff] %v1304_v36  ;;  %v1307_v47 = vadd.f32 %v2662_v2, %v794_v38  ;;  %v306_v32 = vld [vmem:[%s2653_s13 + $0x308] sm:$0xff]  ;;  %v308_v38 = vld [vmem:[%s2653_s13 + $0x318] sm:$0xff] }
  0x7c   : > { %1817 = vst [vmem:[%s2692_s24 + $0x230] sm:$0xff] %v1305_v37  ;;  %v1308_v48 = vadd.f32 %v2662_v2, %v795_v39  ;;  %v799_v49 = vmul.f32 %v2660_v1, %v286_v34  ;;  %v800_v50 = vmul.f32 %v2660_v1, %v287_v35  ;;  %1818 = vst [vmem:[%s2692_s24 + $0x238] sm:$0xff] %v1306_v41  ;;  %v307_v37 = vld [vmem:[%s2653_s13 + $0x310] sm:$0xff]  ;;  %v309_v39 = vld [vmem:[%s2653_s13 + $0x320] sm:$0xff] }
  0x7d   : > { %v1309_v54 = vadd.f32 %v2662_v2, %v796_v42  ;;  %v1310_v55 = vadd.f32 %v2662_v2, %v797_v43  ;;  %v1311_v56 = vadd.f32 %v2662_v2, %v798_v44  ;;  %v801_v57 = vmul.f32 %v2660_v1, %v288_v40  ;;  %1819 = vst [vmem:[%s2692_s24 + $0x240] sm:$0xff] %v1307_v47  ;;  %v310_v44 = vld [vmem:[%s2653_s13 + $0x328] sm:$0xff] }
  0x7e   : > { %1820 = vst [vmem:[%s2692_s24 + $0x248] sm:$0xff] %v1308_v48  ;;  %v1312_v60 = vadd.f32 %v2662_v2, %v799_v49  ;;  %v1313_v61 = vadd.f32 %v2662_v2, %v800_v50  ;;  %v802_v62 = vmul.f32 %v2660_v1, %v289_v45  ;;  %v803_v63 = vmul.f32 %v2660_v1, %v290_v46  ;;  %v311_v45 = vld [vmem:[%s2653_s13 + $0x330] sm:$0xff]  ;;  %v312_v50 = vld [vmem:[%s2653_s13 + $0x338] sm:$0xff] }
  0x7f   : > { %1821 = vst [vmem:[%s2692_s24 + $0x250] sm:$0xff] %v1309_v54  ;;  %1822 = vst [vmem:[%s2692_s24 + $0x258] sm:$0xff] %v1310_v55  ;;  %v1314_v3 = vadd.f32 %v2662_v2, %v801_v57  ;;  %v804_v4 = vmul.f32 %v2660_v1, %v291_v51  ;;  %v805_v5 = vmul.f32 %v2660_v1, %v292_v52  ;;  %v313_v55 = vld [vmem:[%s2653_s13 + $0x340] sm:$0xff] }
  0x80   : > { %1823 = vst [vmem:[%s2692_s24 + $0x260] sm:$0xff] %v1311_v56  ;;  %v806_v6 = vmul.f32 %v2660_v1, %v293_v53  ;;  %1824 = vst [vmem:[%s2692_s24 + $0x268] sm:$0xff] %v1312_v60  ;;  %v1315_v9 = vadd.f32 %v2662_v2, %v802_v62  ;;  %v1316_v10 = vadd.f32 %v2662_v2, %v803_v63  ;;  %v314_v56 = vld [vmem:[%s2653_s13 + $0x348] sm:$0xff]  ;;  %v316_v62 = vld [vmem:[%s2653_s13 + $0x358] sm:$0xff] }
  0x81   : > { %1825 = vst [vmem:[%s2692_s24 + $0x270] sm:$0xff] %v1313_v61  ;;  %v807_v11 = vmul.f32 %v2660_v1, %v294_v58  ;;  %v808_v12 = vmul.f32 %v2660_v1, %v295_v59  ;;  %1826 = vst [vmem:[%s2692_s24 + $0x278] sm:$0xff] %v1314_v3  ;;  %v1317_v16 = vadd.f32 %v2662_v2, %v804_v4  ;;  %v315_v61 = vld [vmem:[%s2653_s13 + $0x350] sm:$0xff]  ;;  %v317_v63 = vld [vmem:[%s2653_s13 + $0x360] sm:$0xff] }
  0x82   : > { %v1318_v17 = vadd.f32 %v2662_v2, %v805_v5  ;;  %v1319_v18 = vadd.f32 %v2662_v2, %v806_v6  ;;  %v809_v19 = vmul.f32 %v2660_v1, %v296_v0  ;;  %1827 = vst [vmem:[%s2692_s24 + $0x280] sm:$0xff] %v1315_v9  ;;  %1828 = vst [vmem:[%s2692_s24 + $0x288] sm:$0xff] %v1316_v10  ;;  %v318_v6 = vld [vmem:[%s2653_s13 + $0x368] sm:$0xff] }
  0x83   : > { %v1320_v22 = vadd.f32 %v2662_v2, %v807_v11  ;;  %v1321_v23 = vadd.f32 %v2662_v2, %v808_v12  ;;  %v810_v24 = vmul.f32 %v2660_v1, %v297_v7  ;;  %v811_v25 = vmul.f32 %v2660_v1, %v298_v8  ;;  %1829 = vst [vmem:[%s2692_s24 + $0x290] sm:$0xff] %v1317_v16  ;;  %v319_v7 = vld [vmem:[%s2653_s13 + $0x370] sm:$0xff]  ;;  %v320_v12 = vld [vmem:[%s2653_s13 + $0x378] sm:$0xff] }
  0x84   : > { %1830 = vst [vmem:[%s2692_s24 + $0x298] sm:$0xff] %v1318_v17  ;;  %1831 = vst [vmem:[%s2692_s24 + $0x2a0] sm:$0xff] %v1319_v18  ;;  %v1322_v27 = vadd.f32 %v2662_v2, %v809_v19  ;;  %v812_v28 = vmul.f32 %v2660_v1, %v299_v13  ;;  %v813_v29 = vmul.f32 %v2660_v1, %v300_v14  ;;  %v321_v17 = vld [vmem:[%s2653_s13 + $0x380] sm:$0xff]  ;;  %v322_v18 = vld [vmem:[%s2653_s13 + $0x388] sm:$0xff] }
  0x85   : > { %v814_v30 = vmul.f32 %v2660_v1, %v301_v15  ;;  %1832 = vst [vmem:[%s2692_s24 + $0x2a8] sm:$0xff] %v1320_v22  ;;  %1833 = vst [vmem:[%s2692_s24 + $0x2b0] sm:$0xff] %v1321_v23  ;;  %v1323_v33 = vadd.f32 %v2662_v2, %v810_v24  ;;  %v1324_v34 = vadd.f32 %v2662_v2, %v811_v25  ;;  %v323_v23 = vld [vmem:[%s2653_s13 + $0x390] sm:$0xff]  ;;  %v324_v24 = vld [vmem:[%s2653_s13 + $0x398] sm:$0xff] }
  0x86   : > { %v815_v35 = vmul.f32 %v2660_v1, %v302_v20  ;;  %v816_v36 = vmul.f32 %v2660_v1, %v303_v21  ;;  %1834 = vst [vmem:[%s2692_s24 + $0x2b8] sm:$0xff] %v1322_v27  ;;  %v1325_v40 = vadd.f32 %v2662_v2, %v812_v28  ;;  %v1326_v41 = vadd.f32 %v2662_v2, %v813_v29  ;;  %v325_v25 = vld [vmem:[%s2653_s13 + $0x3a0] sm:$0xff] }
  0x87   : > { %v1327_v42 = vadd.f32 %v2662_v2, %v814_v30  ;;  %v817_v43 = vmul.f32 %v2660_v1, %v304_v26  ;;  %1835 = vst [vmem:[%s2692_s24 + $0x2c0] sm:$0xff] %v1323_v33  ;;  %1836 = vst [vmem:[%s2692_s24 + $0x2c8] sm:$0xff] %v1324_v34  ;;  %v818_v48 = vmul.f32 %v2660_v1, %v305_v31  ;;  %v326_v30 = vld [vmem:[%s2653_s13 + $0x3a8] sm:$0xff]  ;;  %v327_v31 = vld [vmem:[%s2653_s13 + $0x3b0] sm:$0xff] }
  0x88   : > { %v1328_v46 = vadd.f32 %v2662_v2, %v815_v35  ;;  %v1329_v47 = vadd.f32 %v2662_v2, %v816_v36  ;;  %v819_v49 = vmul.f32 %v2660_v1, %v306_v32  ;;  %1837 = vst [vmem:[%s2692_s24 + $0x2d0] sm:$0xff] %v1325_v40  ;;  %1838 = vst [vmem:[%s2692_s24 + $0x2d8] sm:$0xff] %v1326_v41  ;;  %v328_v36 = vld [vmem:[%s2653_s13 + $0x3b8] sm:$0xff]  ;;  %v329_v41 = vld [vmem:[%s2653_s13 + $0x3c0] sm:$0xff] }
  0x89   : > { %1839 = vst [vmem:[%s2692_s24 + $0x2e0] sm:$0xff] %v1327_v42  ;;  %v1330_v51 = vadd.f32 %v2662_v2, %v817_v43  ;;  %v820_v52 = vmul.f32 %v2660_v1, %v307_v37  ;;  %v821_v53 = vmul.f32 %v2660_v1, %v308_v38  ;;  %v822_v54 = vmul.f32 %v2660_v1, %v309_v39  ;;  %v330_v42 = vld [vmem:[%s2653_s13 + $0x3c8] sm:$0xff] }
  0x8a   : > { %1840 = vst [vmem:[%s2692_s24 + $0x2e8] sm:$0xff] %v1328_v46  ;;  %1841 = vst [vmem:[%s2692_s24 + $0x2f0] sm:$0xff] %v1329_v47  ;;  %v1331_v57 = vadd.f32 %v2662_v2, %v818_v48  ;;  %v1332_v58 = vadd.f32 %v2662_v2, %v819_v49  ;;  %v823_v59 = vmul.f32 %v2660_v1, %v310_v44  ;;  %v331_v47 = vld [vmem:[%s2653_s13 + $0x3d0] sm:$0xff]  ;;  %v332_v48 = vld [vmem:[%s2653_s13 + $0x3d8] sm:$0xff] }
  0x8b   : > { %v824_v60 = vmul.f32 %v2660_v1, %v311_v45  ;;  %1842 = vst [vmem:[%s2692_s24 + $0x2f8] sm:$0xff] %v1330_v51  ;;  %v1333_v0 = vadd.f32 %v2662_v2, %v820_v52  ;;  %v1334_v3 = vadd.f32 %v2662_v2, %v821_v53  ;;  %v1335_v4 = vadd.f32 %v2662_v2, %v822_v54  ;;  %v333_v49 = vld [vmem:[%s2653_s13 + $0x3e0] sm:$0xff]  ;;  %v334_v54 = vld [vmem:[%s2653_s13 + $0x3e8] sm:$0xff] }
  0x8c   : > { %v825_v5 = vmul.f32 %v2660_v1, %v312_v50  ;;  %1843 = vst [vmem:[%s2692_s24 + $0x300] sm:$0xff] %v1331_v57  ;;  %1844 = vst [vmem:[%s2692_s24 + $0x308] sm:$0xff] %v1332_v58  ;;  %v1336_v8 = vadd.f32 %v2662_v2, %v823_v59  ;;  %v826_v10 = vmul.f32 %v2660_v1, %v313_v55  ;;  %v335_v55 = vld [vmem:[%s2653_s13 + $0x3f0] sm:$0xff] }
  0x8d   : > { %v1337_v9 = vadd.f32 %v2662_v2, %v824_v60  ;;  %v827_v11 = vmul.f32 %v2660_v1, %v314_v56  ;;  %1845 = vst [vmem:[%s2692_s24 + $0x310] sm:$0xff] %v1333_v0  ;;  %1846 = vst [vmem:[%s2692_s24 + $0x318] sm:$0xff] %v1334_v3  ;;  %v828_v14 = vmul.f32 %v2660_v1, %v315_v61  ;;  %v336_v60 = vld [vmem:[%s2653_s13 + $0x3f8] sm:$0xff]  ;;  %v337_v3 = vld [vmem:[%s2653_s13 + $0x400] sm:$0xff] }
  0x8e   : > { %1847 = vst [vmem:[%s2692_s24 + $0x320] sm:$0xff] %v1335_v4  ;;  %v1338_v13 = vadd.f32 %v2662_v2, %v825_v5  ;;  %v829_v15 = vmul.f32 %v2660_v1, %v316_v62  ;;  %v830_v16 = vmul.f32 %v2660_v1, %v317_v63  ;;  %1848 = vst [vmem:[%s2692_s24 + $0x328] sm:$0xff] %v1336_v8  ;;  %v338_v4 = vld [vmem:[%s2653_s13 + $0x408] sm:$0xff] }
  0x8f   : > { %1849 = vst [vmem:[%s2692_s24 + $0x330] sm:$0xff] %v1337_v9  ;;  %v1339_v19 = vadd.f32 %v2662_v2, %v826_v10  ;;  %v1340_v20 = vadd.f32 %v2662_v2, %v827_v11  ;;  %v831_v21 = vmul.f32 %v2660_v1, %v318_v6  ;;  %v832_v22 = vmul.f32 %v2660_v1, %v319_v7  ;;  %v339_v9 = vld [vmem:[%s2653_s13 + $0x410] sm:$0xff]  ;;  %v340_v10 = vld [vmem:[%s2653_s13 + $0x418] sm:$0xff]  ;;  %v341_v11 = vld [vmem:[%s2653_s13 + $0x420] sm:$0xff] }
  0x90   : > { %1850 = vst [vmem:[%s2692_s24 + $0x338] sm:$0xff] %v1338_v13  ;;  %v1341_v26 = vadd.f32 %v2662_v2, %v828_v14  ;;  %v1342_v27 = vadd.f32 %v2662_v2, %v829_v15  ;;  %v1343_v28 = vadd.f32 %v2662_v2, %v830_v16  ;;  %v833_v29 = vmul.f32 %v2660_v1, %v320_v12  ;;  %v342_v16 = vld [vmem:[%s2653_s13 + $0x428] sm:$0xff] }
  0x91   : > { %1851 = vst [vmem:[%s2692_s24 + $0x340] sm:$0xff] %v1339_v19  ;;  %1852 = vst [vmem:[%s2692_s24 + $0x348] sm:$0xff] %v1340_v20  ;;  %v1344_v32 = vadd.f32 %v2662_v2, %v831_v21  ;;  %v1345_v33 = vadd.f32 %v2662_v2, %v832_v22  ;;  %v834_v34 = vmul.f32 %v2660_v1, %v321_v17  ;;  %v343_v17 = vld [vmem:[%s2653_s13 + $0x430] sm:$0xff]  ;;  %v344_v22 = vld [vmem:[%s2653_s13 + $0x438] sm:$0xff] }
  0x92   : > { %v835_v35 = vmul.f32 %v2660_v1, %v322_v18  ;;  %1853 = vst [vmem:[%s2692_s24 + $0x350] sm:$0xff] %v1341_v26  ;;  %1854 = vst [vmem:[%s2692_s24 + $0x358] sm:$0xff] %v1342_v27  ;;  %v1346_v37 = vadd.f32 %v2662_v2, %v833_v29  ;;  %v836_v38 = vmul.f32 %v2660_v1, %v323_v23  ;;  %v345_v27 = vld [vmem:[%s2653_s13 + $0x440] sm:$0xff] }
  0x93   : > { %1855 = vst [vmem:[%s2692_s24 + $0x360] sm:$0xff] %v1343_v28  ;;  %v837_v39 = vmul.f32 %v2660_v1, %v324_v24  ;;  %v838_v40 = vmul.f32 %v2660_v1, %v325_v25  ;;  %1856 = vst [vmem:[%s2692_s24 + $0x368] sm:$0xff] %v1344_v32  ;;  %v1347_v43 = vadd.f32 %v2662_v2, %v834_v34  ;;  %v346_v28 = vld [vmem:[%s2653_s13 + $0x448] sm:$0xff]  ;;  %v348_v34 = vld [vmem:[%s2653_s13 + $0x458] sm:$0xff] }
  0x94   : > { %1857 = vst [vmem:[%s2692_s24 + $0x370] sm:$0xff] %v1345_v33  ;;  %v1348_v44 = vadd.f32 %v2662_v2, %v835_v35  ;;  %v839_v45 = vmul.f32 %v2660_v1, %v326_v30  ;;  %v840_v46 = vmul.f32 %v2660_v1, %v327_v31  ;;  %1858 = vst [vmem:[%s2692_s24 + $0x378] sm:$0xff] %v1346_v37  ;;  %v347_v33 = vld [vmem:[%s2653_s13 + $0x450] sm:$0xff]  ;;  %v349_v35 = vld [vmem:[%s2653_s13 + $0x460] sm:$0xff] }
  0x95   : > { %v1349_v50 = vadd.f32 %v2662_v2, %v836_v38  ;;  %v1350_v51 = vadd.f32 %v2662_v2, %v837_v39  ;;  %v1351_v52 = vadd.f32 %v2662_v2, %v838_v40  ;;  %v841_v53 = vmul.f32 %v2660_v1, %v328_v36  ;;  %1859 = vst [vmem:[%s2692_s24 + $0x380] sm:$0xff] %v1347_v43  ;;  %v350_v40 = vld [vmem:[%s2653_s13 + $0x468] sm:$0xff] }
  0x96   : > { %1860 = vst [vmem:[%s2692_s24 + $0x388] sm:$0xff] %v1348_v44  ;;  %v1352_v56 = vadd.f32 %v2662_v2, %v839_v45  ;;  %v1353_v57 = vadd.f32 %v2662_v2, %v840_v46  ;;  %v842_v58 = vmul.f32 %v2660_v1, %v329_v41  ;;  %v843_v59 = vmul.f32 %v2660_v1, %v330_v42  ;;  %v351_v41 = vld [vmem:[%s2653_s13 + $0x470] sm:$0xff]  ;;  %v352_v46 = vld [vmem:[%s2653_s13 + $0x478] sm:$0xff] }
  0x97   : > { %1861 = vst [vmem:[%s2692_s24 + $0x390] sm:$0xff] %v1349_v50  ;;  %1862 = vst [vmem:[%s2692_s24 + $0x398] sm:$0xff] %v1350_v51  ;;  %v1354_v61 = vadd.f32 %v2662_v2, %v841_v53  ;;  %v844_v62 = vmul.f32 %v2660_v1, %v331_v47  ;;  %v845_v63 = vmul.f32 %v2660_v1, %v332_v48  ;;  %v353_v51 = vld [vmem:[%s2653_s13 + $0x480] sm:$0xff] }
  0x98   : > { %1863 = vst [vmem:[%s2692_s24 + $0x3a0] sm:$0xff] %v1351_v52  ;;  %v846_v0 = vmul.f32 %v2660_v1, %v333_v49  ;;  %1864 = vst [vmem:[%s2692_s24 + $0x3a8] sm:$0xff] %v1352_v56  ;;  %v1355_v5 = vadd.f32 %v2662_v2, %v842_v58  ;;  %v1356_v6 = vadd.f32 %v2662_v2, %v843_v59  ;;  %v354_v52 = vld [vmem:[%s2653_s13 + $0x488] sm:$0xff]  ;;  %v356_v58 = vld [vmem:[%s2653_s13 + $0x498] sm:$0xff] }
  0x99   : > { %1865 = vst [vmem:[%s2692_s24 + $0x3b0] sm:$0xff] %v1353_v57  ;;  %v847_v7 = vmul.f32 %v2660_v1, %v334_v54  ;;  %v848_v8 = vmul.f32 %v2660_v1, %v335_v55  ;;  %1866 = vst [vmem:[%s2692_s24 + $0x3b8] sm:$0xff] %v1354_v61  ;;  %v1357_v12 = vadd.f32 %v2662_v2, %v844_v62  ;;  %v355_v57 = vld [vmem:[%s2653_s13 + $0x490] sm:$0xff]  ;;  %v357_v59 = vld [vmem:[%s2653_s13 + $0x4a0] sm:$0xff] }
  0x9a   : > { %v1358_v13 = vadd.f32 %v2662_v2, %v845_v63  ;;  %v1359_v14 = vadd.f32 %v2662_v2, %v846_v0  ;;  %v849_v15 = vmul.f32 %v2660_v1, %v336_v60  ;;  %1867 = vst [vmem:[%s2692_s24 + $0x3c0] sm:$0xff] %v1355_v5  ;;  %1868 = vst [vmem:[%s2692_s24 + $0x3c8] sm:$0xff] %v1356_v6  ;;  %v358_v0 = vld [vmem:[%s2653_s13 + $0x4a8] sm:$0xff] }
  0x9b   : > { %v1360_v18 = vadd.f32 %v2662_v2, %v847_v7  ;;  %v1361_v19 = vadd.f32 %v2662_v2, %v848_v8  ;;  %v850_v20 = vmul.f32 %v2660_v1, %v337_v3  ;;  %v851_v21 = vmul.f32 %v2660_v1, %v338_v4  ;;  %1869 = vst [vmem:[%s2692_s24 + $0x3d0] sm:$0xff] %v1357_v12  ;;  %v359_v3 = vld [vmem:[%s2653_s13 + $0x4b0] sm:$0xff]  ;;  %v360_v8 = vld [vmem:[%s2653_s13 + $0x4b8] sm:$0xff] }
  0x9c   : > { %1870 = vst [vmem:[%s2692_s24 + $0x3d8] sm:$0xff] %v1358_v13  ;;  %1871 = vst [vmem:[%s2692_s24 + $0x3e0] sm:$0xff] %v1359_v14  ;;  %v1362_v23 = vadd.f32 %v2662_v2, %v849_v15  ;;  %v852_v24 = vmul.f32 %v2660_v1, %v339_v9  ;;  %v853_v25 = vmul.f32 %v2660_v1, %v340_v10  ;;  %v361_v13 = vld [vmem:[%s2653_s13 + $0x4c0] sm:$0xff]  ;;  %v362_v14 = vld [vmem:[%s2653_s13 + $0x4c8] sm:$0xff] }
  0x9d   : > { %v854_v26 = vmul.f32 %v2660_v1, %v341_v11  ;;  %1872 = vst [vmem:[%s2692_s24 + $0x3e8] sm:$0xff] %v1360_v18  ;;  %1873 = vst [vmem:[%s2692_s24 + $0x3f0] sm:$0xff] %v1361_v19  ;;  %v1363_v29 = vadd.f32 %v2662_v2, %v850_v20  ;;  %v1364_v30 = vadd.f32 %v2662_v2, %v851_v21  ;;  %v363_v19 = vld [vmem:[%s2653_s13 + $0x4d0] sm:$0xff]  ;;  %v364_v20 = vld [vmem:[%s2653_s13 + $0x4d8] sm:$0xff] }
  0x9e   : > { %v855_v31 = vmul.f32 %v2660_v1, %v342_v16  ;;  %v856_v32 = vmul.f32 %v2660_v1, %v343_v17  ;;  %1874 = vst [vmem:[%s2692_s24 + $0x3f8] sm:$0xff] %v1362_v23  ;;  %v1365_v36 = vadd.f32 %v2662_v2, %v852_v24  ;;  %v1366_v37 = vadd.f32 %v2662_v2, %v853_v25  ;;  %v365_v21 = vld [vmem:[%s2653_s13 + $0x4e0] sm:$0xff] }
  0x9f   : > { %v1367_v38 = vadd.f32 %v2662_v2, %v854_v26  ;;  %v857_v39 = vmul.f32 %v2660_v1, %v344_v22  ;;  %1875 = vst [vmem:[%s2692_s24 + $0x400] sm:$0xff] %v1363_v29  ;;  %1876 = vst [vmem:[%s2692_s24 + $0x408] sm:$0xff] %v1364_v30  ;;  %v858_v44 = vmul.f32 %v2660_v1, %v345_v27  ;;  %v366_v26 = vld [vmem:[%s2653_s13 + $0x4e8] sm:$0xff]  ;;  %v367_v27 = vld [vmem:[%s2653_s13 + $0x4f0] sm:$0xff] }
  0xa0   : > { %v1368_v42 = vadd.f32 %v2662_v2, %v855_v31  ;;  %v1369_v43 = vadd.f32 %v2662_v2, %v856_v32  ;;  %v859_v45 = vmul.f32 %v2660_v1, %v346_v28  ;;  %1877 = vst [vmem:[%s2692_s24 + $0x410] sm:$0xff] %v1365_v36  ;;  %1878 = vst [vmem:[%s2692_s24 + $0x418] sm:$0xff] %v1366_v37  ;;  %v368_v32 = vld [vmem:[%s2653_s13 + $0x4f8] sm:$0xff]  ;;  %v369_v37 = vld [vmem:[%s2653_s13 + $0x500] sm:$0xff] }
  0xa1   : > { %1879 = vst [vmem:[%s2692_s24 + $0x420] sm:$0xff] %v1367_v38  ;;  %v1370_v47 = vadd.f32 %v2662_v2, %v857_v39  ;;  %v860_v48 = vmul.f32 %v2660_v1, %v347_v33  ;;  %v861_v49 = vmul.f32 %v2660_v1, %v348_v34  ;;  %v862_v50 = vmul.f32 %v2660_v1, %v349_v35  ;;  %v370_v38 = vld [vmem:[%s2653_s13 + $0x508] sm:$0xff] }
  0xa2   : > { %1880 = vst [vmem:[%s2692_s24 + $0x428] sm:$0xff] %v1368_v42  ;;  %1881 = vst [vmem:[%s2692_s24 + $0x430] sm:$0xff] %v1369_v43  ;;  %v1371_v53 = vadd.f32 %v2662_v2, %v858_v44  ;;  %v1372_v54 = vadd.f32 %v2662_v2, %v859_v45  ;;  %v863_v55 = vmul.f32 %v2660_v1, %v350_v40  ;;  %v371_v43 = vld [vmem:[%s2653_s13 + $0x510] sm:$0xff]  ;;  %v372_v44 = vld [vmem:[%s2653_s13 + $0x518] sm:$0xff] }
  0xa3   : > { %v864_v56 = vmul.f32 %v2660_v1, %v351_v41  ;;  %1882 = vst [vmem:[%s2692_s24 + $0x438] sm:$0xff] %v1370_v47  ;;  %v1373_v60 = vadd.f32 %v2662_v2, %v860_v48  ;;  %v1374_v61 = vadd.f32 %v2662_v2, %v861_v49  ;;  %v1375_v62 = vadd.f32 %v2662_v2, %v862_v50  ;;  %v373_v45 = vld [vmem:[%s2653_s13 + $0x520] sm:$0xff]  ;;  %v374_v50 = vld [vmem:[%s2653_s13 + $0x528] sm:$0xff] }
  0xa4   : > { %v865_v63 = vmul.f32 %v2660_v1, %v352_v46  ;;  %1883 = vst [vmem:[%s2692_s24 + $0x440] sm:$0xff] %v1371_v53  ;;  %1884 = vst [vmem:[%s2692_s24 + $0x448] sm:$0xff] %v1372_v54  ;;  %v1376_v4 = vadd.f32 %v2662_v2, %v863_v55  ;;  %v866_v6 = vmul.f32 %v2660_v1, %v353_v51  ;;  %v375_v51 = vld [vmem:[%s2653_s13 + $0x530] sm:$0xff] }
  0xa5   : > { %v1377_v5 = vadd.f32 %v2662_v2, %v864_v56  ;;  %v867_v7 = vmul.f32 %v2660_v1, %v354_v52  ;;  %1885 = vst [vmem:[%s2692_s24 + $0x450] sm:$0xff] %v1373_v60  ;;  %1886 = vst [vmem:[%s2692_s24 + $0x458] sm:$0xff] %v1374_v61  ;;  %v868_v10 = vmul.f32 %v2660_v1, %v355_v57  ;;  %v376_v56 = vld [vmem:[%s2653_s13 + $0x538] sm:$0xff]  ;;  %v377_v61 = vld [vmem:[%s2653_s13 + $0x540] sm:$0xff] }
  0xa6   : > { %1887 = vst [vmem:[%s2692_s24 + $0x460] sm:$0xff] %v1375_v62  ;;  %v1378_v9 = vadd.f32 %v2662_v2, %v865_v63  ;;  %v869_v11 = vmul.f32 %v2660_v1, %v356_v58  ;;  %v870_v12 = vmul.f32 %v2660_v1, %v357_v59  ;;  %1888 = vst [vmem:[%s2692_s24 + $0x468] sm:$0xff] %v1376_v4  ;;  %v378_v62 = vld [vmem:[%s2653_s13 + $0x548] sm:$0xff] }
  0xa7   : > { %1889 = vst [vmem:[%s2692_s24 + $0x470] sm:$0xff] %v1377_v5  ;;  %v1379_v15 = vadd.f32 %v2662_v2, %v866_v6  ;;  %v1380_v16 = vadd.f32 %v2662_v2, %v867_v7  ;;  %v871_v17 = vmul.f32 %v2660_v1, %v358_v0  ;;  %v872_v18 = vmul.f32 %v2660_v1, %v359_v3  ;;  %v379_v5 = vld [vmem:[%s2653_s13 + $0x550] sm:$0xff]  ;;  %v380_v6 = vld [vmem:[%s2653_s13 + $0x558] sm:$0xff]  ;;  %v381_v7 = vld [vmem:[%s2653_s13 + $0x560] sm:$0xff] }
  0xa8   : > { %1890 = vst [vmem:[%s2692_s24 + $0x478] sm:$0xff] %v1378_v9  ;;  %v1381_v22 = vadd.f32 %v2662_v2, %v868_v10  ;;  %v1382_v23 = vadd.f32 %v2662_v2, %v869_v11  ;;  %v1383_v24 = vadd.f32 %v2662_v2, %v870_v12  ;;  %v873_v25 = vmul.f32 %v2660_v1, %v360_v8  ;;  %v382_v12 = vld [vmem:[%s2653_s13 + $0x568] sm:$0xff] }
  0xa9   : > { %1891 = vst [vmem:[%s2692_s24 + $0x480] sm:$0xff] %v1379_v15  ;;  %1892 = vst [vmem:[%s2692_s24 + $0x488] sm:$0xff] %v1380_v16  ;;  %v1384_v28 = vadd.f32 %v2662_v2, %v871_v17  ;;  %v1385_v29 = vadd.f32 %v2662_v2, %v872_v18  ;;  %v874_v30 = vmul.f32 %v2660_v1, %v361_v13  ;;  %v383_v13 = vld [vmem:[%s2653_s13 + $0x570] sm:$0xff]  ;;  %v384_v18 = vld [vmem:[%s2653_s13 + $0x578] sm:$0xff] }
  0xaa   : > { %v875_v31 = vmul.f32 %v2660_v1, %v362_v14  ;;  %1893 = vst [vmem:[%s2692_s24 + $0x490] sm:$0xff] %v1381_v22  ;;  %1894 = vst [vmem:[%s2692_s24 + $0x498] sm:$0xff] %v1382_v23  ;;  %v1386_v33 = vadd.f32 %v2662_v2, %v873_v25  ;;  %v876_v34 = vmul.f32 %v2660_v1, %v363_v19  ;;  %v385_v23 = vld [vmem:[%s2653_s13 + $0x580] sm:$0xff] }
  0xab   : > { %1895 = vst [vmem:[%s2692_s24 + $0x4a0] sm:$0xff] %v1383_v24  ;;  %v877_v35 = vmul.f32 %v2660_v1, %v364_v20  ;;  %v878_v36 = vmul.f32 %v2660_v1, %v365_v21  ;;  %1896 = vst [vmem:[%s2692_s24 + $0x4a8] sm:$0xff] %v1384_v28  ;;  %v1387_v39 = vadd.f32 %v2662_v2, %v874_v30  ;;  %v386_v24 = vld [vmem:[%s2653_s13 + $0x588] sm:$0xff]  ;;  %v388_v30 = vld [vmem:[%s2653_s13 + $0x598] sm:$0xff] }
  0xac   : > { %1897 = vst [vmem:[%s2692_s24 + $0x4b0] sm:$0xff] %v1385_v29  ;;  %v1388_v40 = vadd.f32 %v2662_v2, %v875_v31  ;;  %v879_v41 = vmul.f32 %v2660_v1, %v366_v26  ;;  %v880_v42 = vmul.f32 %v2660_v1, %v367_v27  ;;  %1898 = vst [vmem:[%s2692_s24 + $0x4b8] sm:$0xff] %v1386_v33  ;;  %v387_v29 = vld [vmem:[%s2653_s13 + $0x590] sm:$0xff]  ;;  %v389_v31 = vld [vmem:[%s2653_s13 + $0x5a0] sm:$0xff] }
  0xad   : > { %v1389_v46 = vadd.f32 %v2662_v2, %v876_v34  ;;  %v1390_v47 = vadd.f32 %v2662_v2, %v877_v35  ;;  %v1391_v48 = vadd.f32 %v2662_v2, %v878_v36  ;;  %v881_v49 = vmul.f32 %v2660_v1, %v368_v32  ;;  %1899 = vst [vmem:[%s2692_s24 + $0x4c0] sm:$0xff] %v1387_v39  ;;  %v390_v36 = vld [vmem:[%s2653_s13 + $0x5a8] sm:$0xff] }
  0xae   : > { %1900 = vst [vmem:[%s2692_s24 + $0x4c8] sm:$0xff] %v1388_v40  ;;  %v1392_v52 = vadd.f32 %v2662_v2, %v879_v41  ;;  %v1393_v53 = vadd.f32 %v2662_v2, %v880_v42  ;;  %v882_v54 = vmul.f32 %v2660_v1, %v369_v37  ;;  %v883_v55 = vmul.f32 %v2660_v1, %v370_v38  ;;  %v391_v37 = vld [vmem:[%s2653_s13 + $0x5b0] sm:$0xff]  ;;  %v392_v42 = vld [vmem:[%s2653_s13 + $0x5b8] sm:$0xff] }
  0xaf   : > { %1901 = vst [vmem:[%s2692_s24 + $0x4d0] sm:$0xff] %v1389_v46  ;;  %1902 = vst [vmem:[%s2692_s24 + $0x4d8] sm:$0xff] %v1390_v47  ;;  %v1394_v57 = vadd.f32 %v2662_v2, %v881_v49  ;;  %v884_v58 = vmul.f32 %v2660_v1, %v371_v43  ;;  %v885_v59 = vmul.f32 %v2660_v1, %v372_v44  ;;  %v393_v47 = vld [vmem:[%s2653_s13 + $0x5c0] sm:$0xff] }
  0xb0   : > { %1903 = vst [vmem:[%s2692_s24 + $0x4e0] sm:$0xff] %v1391_v48  ;;  %v886_v60 = vmul.f32 %v2660_v1, %v373_v45  ;;  %1904 = vst [vmem:[%s2692_s24 + $0x4e8] sm:$0xff] %v1392_v52  ;;  %v1395_v63 = vadd.f32 %v2662_v2, %v882_v54  ;;  %v1396_v0 = vadd.f32 %v2662_v2, %v883_v55  ;;  %v394_v48 = vld [vmem:[%s2653_s13 + $0x5c8] sm:$0xff]  ;;  %v396_v54 = vld [vmem:[%s2653_s13 + $0x5d8] sm:$0xff] }
  0xb1   : > { %1905 = vst [vmem:[%s2692_s24 + $0x4f0] sm:$0xff] %v1393_v53  ;;  %v887_v3 = vmul.f32 %v2660_v1, %v374_v50  ;;  %v888_v4 = vmul.f32 %v2660_v1, %v375_v51  ;;  %1906 = vst [vmem:[%s2692_s24 + $0x4f8] sm:$0xff] %v1394_v57  ;;  %v1397_v8 = vadd.f32 %v2662_v2, %v884_v58  ;;  %v395_v53 = vld [vmem:[%s2653_s13 + $0x5d0] sm:$0xff]  ;;  %v397_v55 = vld [vmem:[%s2653_s13 + $0x5e0] sm:$0xff] }
  0xb2   : > { %v1398_v9 = vadd.f32 %v2662_v2, %v885_v59  ;;  %v1399_v10 = vadd.f32 %v2662_v2, %v886_v60  ;;  %v889_v11 = vmul.f32 %v2660_v1, %v376_v56  ;;  %1907 = vst [vmem:[%s2692_s24 + $0x500] sm:$0xff] %v1395_v63  ;;  %1908 = vst [vmem:[%s2692_s24 + $0x508] sm:$0xff] %v1396_v0  ;;  %v398_v60 = vld [vmem:[%s2653_s13 + $0x5e8] sm:$0xff] }
  0xb3   : > { %v1400_v14 = vadd.f32 %v2662_v2, %v887_v3  ;;  %v1401_v15 = vadd.f32 %v2662_v2, %v888_v4  ;;  %v890_v16 = vmul.f32 %v2660_v1, %v377_v61  ;;  %v891_v17 = vmul.f32 %v2660_v1, %v378_v62  ;;  %1909 = vst [vmem:[%s2692_s24 + $0x510] sm:$0xff] %v1397_v8  ;;  %v399_v61 = vld [vmem:[%s2653_s13 + $0x5f0] sm:$0xff]  ;;  %v400_v4 = vld [vmem:[%s2653_s13 + $0x5f8] sm:$0xff] }
  0xb4   : > { %1910 = vst [vmem:[%s2692_s24 + $0x518] sm:$0xff] %v1398_v9  ;;  %1911 = vst [vmem:[%s2692_s24 + $0x520] sm:$0xff] %v1399_v10  ;;  %v1402_v19 = vadd.f32 %v2662_v2, %v889_v11  ;;  %v892_v20 = vmul.f32 %v2660_v1, %v379_v5  ;;  %v893_v21 = vmul.f32 %v2660_v1, %v380_v6  ;;  %v401_v9 = vld [vmem:[%s2653_s13 + $0x600] sm:$0xff]  ;;  %v402_v10 = vld [vmem:[%s2653_s13 + $0x608] sm:$0xff] }
  0xb5   : > { %v894_v22 = vmul.f32 %v2660_v1, %v381_v7  ;;  %1912 = vst [vmem:[%s2692_s24 + $0x528] sm:$0xff] %v1400_v14  ;;  %1913 = vst [vmem:[%s2692_s24 + $0x530] sm:$0xff] %v1401_v15  ;;  %v1403_v25 = vadd.f32 %v2662_v2, %v890_v16  ;;  %v1404_v26 = vadd.f32 %v2662_v2, %v891_v17  ;;  %v403_v15 = vld [vmem:[%s2653_s13 + $0x610] sm:$0xff]  ;;  %v404_v16 = vld [vmem:[%s2653_s13 + $0x618] sm:$0xff] }
  0xb6   : > { %v895_v27 = vmul.f32 %v2660_v1, %v382_v12  ;;  %v896_v28 = vmul.f32 %v2660_v1, %v383_v13  ;;  %1914 = vst [vmem:[%s2692_s24 + $0x538] sm:$0xff] %v1402_v19  ;;  %v1405_v32 = vadd.f32 %v2662_v2, %v892_v20  ;;  %v1406_v33 = vadd.f32 %v2662_v2, %v893_v21  ;;  %v405_v17 = vld [vmem:[%s2653_s13 + $0x620] sm:$0xff] }
  0xb7   : > { %v1407_v34 = vadd.f32 %v2662_v2, %v894_v22  ;;  %v897_v35 = vmul.f32 %v2660_v1, %v384_v18  ;;  %1915 = vst [vmem:[%s2692_s24 + $0x540] sm:$0xff] %v1403_v25  ;;  %1916 = vst [vmem:[%s2692_s24 + $0x548] sm:$0xff] %v1404_v26  ;;  %v898_v40 = vmul.f32 %v2660_v1, %v385_v23  ;;  %v406_v22 = vld [vmem:[%s2653_s13 + $0x628] sm:$0xff]  ;;  %v407_v23 = vld [vmem:[%s2653_s13 + $0x630] sm:$0xff] }
  0xb8   : > { %v1408_v38 = vadd.f32 %v2662_v2, %v895_v27  ;;  %v1409_v39 = vadd.f32 %v2662_v2, %v896_v28  ;;  %v899_v41 = vmul.f32 %v2660_v1, %v386_v24  ;;  %1917 = vst [vmem:[%s2692_s24 + $0x550] sm:$0xff] %v1405_v32  ;;  %1918 = vst [vmem:[%s2692_s24 + $0x558] sm:$0xff] %v1406_v33  ;;  %v408_v28 = vld [vmem:[%s2653_s13 + $0x638] sm:$0xff]  ;;  %v409_v33 = vld [vmem:[%s2653_s13 + $0x640] sm:$0xff] }
  0xb9   : > { %1919 = vst [vmem:[%s2692_s24 + $0x560] sm:$0xff] %v1407_v34  ;;  %v1410_v43 = vadd.f32 %v2662_v2, %v897_v35  ;;  %v900_v44 = vmul.f32 %v2660_v1, %v387_v29  ;;  %v901_v45 = vmul.f32 %v2660_v1, %v388_v30  ;;  %v902_v46 = vmul.f32 %v2660_v1, %v389_v31  ;;  %v410_v34 = vld [vmem:[%s2653_s13 + $0x648] sm:$0xff] }
  0xba   : > { %1920 = vst [vmem:[%s2692_s24 + $0x568] sm:$0xff] %v1408_v38  ;;  %1921 = vst [vmem:[%s2692_s24 + $0x570] sm:$0xff] %v1409_v39  ;;  %v1411_v49 = vadd.f32 %v2662_v2, %v898_v40  ;;  %v1412_v50 = vadd.f32 %v2662_v2, %v899_v41  ;;  %v903_v51 = vmul.f32 %v2660_v1, %v390_v36  ;;  %v411_v39 = vld [vmem:[%s2653_s13 + $0x650] sm:$0xff]  ;;  %v412_v40 = vld [vmem:[%s2653_s13 + $0x658] sm:$0xff] }
  0xbb   : > { %v904_v52 = vmul.f32 %v2660_v1, %v391_v37  ;;  %1922 = vst [vmem:[%s2692_s24 + $0x578] sm:$0xff] %v1410_v43  ;;  %v1413_v56 = vadd.f32 %v2662_v2, %v900_v44  ;;  %v1414_v57 = vadd.f32 %v2662_v2, %v901_v45  ;;  %v1415_v58 = vadd.f32 %v2662_v2, %v902_v46  ;;  %v413_v41 = vld [vmem:[%s2653_s13 + $0x660] sm:$0xff]  ;;  %v414_v46 = vld [vmem:[%s2653_s13 + $0x668] sm:$0xff] }
  0xbc   : > { %v905_v59 = vmul.f32 %v2660_v1, %v392_v42  ;;  %1923 = vst [vmem:[%s2692_s24 + $0x580] sm:$0xff] %v1411_v49  ;;  %1924 = vst [vmem:[%s2692_s24 + $0x588] sm:$0xff] %v1412_v50  ;;  %v1416_v62 = vadd.f32 %v2662_v2, %v903_v51  ;;  %v906_v0 = vmul.f32 %v2660_v1, %v393_v47  ;;  %v415_v47 = vld [vmem:[%s2653_s13 + $0x670] sm:$0xff] }
  0xbd   : > { %v1417_v63 = vadd.f32 %v2662_v2, %v904_v52  ;;  %v907_v3 = vmul.f32 %v2660_v1, %v394_v48  ;;  %1925 = vst [vmem:[%s2692_s24 + $0x590] sm:$0xff] %v1413_v56  ;;  %1926 = vst [vmem:[%s2692_s24 + $0x598] sm:$0xff] %v1414_v57  ;;  %v908_v6 = vmul.f32 %v2660_v1, %v395_v53  ;;  %v416_v52 = vld [vmem:[%s2653_s13 + $0x678] sm:$0xff]  ;;  %v417_v57 = vld [vmem:[%s2653_s13 + $0x680] sm:$0xff] }
  0xbe   : > { %1927 = vst [vmem:[%s2692_s24 + $0x5a0] sm:$0xff] %v1415_v58  ;;  %v1418_v5 = vadd.f32 %v2662_v2, %v905_v59  ;;  %v909_v7 = vmul.f32 %v2660_v1, %v396_v54  ;;  %v910_v8 = vmul.f32 %v2660_v1, %v397_v55  ;;  %1928 = vst [vmem:[%s2692_s24 + $0x5a8] sm:$0xff] %v1416_v62  ;;  %v418_v58 = vld [vmem:[%s2653_s13 + $0x688] sm:$0xff] }
  0xbf   : > { %1929 = vst [vmem:[%s2692_s24 + $0x5b0] sm:$0xff] %v1417_v63  ;;  %v1419_v11 = vadd.f32 %v2662_v2, %v906_v0  ;;  %v1420_v12 = vadd.f32 %v2662_v2, %v907_v3  ;;  %v911_v13 = vmul.f32 %v2660_v1, %v398_v60  ;;  %v912_v14 = vmul.f32 %v2660_v1, %v399_v61  ;;  %v419_v63 = vld [vmem:[%s2653_s13 + $0x690] sm:$0xff]  ;;  %v420_v0 = vld [vmem:[%s2653_s13 + $0x698] sm:$0xff]  ;;  %v421_v3 = vld [vmem:[%s2653_s13 + $0x6a0] sm:$0xff] }
  0xc0   : > { %1930 = vst [vmem:[%s2692_s24 + $0x5b8] sm:$0xff] %v1418_v5  ;;  %v1421_v18 = vadd.f32 %v2662_v2, %v908_v6  ;;  %v1422_v19 = vadd.f32 %v2662_v2, %v909_v7  ;;  %v1423_v20 = vadd.f32 %v2662_v2, %v910_v8  ;;  %v913_v21 = vmul.f32 %v2660_v1, %v400_v4  ;;  %v422_v8 = vld [vmem:[%s2653_s13 + $0x6a8] sm:$0xff] }
  0xc1   : > { %1931 = vst [vmem:[%s2692_s24 + $0x5c0] sm:$0xff] %v1419_v11  ;;  %1932 = vst [vmem:[%s2692_s24 + $0x5c8] sm:$0xff] %v1420_v12  ;;  %v1424_v24 = vadd.f32 %v2662_v2, %v911_v13  ;;  %v1425_v25 = vadd.f32 %v2662_v2, %v912_v14  ;;  %v914_v26 = vmul.f32 %v2660_v1, %v401_v9  ;;  %v423_v9 = vld [vmem:[%s2653_s13 + $0x6b0] sm:$0xff]  ;;  %v424_v14 = vld [vmem:[%s2653_s13 + $0x6b8] sm:$0xff] }
  0xc2   : > { %v915_v27 = vmul.f32 %v2660_v1, %v402_v10  ;;  %1933 = vst [vmem:[%s2692_s24 + $0x5d0] sm:$0xff] %v1421_v18  ;;  %1934 = vst [vmem:[%s2692_s24 + $0x5d8] sm:$0xff] %v1422_v19  ;;  %v1426_v29 = vadd.f32 %v2662_v2, %v913_v21  ;;  %v916_v30 = vmul.f32 %v2660_v1, %v403_v15  ;;  %v425_v19 = vld [vmem:[%s2653_s13 + $0x6c0] sm:$0xff] }
  0xc3   : > { %1935 = vst [vmem:[%s2692_s24 + $0x5e0] sm:$0xff] %v1423_v20  ;;  %v917_v31 = vmul.f32 %v2660_v1, %v404_v16  ;;  %v918_v32 = vmul.f32 %v2660_v1, %v405_v17  ;;  %1936 = vst [vmem:[%s2692_s24 + $0x5e8] sm:$0xff] %v1424_v24  ;;  %v1427_v35 = vadd.f32 %v2662_v2, %v914_v26  ;;  %v426_v20 = vld [vmem:[%s2653_s13 + $0x6c8] sm:$0xff]  ;;  %v428_v26 = vld [vmem:[%s2653_s13 + $0x6d8] sm:$0xff] }
  0xc4   : > { %1937 = vst [vmem:[%s2692_s24 + $0x5f0] sm:$0xff] %v1425_v25  ;;  %v1428_v36 = vadd.f32 %v2662_v2, %v915_v27  ;;  %v919_v37 = vmul.f32 %v2660_v1, %v406_v22  ;;  %v920_v38 = vmul.f32 %v2660_v1, %v407_v23  ;;  %1938 = vst [vmem:[%s2692_s24 + $0x5f8] sm:$0xff] %v1426_v29  ;;  %v427_v25 = vld [vmem:[%s2653_s13 + $0x6d0] sm:$0xff]  ;;  %v429_v27 = vld [vmem:[%s2653_s13 + $0x6e0] sm:$0xff] }
  0xc5   : > { %v1429_v42 = vadd.f32 %v2662_v2, %v916_v30  ;;  %v1430_v43 = vadd.f32 %v2662_v2, %v917_v31  ;;  %v1431_v44 = vadd.f32 %v2662_v2, %v918_v32  ;;  %v921_v45 = vmul.f32 %v2660_v1, %v408_v28  ;;  %1939 = vst [vmem:[%s2692_s24 + $0x600] sm:$0xff] %v1427_v35  ;;  %v430_v32 = vld [vmem:[%s2653_s13 + $0x6e8] sm:$0xff] }
  0xc6   : > { %1940 = vst [vmem:[%s2692_s24 + $0x608] sm:$0xff] %v1428_v36  ;;  %v1432_v48 = vadd.f32 %v2662_v2, %v919_v37  ;;  %v1433_v49 = vadd.f32 %v2662_v2, %v920_v38  ;;  %v922_v50 = vmul.f32 %v2660_v1, %v409_v33  ;;  %v923_v51 = vmul.f32 %v2660_v1, %v410_v34  ;;  %v431_v33 = vld [vmem:[%s2653_s13 + $0x6f0] sm:$0xff]  ;;  %v432_v38 = vld [vmem:[%s2653_s13 + $0x6f8] sm:$0xff] }
  0xc7   : > { %1941 = vst [vmem:[%s2692_s24 + $0x610] sm:$0xff] %v1429_v42  ;;  %1942 = vst [vmem:[%s2692_s24 + $0x618] sm:$0xff] %v1430_v43  ;;  %v1434_v53 = vadd.f32 %v2662_v2, %v921_v45  ;;  %v924_v54 = vmul.f32 %v2660_v1, %v411_v39  ;;  %v925_v55 = vmul.f32 %v2660_v1, %v412_v40  ;;  %v433_v43 = vld [vmem:[%s2653_s13 + $0x700] sm:$0xff] }
  0xc8   : > { %1943 = vst [vmem:[%s2692_s24 + $0x620] sm:$0xff] %v1431_v44  ;;  %v926_v56 = vmul.f32 %v2660_v1, %v413_v41  ;;  %1944 = vst [vmem:[%s2692_s24 + $0x628] sm:$0xff] %v1432_v48  ;;  %v1435_v59 = vadd.f32 %v2662_v2, %v922_v50  ;;  %v1436_v60 = vadd.f32 %v2662_v2, %v923_v51  ;;  %v434_v44 = vld [vmem:[%s2653_s13 + $0x708] sm:$0xff]  ;;  %v436_v50 = vld [vmem:[%s2653_s13 + $0x718] sm:$0xff] }
  0xc9   : > { %1945 = vst [vmem:[%s2692_s24 + $0x630] sm:$0xff] %v1433_v49  ;;  %v927_v61 = vmul.f32 %v2660_v1, %v414_v46  ;;  %v928_v62 = vmul.f32 %v2660_v1, %v415_v47  ;;  %1946 = vst [vmem:[%s2692_s24 + $0x638] sm:$0xff] %v1434_v53  ;;  %v1437_v4 = vadd.f32 %v2662_v2, %v924_v54  ;;  %v435_v49 = vld [vmem:[%s2653_s13 + $0x710] sm:$0xff]  ;;  %v437_v51 = vld [vmem:[%s2653_s13 + $0x720] sm:$0xff] }
  0xca   : > { %v1438_v5 = vadd.f32 %v2662_v2, %v925_v55  ;;  %v1439_v6 = vadd.f32 %v2662_v2, %v926_v56  ;;  %v929_v7 = vmul.f32 %v2660_v1, %v416_v52  ;;  %1947 = vst [vmem:[%s2692_s24 + $0x640] sm:$0xff] %v1435_v59  ;;  %1948 = vst [vmem:[%s2692_s24 + $0x648] sm:$0xff] %v1436_v60  ;;  %v438_v56 = vld [vmem:[%s2653_s13 + $0x728] sm:$0xff] }
  0xcb   : > { %v1440_v10 = vadd.f32 %v2662_v2, %v927_v61  ;;  %v1441_v11 = vadd.f32 %v2662_v2, %v928_v62  ;;  %v930_v12 = vmul.f32 %v2660_v1, %v417_v57  ;;  %v931_v13 = vmul.f32 %v2660_v1, %v418_v58  ;;  %1949 = vst [vmem:[%s2692_s24 + $0x650] sm:$0xff] %v1437_v4  ;;  %v439_v57 = vld [vmem:[%s2653_s13 + $0x730] sm:$0xff]  ;;  %v440_v62 = vld [vmem:[%s2653_s13 + $0x738] sm:$0xff] }
  0xcc   : > { %1950 = vst [vmem:[%s2692_s24 + $0x658] sm:$0xff] %v1438_v5  ;;  %1951 = vst [vmem:[%s2692_s24 + $0x660] sm:$0xff] %v1439_v6  ;;  %v1442_v15 = vadd.f32 %v2662_v2, %v929_v7  ;;  %v932_v16 = vmul.f32 %v2660_v1, %v419_v63  ;;  %v933_v17 = vmul.f32 %v2660_v1, %v420_v0  ;;  %v441_v5 = vld [vmem:[%s2653_s13 + $0x740] sm:$0xff]  ;;  %v442_v6 = vld [vmem:[%s2653_s13 + $0x748] sm:$0xff] }
  0xcd   : > { %v934_v18 = vmul.f32 %v2660_v1, %v421_v3  ;;  %1952 = vst [vmem:[%s2692_s24 + $0x668] sm:$0xff] %v1440_v10  ;;  %1953 = vst [vmem:[%s2692_s24 + $0x670] sm:$0xff] %v1441_v11  ;;  %v1443_v21 = vadd.f32 %v2662_v2, %v930_v12  ;;  %v1444_v22 = vadd.f32 %v2662_v2, %v931_v13  ;;  %v443_v11 = vld [vmem:[%s2653_s13 + $0x750] sm:$0xff]  ;;  %v444_v12 = vld [vmem:[%s2653_s13 + $0x758] sm:$0xff] }
  0xce   : > { %v935_v23 = vmul.f32 %v2660_v1, %v422_v8  ;;  %v936_v24 = vmul.f32 %v2660_v1, %v423_v9  ;;  %1954 = vst [vmem:[%s2692_s24 + $0x678] sm:$0xff] %v1442_v15  ;;  %v1445_v28 = vadd.f32 %v2662_v2, %v932_v16  ;;  %v1446_v29 = vadd.f32 %v2662_v2, %v933_v17  ;;  %v445_v13 = vld [vmem:[%s2653_s13 + $0x760] sm:$0xff] }
  0xcf   : > { %v1447_v30 = vadd.f32 %v2662_v2, %v934_v18  ;;  %v937_v31 = vmul.f32 %v2660_v1, %v424_v14  ;;  %1955 = vst [vmem:[%s2692_s24 + $0x680] sm:$0xff] %v1443_v21  ;;  %1956 = vst [vmem:[%s2692_s24 + $0x688] sm:$0xff] %v1444_v22  ;;  %v938_v36 = vmul.f32 %v2660_v1, %v425_v19  ;;  %v446_v18 = vld [vmem:[%s2653_s13 + $0x768] sm:$0xff]  ;;  %v447_v19 = vld [vmem:[%s2653_s13 + $0x770] sm:$0xff] }
  0xd0   : > { %v1448_v34 = vadd.f32 %v2662_v2, %v935_v23  ;;  %v1449_v35 = vadd.f32 %v2662_v2, %v936_v24  ;;  %v939_v37 = vmul.f32 %v2660_v1, %v426_v20  ;;  %1957 = vst [vmem:[%s2692_s24 + $0x690] sm:$0xff] %v1445_v28  ;;  %1958 = vst [vmem:[%s2692_s24 + $0x698] sm:$0xff] %v1446_v29  ;;  %v448_v24 = vld [vmem:[%s2653_s13 + $0x778] sm:$0xff]  ;;  %v449_v29 = vld [vmem:[%s2653_s13 + $0x780] sm:$0xff] }
  0xd1   : > { %1959 = vst [vmem:[%s2692_s24 + $0x6a0] sm:$0xff] %v1447_v30  ;;  %v1450_v39 = vadd.f32 %v2662_v2, %v937_v31  ;;  %v940_v40 = vmul.f32 %v2660_v1, %v427_v25  ;;  %v941_v41 = vmul.f32 %v2660_v1, %v428_v26  ;;  %v942_v42 = vmul.f32 %v2660_v1, %v429_v27  ;;  %v450_v30 = vld [vmem:[%s2653_s13 + $0x788] sm:$0xff] }
  0xd2   : > { %1960 = vst [vmem:[%s2692_s24 + $0x6a8] sm:$0xff] %v1448_v34  ;;  %1961 = vst [vmem:[%s2692_s24 + $0x6b0] sm:$0xff] %v1449_v35  ;;  %v1451_v45 = vadd.f32 %v2662_v2, %v938_v36  ;;  %v1452_v46 = vadd.f32 %v2662_v2, %v939_v37  ;;  %v943_v47 = vmul.f32 %v2660_v1, %v430_v32  ;;  %v451_v35 = vld [vmem:[%s2653_s13 + $0x790] sm:$0xff]  ;;  %v452_v36 = vld [vmem:[%s2653_s13 + $0x798] sm:$0xff] }
  0xd3   : > { %v944_v48 = vmul.f32 %v2660_v1, %v431_v33  ;;  %1962 = vst [vmem:[%s2692_s24 + $0x6b8] sm:$0xff] %v1450_v39  ;;  %v1453_v52 = vadd.f32 %v2662_v2, %v940_v40  ;;  %v1454_v53 = vadd.f32 %v2662_v2, %v941_v41  ;;  %v1455_v54 = vadd.f32 %v2662_v2, %v942_v42  ;;  %v453_v37 = vld [vmem:[%s2653_s13 + $0x7a0] sm:$0xff]  ;;  %v454_v42 = vld [vmem:[%s2653_s13 + $0x7a8] sm:$0xff] }
  0xd4   : > { %v945_v55 = vmul.f32 %v2660_v1, %v432_v38  ;;  %1963 = vst [vmem:[%s2692_s24 + $0x6c0] sm:$0xff] %v1451_v45  ;;  %1964 = vst [vmem:[%s2692_s24 + $0x6c8] sm:$0xff] %v1452_v46  ;;  %v1456_v58 = vadd.f32 %v2662_v2, %v943_v47  ;;  %v946_v60 = vmul.f32 %v2660_v1, %v433_v43  ;;  %v455_v43 = vld [vmem:[%s2653_s13 + $0x7b0] sm:$0xff] }
  0xd5   : > { %v1457_v59 = vadd.f32 %v2662_v2, %v944_v48  ;;  %v947_v61 = vmul.f32 %v2660_v1, %v434_v44  ;;  %1965 = vst [vmem:[%s2692_s24 + $0x6d0] sm:$0xff] %v1453_v52  ;;  %1966 = vst [vmem:[%s2692_s24 + $0x6d8] sm:$0xff] %v1454_v53  ;;  %v948_v0 = vmul.f32 %v2660_v1, %v435_v49  ;;  %v456_v48 = vld [vmem:[%s2653_s13 + $0x7b8] sm:$0xff]  ;;  %v457_v53 = vld [vmem:[%s2653_s13 + $0x7c0] sm:$0xff] }
  0xd6   : > { %1967 = vst [vmem:[%s2692_s24 + $0x6e0] sm:$0xff] %v1455_v54  ;;  %v1458_v63 = vadd.f32 %v2662_v2, %v945_v55  ;;  %v949_v3 = vmul.f32 %v2660_v1, %v436_v50  ;;  %v950_v4 = vmul.f32 %v2660_v1, %v437_v51  ;;  %1968 = vst [vmem:[%s2692_s24 + $0x6e8] sm:$0xff] %v1456_v58  ;;  %v458_v54 = vld [vmem:[%s2653_s13 + $0x7c8] sm:$0xff] }
  0xd7   : > { %1969 = vst [vmem:[%s2692_s24 + $0x6f0] sm:$0xff] %v1457_v59  ;;  %v1459_v7 = vadd.f32 %v2662_v2, %v946_v60  ;;  %v1460_v8 = vadd.f32 %v2662_v2, %v947_v61  ;;  %v951_v9 = vmul.f32 %v2660_v1, %v438_v56  ;;  %v952_v10 = vmul.f32 %v2660_v1, %v439_v57  ;;  %v459_v59 = vld [vmem:[%s2653_s13 + $0x7d0] sm:$0xff]  ;;  %v460_v60 = vld [vmem:[%s2653_s13 + $0x7d8] sm:$0xff]  ;;  %v461_v61 = vld [vmem:[%s2653_s13 + $0x7e0] sm:$0xff] }
  0xd8   : > { %1970 = vst [vmem:[%s2692_s24 + $0x6f8] sm:$0xff] %v1458_v63  ;;  %v1461_v14 = vadd.f32 %v2662_v2, %v948_v0  ;;  %v1462_v15 = vadd.f32 %v2662_v2, %v949_v3  ;;  %v1463_v16 = vadd.f32 %v2662_v2, %v950_v4  ;;  %v953_v17 = vmul.f32 %v2660_v1, %v440_v62  ;;  %v462_v4 = vld [vmem:[%s2653_s13 + $0x7e8] sm:$0xff] }
  0xd9   : > { %1971 = vst [vmem:[%s2692_s24 + $0x700] sm:$0xff] %v1459_v7  ;;  %1972 = vst [vmem:[%s2692_s24 + $0x708] sm:$0xff] %v1460_v8  ;;  %v1464_v20 = vadd.f32 %v2662_v2, %v951_v9  ;;  %v1465_v21 = vadd.f32 %v2662_v2, %v952_v10  ;;  %v954_v22 = vmul.f32 %v2660_v1, %v441_v5  ;;  %v463_v5 = vld [vmem:[%s2653_s13 + $0x7f0] sm:$0xff]  ;;  %v464_v10 = vld [vmem:[%s2653_s13 + $0x7f8] sm:$0xff] }
  0xda   : > { %v955_v23 = vmul.f32 %v2660_v1, %v442_v6  ;;  %1973 = vst [vmem:[%s2692_s24 + $0x710] sm:$0xff] %v1461_v14  ;;  %1974 = vst [vmem:[%s2692_s24 + $0x718] sm:$0xff] %v1462_v15  ;;  %v1466_v25 = vadd.f32 %v2662_v2, %v953_v17  ;;  %v956_v26 = vmul.f32 %v2660_v1, %v443_v11  ;;  %v465_v15 = vld [vmem:[%s2653_s13 + $0x800] sm:$0xff] }
  0xdb   : > { %1975 = vst [vmem:[%s2692_s24 + $0x720] sm:$0xff] %v1463_v16  ;;  %v957_v27 = vmul.f32 %v2660_v1, %v444_v12  ;;  %v958_v28 = vmul.f32 %v2660_v1, %v445_v13  ;;  %1976 = vst [vmem:[%s2692_s24 + $0x728] sm:$0xff] %v1464_v20  ;;  %v1467_v31 = vadd.f32 %v2662_v2, %v954_v22  ;;  %v466_v16 = vld [vmem:[%s2653_s13 + $0x808] sm:$0xff]  ;;  %v468_v22 = vld [vmem:[%s2653_s13 + $0x818] sm:$0xff] }
  0xdc   : > { %1977 = vst [vmem:[%s2692_s24 + $0x730] sm:$0xff] %v1465_v21  ;;  %v1468_v32 = vadd.f32 %v2662_v2, %v955_v23  ;;  %v959_v33 = vmul.f32 %v2660_v1, %v446_v18  ;;  %v960_v34 = vmul.f32 %v2660_v1, %v447_v19  ;;  %1978 = vst [vmem:[%s2692_s24 + $0x738] sm:$0xff] %v1466_v25  ;;  %v467_v21 = vld [vmem:[%s2653_s13 + $0x810] sm:$0xff]  ;;  %v469_v23 = vld [vmem:[%s2653_s13 + $0x820] sm:$0xff] }
  0xdd   : > { %v1469_v38 = vadd.f32 %v2662_v2, %v956_v26  ;;  %v1470_v39 = vadd.f32 %v2662_v2, %v957_v27  ;;  %v1471_v40 = vadd.f32 %v2662_v2, %v958_v28  ;;  %v961_v41 = vmul.f32 %v2660_v1, %v448_v24  ;;  %1979 = vst [vmem:[%s2692_s24 + $0x740] sm:$0xff] %v1467_v31  ;;  %v470_v28 = vld [vmem:[%s2653_s13 + $0x828] sm:$0xff] }
  0xde   : > { %1980 = vst [vmem:[%s2692_s24 + $0x748] sm:$0xff] %v1468_v32  ;;  %v1472_v44 = vadd.f32 %v2662_v2, %v959_v33  ;;  %v1473_v45 = vadd.f32 %v2662_v2, %v960_v34  ;;  %v962_v46 = vmul.f32 %v2660_v1, %v449_v29  ;;  %v963_v47 = vmul.f32 %v2660_v1, %v450_v30  ;;  %v471_v29 = vld [vmem:[%s2653_s13 + $0x830] sm:$0xff]  ;;  %v472_v34 = vld [vmem:[%s2653_s13 + $0x838] sm:$0xff] }
  0xdf   : > { %1981 = vst [vmem:[%s2692_s24 + $0x750] sm:$0xff] %v1469_v38  ;;  %1982 = vst [vmem:[%s2692_s24 + $0x758] sm:$0xff] %v1470_v39  ;;  %v1474_v49 = vadd.f32 %v2662_v2, %v961_v41  ;;  %v964_v50 = vmul.f32 %v2660_v1, %v451_v35  ;;  %v965_v51 = vmul.f32 %v2660_v1, %v452_v36  ;;  %v473_v39 = vld [vmem:[%s2653_s13 + $0x840] sm:$0xff] }
  0xe0   : > { %1983 = vst [vmem:[%s2692_s24 + $0x760] sm:$0xff] %v1471_v40  ;;  %v966_v52 = vmul.f32 %v2660_v1, %v453_v37  ;;  %1984 = vst [vmem:[%s2692_s24 + $0x768] sm:$0xff] %v1472_v44  ;;  %v1475_v55 = vadd.f32 %v2662_v2, %v962_v46  ;;  %v1476_v56 = vadd.f32 %v2662_v2, %v963_v47  ;;  %v474_v40 = vld [vmem:[%s2653_s13 + $0x848] sm:$0xff]  ;;  %v476_v46 = vld [vmem:[%s2653_s13 + $0x858] sm:$0xff] }
  0xe1   : > { %1985 = vst [vmem:[%s2692_s24 + $0x770] sm:$0xff] %v1473_v45  ;;  %v967_v57 = vmul.f32 %v2660_v1, %v454_v42  ;;  %v968_v58 = vmul.f32 %v2660_v1, %v455_v43  ;;  %1986 = vst [vmem:[%s2692_s24 + $0x778] sm:$0xff] %v1474_v49  ;;  %v1477_v62 = vadd.f32 %v2662_v2, %v964_v50  ;;  %v475_v45 = vld [vmem:[%s2653_s13 + $0x850] sm:$0xff]  ;;  %v477_v47 = vld [vmem:[%s2653_s13 + $0x860] sm:$0xff] }
  0xe2   : > { %v1478_v63 = vadd.f32 %v2662_v2, %v965_v51  ;;  %v1479_v0 = vadd.f32 %v2662_v2, %v966_v52  ;;  %v969_v3 = vmul.f32 %v2660_v1, %v456_v48  ;;  %1987 = vst [vmem:[%s2692_s24 + $0x780] sm:$0xff] %v1475_v55  ;;  %1988 = vst [vmem:[%s2692_s24 + $0x788] sm:$0xff] %v1476_v56  ;;  %v478_v52 = vld [vmem:[%s2653_s13 + $0x868] sm:$0xff] }
  0xe3   : > { %v1480_v6 = vadd.f32 %v2662_v2, %v967_v57  ;;  %v1481_v7 = vadd.f32 %v2662_v2, %v968_v58  ;;  %v970_v8 = vmul.f32 %v2660_v1, %v457_v53  ;;  %v971_v9 = vmul.f32 %v2660_v1, %v458_v54  ;;  %1989 = vst [vmem:[%s2692_s24 + $0x790] sm:$0xff] %v1477_v62  ;;  %v479_v53 = vld [vmem:[%s2653_s13 + $0x870] sm:$0xff]  ;;  %v480_v58 = vld [vmem:[%s2653_s13 + $0x878] sm:$0xff] }
  0xe4   : > { %1990 = vst [vmem:[%s2692_s24 + $0x798] sm:$0xff] %v1478_v63  ;;  %1991 = vst [vmem:[%s2692_s24 + $0x7a0] sm:$0xff] %v1479_v0  ;;  %v1482_v11 = vadd.f32 %v2662_v2, %v969_v3  ;;  %v972_v12 = vmul.f32 %v2660_v1, %v459_v59  ;;  %v973_v13 = vmul.f32 %v2660_v1, %v460_v60  ;;  %v481_v63 = vld [vmem:[%s2653_s13 + $0x880] sm:$0xff]  ;;  %v482_v0 = vld [vmem:[%s2653_s13 + $0x888] sm:$0xff] }
  0xe5   : > { %v974_v14 = vmul.f32 %v2660_v1, %v461_v61  ;;  %1992 = vst [vmem:[%s2692_s24 + $0x7a8] sm:$0xff] %v1480_v6  ;;  %1993 = vst [vmem:[%s2692_s24 + $0x7b0] sm:$0xff] %v1481_v7  ;;  %v1483_v17 = vadd.f32 %v2662_v2, %v970_v8  ;;  %v1484_v18 = vadd.f32 %v2662_v2, %v971_v9  ;;  %v483_v7 = vld [vmem:[%s2653_s13 + $0x890] sm:$0xff]  ;;  %v484_v8 = vld [vmem:[%s2653_s13 + $0x898] sm:$0xff] }
  0xe6   : > { %v975_v19 = vmul.f32 %v2660_v1, %v462_v4  ;;  %v976_v20 = vmul.f32 %v2660_v1, %v463_v5  ;;  %1994 = vst [vmem:[%s2692_s24 + $0x7b8] sm:$0xff] %v1482_v11  ;;  %v1485_v24 = vadd.f32 %v2662_v2, %v972_v12  ;;  %v1486_v25 = vadd.f32 %v2662_v2, %v973_v13  ;;  %v485_v9 = vld [vmem:[%s2653_s13 + $0x8a0] sm:$0xff] }
  0xe7   : > { %v1487_v26 = vadd.f32 %v2662_v2, %v974_v14  ;;  %v977_v27 = vmul.f32 %v2660_v1, %v464_v10  ;;  %1995 = vst [vmem:[%s2692_s24 + $0x7c0] sm:$0xff] %v1483_v17  ;;  %1996 = vst [vmem:[%s2692_s24 + $0x7c8] sm:$0xff] %v1484_v18  ;;  %v978_v32 = vmul.f32 %v2660_v1, %v465_v15  ;;  %v486_v14 = vld [vmem:[%s2653_s13 + $0x8a8] sm:$0xff]  ;;  %v487_v15 = vld [vmem:[%s2653_s13 + $0x8b0] sm:$0xff] }
  0xe8   : > { %v1488_v30 = vadd.f32 %v2662_v2, %v975_v19  ;;  %v1489_v31 = vadd.f32 %v2662_v2, %v976_v20  ;;  %v979_v33 = vmul.f32 %v2660_v1, %v466_v16  ;;  %1997 = vst [vmem:[%s2692_s24 + $0x7d0] sm:$0xff] %v1485_v24  ;;  %1998 = vst [vmem:[%s2692_s24 + $0x7d8] sm:$0xff] %v1486_v25  ;;  %v488_v20 = vld [vmem:[%s2653_s13 + $0x8b8] sm:$0xff]  ;;  %v489_v25 = vld [vmem:[%s2653_s13 + $0x8c0] sm:$0xff] }
  0xe9   : > { %1999 = vst [vmem:[%s2692_s24 + $0x7e0] sm:$0xff] %v1487_v26  ;;  %v1490_v35 = vadd.f32 %v2662_v2, %v977_v27  ;;  %v980_v36 = vmul.f32 %v2660_v1, %v467_v21  ;;  %v981_v37 = vmul.f32 %v2660_v1, %v468_v22  ;;  %v982_v38 = vmul.f32 %v2660_v1, %v469_v23  ;;  %v490_v26 = vld [vmem:[%s2653_s13 + $0x8c8] sm:$0xff] }
  0xea   : > { %2000 = vst [vmem:[%s2692_s24 + $0x7e8] sm:$0xff] %v1488_v30  ;;  %2001 = vst [vmem:[%s2692_s24 + $0x7f0] sm:$0xff] %v1489_v31  ;;  %v1491_v41 = vadd.f32 %v2662_v2, %v978_v32  ;;  %v1492_v42 = vadd.f32 %v2662_v2, %v979_v33  ;;  %v983_v43 = vmul.f32 %v2660_v1, %v470_v28  ;;  %v491_v31 = vld [vmem:[%s2653_s13 + $0x8d0] sm:$0xff]  ;;  %v492_v32 = vld [vmem:[%s2653_s13 + $0x8d8] sm:$0xff] }
  0xeb   : > { %v984_v44 = vmul.f32 %v2660_v1, %v471_v29  ;;  %2002 = vst [vmem:[%s2692_s24 + $0x7f8] sm:$0xff] %v1490_v35  ;;  %v1493_v48 = vadd.f32 %v2662_v2, %v980_v36  ;;  %v1494_v49 = vadd.f32 %v2662_v2, %v981_v37  ;;  %v1495_v50 = vadd.f32 %v2662_v2, %v982_v38  ;;  %v493_v33 = vld [vmem:[%s2653_s13 + $0x8e0] sm:$0xff]  ;;  %v494_v38 = vld [vmem:[%s2653_s13 + $0x8e8] sm:$0xff] }
  0xec   : > { %v985_v51 = vmul.f32 %v2660_v1, %v472_v34  ;;  %2003 = vst [vmem:[%s2692_s24 + $0x800] sm:$0xff] %v1491_v41  ;;  %2004 = vst [vmem:[%s2692_s24 + $0x808] sm:$0xff] %v1492_v42  ;;  %v1496_v54 = vadd.f32 %v2662_v2, %v983_v43  ;;  %v986_v56 = vmul.f32 %v2660_v1, %v473_v39  ;;  %v495_v39 = vld [vmem:[%s2653_s13 + $0x8f0] sm:$0xff] }
  0xed   : > { %v1497_v55 = vadd.f32 %v2662_v2, %v984_v44  ;;  %v987_v57 = vmul.f32 %v2660_v1, %v474_v40  ;;  %2005 = vst [vmem:[%s2692_s24 + $0x810] sm:$0xff] %v1493_v48  ;;  %2006 = vst [vmem:[%s2692_s24 + $0x818] sm:$0xff] %v1494_v49  ;;  %v988_v60 = vmul.f32 %v2660_v1, %v475_v45  ;;  %v496_v44 = vld [vmem:[%s2653_s13 + $0x8f8] sm:$0xff]  ;;  %v497_v49 = vld [vmem:[%s2653_s13 + $0x900] sm:$0xff] }
  0xee   : > { %2007 = vst [vmem:[%s2692_s24 + $0x820] sm:$0xff] %v1495_v50  ;;  %v1498_v59 = vadd.f32 %v2662_v2, %v985_v51  ;;  %v989_v61 = vmul.f32 %v2660_v1, %v476_v46  ;;  %v990_v62 = vmul.f32 %v2660_v1, %v477_v47  ;;  %2008 = vst [vmem:[%s2692_s24 + $0x828] sm:$0xff] %v1496_v54  ;;  %v498_v50 = vld [vmem:[%s2653_s13 + $0x908] sm:$0xff] }
  0xef   : > { %2009 = vst [vmem:[%s2692_s24 + $0x830] sm:$0xff] %v1497_v55  ;;  %v1499_v3 = vadd.f32 %v2662_v2, %v986_v56  ;;  %v1500_v4 = vadd.f32 %v2662_v2, %v987_v57  ;;  %v991_v5 = vmul.f32 %v2660_v1, %v478_v52  ;;  %v992_v6 = vmul.f32 %v2660_v1, %v479_v53  ;;  %v499_v55 = vld [vmem:[%s2653_s13 + $0x910] sm:$0xff]  ;;  %v500_v56 = vld [vmem:[%s2653_s13 + $0x918] sm:$0xff]  ;;  %v501_v57 = vld [vmem:[%s2653_s13 + $0x920] sm:$0xff] }
  0xf0   : > { %2010 = vst [vmem:[%s2692_s24 + $0x838] sm:$0xff] %v1498_v59  ;;  %v1501_v10 = vadd.f32 %v2662_v2, %v988_v60  ;;  %v1502_v11 = vadd.f32 %v2662_v2, %v989_v61  ;;  %v1503_v12 = vadd.f32 %v2662_v2, %v990_v62  ;;  %v993_v13 = vmul.f32 %v2660_v1, %v480_v58  ;;  %v502_v62 = vld [vmem:[%s2653_s13 + $0x928] sm:$0xff] }
  0xf1   : > { %2011 = vst [vmem:[%s2692_s24 + $0x840] sm:$0xff] %v1499_v3  ;;  %2012 = vst [vmem:[%s2692_s24 + $0x848] sm:$0xff] %v1500_v4  ;;  %v1504_v16 = vadd.f32 %v2662_v2, %v991_v5  ;;  %v1505_v17 = vadd.f32 %v2662_v2, %v992_v6  ;;  %v994_v18 = vmul.f32 %v2660_v1, %v481_v63  ;;  %v503_v63 = vld [vmem:[%s2653_s13 + $0x930] sm:$0xff]  ;;  %v504_v6 = vld [vmem:[%s2653_s13 + $0x938] sm:$0xff] }
  0xf2   : > { %v995_v19 = vmul.f32 %v2660_v1, %v482_v0  ;;  %2013 = vst [vmem:[%s2692_s24 + $0x850] sm:$0xff] %v1501_v10  ;;  %2014 = vst [vmem:[%s2692_s24 + $0x858] sm:$0xff] %v1502_v11  ;;  %v1506_v21 = vadd.f32 %v2662_v2, %v993_v13  ;;  %v996_v22 = vmul.f32 %v2660_v1, %v483_v7  ;;  %v505_v11 = vld [vmem:[%s2653_s13 + $0x940] sm:$0xff] }
  0xf3   : > { %2015 = vst [vmem:[%s2692_s24 + $0x860] sm:$0xff] %v1503_v12  ;;  %v997_v23 = vmul.f32 %v2660_v1, %v484_v8  ;;  %v998_v24 = vmul.f32 %v2660_v1, %v485_v9  ;;  %2016 = vst [vmem:[%s2692_s24 + $0x868] sm:$0xff] %v1504_v16  ;;  %v1507_v27 = vadd.f32 %v2662_v2, %v994_v18  ;;  %v506_v12 = vld [vmem:[%s2653_s13 + $0x948] sm:$0xff]  ;;  %v508_v18 = vld [vmem:[%s2653_s13 + $0x958] sm:$0xff] }
  0xf4   : > { %2017 = vst [vmem:[%s2692_s24 + $0x870] sm:$0xff] %v1505_v17  ;;  %v1508_v28 = vadd.f32 %v2662_v2, %v995_v19  ;;  %v999_v29 = vmul.f32 %v2660_v1, %v486_v14  ;;  %v1000_v30 = vmul.f32 %v2660_v1, %v487_v15  ;;  %2018 = vst [vmem:[%s2692_s24 + $0x878] sm:$0xff] %v1506_v21  ;;  %v507_v17 = vld [vmem:[%s2653_s13 + $0x950] sm:$0xff]  ;;  %v509_v19 = vld [vmem:[%s2653_s13 + $0x960] sm:$0xff] }
  0xf5   : > { %v1509_v34 = vadd.f32 %v2662_v2, %v996_v22  ;;  %v1510_v35 = vadd.f32 %v2662_v2, %v997_v23  ;;  %v1511_v36 = vadd.f32 %v2662_v2, %v998_v24  ;;  %v1001_v37 = vmul.f32 %v2660_v1, %v488_v20  ;;  %2019 = vst [vmem:[%s2692_s24 + $0x880] sm:$0xff] %v1507_v27  ;;  %v510_v24 = vld [vmem:[%s2653_s13 + $0x968] sm:$0xff] }
  0xf6   : > { %2020 = vst [vmem:[%s2692_s24 + $0x888] sm:$0xff] %v1508_v28  ;;  %v1512_v40 = vadd.f32 %v2662_v2, %v999_v29  ;;  %v1513_v41 = vadd.f32 %v2662_v2, %v1000_v30  ;;  %v1002_v42 = vmul.f32 %v2660_v1, %v489_v25  ;;  %v1003_v43 = vmul.f32 %v2660_v1, %v490_v26  ;;  %v511_v25 = vld [vmem:[%s2653_s13 + $0x970] sm:$0xff]  ;;  %v512_v30 = vld [vmem:[%s2653_s13 + $0x978] sm:$0xff] }
  0xf7   : > { %2021 = vst [vmem:[%s2692_s24 + $0x890] sm:$0xff] %v1509_v34  ;;  %2022 = vst [vmem:[%s2692_s24 + $0x898] sm:$0xff] %v1510_v35  ;;  %v1514_v45 = vadd.f32 %v2662_v2, %v1001_v37  ;;  %v1004_v46 = vmul.f32 %v2660_v1, %v491_v31  ;;  %v1005_v47 = vmul.f32 %v2660_v1, %v492_v32  ;;  %v513_v35 = vld [vmem:[%s2653_s13 + $0x980] sm:$0xff] }
  0xf8   : > { %2023 = vst [vmem:[%s2692_s24 + $0x8a0] sm:$0xff] %v1511_v36  ;;  %v1006_v48 = vmul.f32 %v2660_v1, %v493_v33  ;;  %2024 = vst [vmem:[%s2692_s24 + $0x8a8] sm:$0xff] %v1512_v40  ;;  %v1515_v51 = vadd.f32 %v2662_v2, %v1002_v42  ;;  %v1516_v52 = vadd.f32 %v2662_v2, %v1003_v43  ;;  %v514_v36 = vld [vmem:[%s2653_s13 + $0x988] sm:$0xff]  ;;  %v516_v42 = vld [vmem:[%s2653_s13 + $0x998] sm:$0xff] }
  0xf9   : > { %2025 = vst [vmem:[%s2692_s24 + $0x8b0] sm:$0xff] %v1513_v41  ;;  %v1007_v53 = vmul.f32 %v2660_v1, %v494_v38  ;;  %v1008_v54 = vmul.f32 %v2660_v1, %v495_v39  ;;  %2026 = vst [vmem:[%s2692_s24 + $0x8b8] sm:$0xff] %v1514_v45  ;;  %v1517_v58 = vadd.f32 %v2662_v2, %v1004_v46  ;;  %v515_v41 = vld [vmem:[%s2653_s13 + $0x990] sm:$0xff]  ;;  %v517_v43 = vld [vmem:[%s2653_s13 + $0x9a0] sm:$0xff] }
  0xfa   : > { %v1518_v59 = vadd.f32 %v2662_v2, %v1005_v47  ;;  %v1519_v60 = vadd.f32 %v2662_v2, %v1006_v48  ;;  %v1009_v61 = vmul.f32 %v2660_v1, %v496_v44  ;;  %2027 = vst [vmem:[%s2692_s24 + $0x8c0] sm:$0xff] %v1515_v51  ;;  %2028 = vst [vmem:[%s2692_s24 + $0x8c8] sm:$0xff] %v1516_v52  ;;  %v518_v48 = vld [vmem:[%s2653_s13 + $0x9a8] sm:$0xff] }
  0xfb   : > { %v1520_v0 = vadd.f32 %v2662_v2, %v1007_v53  ;;  %v1521_v3 = vadd.f32 %v2662_v2, %v1008_v54  ;;  %v1010_v4 = vmul.f32 %v2660_v1, %v497_v49  ;;  %v1011_v5 = vmul.f32 %v2660_v1, %v498_v50  ;;  %2029 = vst [vmem:[%s2692_s24 + $0x8d0] sm:$0xff] %v1517_v58  ;;  %v519_v49 = vld [vmem:[%s2653_s13 + $0x9b0] sm:$0xff]  ;;  %v520_v54 = vld [vmem:[%s2653_s13 + $0x9b8] sm:$0xff] }
  0xfc   : > { %2030 = vst [vmem:[%s2692_s24 + $0x8d8] sm:$0xff] %v1518_v59  ;;  %2031 = vst [vmem:[%s2692_s24 + $0x8e0] sm:$0xff] %v1519_v60  ;;  %v1522_v7 = vadd.f32 %v2662_v2, %v1009_v61  ;;  %v1012_v8 = vmul.f32 %v2660_v1, %v499_v55  ;;  %v1013_v9 = vmul.f32 %v2660_v1, %v500_v56  ;;  %v521_v59 = vld [vmem:[%s2653_s13 + $0x9c0] sm:$0xff]  ;;  %v522_v60 = vld [vmem:[%s2653_s13 + $0x9c8] sm:$0xff] }
  0xfd   : > { %v1014_v10 = vmul.f32 %v2660_v1, %v501_v57  ;;  %2032 = vst [vmem:[%s2692_s24 + $0x8e8] sm:$0xff] %v1520_v0  ;;  %2033 = vst [vmem:[%s2692_s24 + $0x8f0] sm:$0xff] %v1521_v3  ;;  %v1523_v13 = vadd.f32 %v2662_v2, %v1010_v4  ;;  %v1524_v14 = vadd.f32 %v2662_v2, %v1011_v5  ;;  %v523_v3 = vld [vmem:[%s2653_s13 + $0x9d0] sm:$0xff]  ;;  %v524_v4 = vld [vmem:[%s2653_s13 + $0x9d8] sm:$0xff] }
  0xfe   : > { %v1015_v15 = vmul.f32 %v2660_v1, %v502_v62  ;;  %v1016_v16 = vmul.f32 %v2660_v1, %v503_v63  ;;  %2034 = vst [vmem:[%s2692_s24 + $0x8f8] sm:$0xff] %v1522_v7  ;;  %v1525_v20 = vadd.f32 %v2662_v2, %v1012_v8  ;;  %v1526_v21 = vadd.f32 %v2662_v2, %v1013_v9  ;;  %v525_v5 = vld [vmem:[%s2653_s13 + $0x9e0] sm:$0xff] }
  0xff   : > { %v1527_v22 = vadd.f32 %v2662_v2, %v1014_v10  ;;  %v1017_v23 = vmul.f32 %v2660_v1, %v504_v6  ;;  %2035 = vst [vmem:[%s2692_s24 + $0x900] sm:$0xff] %v1523_v13  ;;  %2036 = vst [vmem:[%s2692_s24 + $0x908] sm:$0xff] %v1524_v14  ;;  %v1018_v28 = vmul.f32 %v2660_v1, %v505_v11  ;;  %v526_v10 = vld [vmem:[%s2653_s13 + $0x9e8] sm:$0xff]  ;;  %v527_v11 = vld [vmem:[%s2653_s13 + $0x9f0] sm:$0xff] }
 0x100   : > { %v1528_v26 = vadd.f32 %v2662_v2, %v1015_v15  ;;  %v1529_v27 = vadd.f32 %v2662_v2, %v1016_v16  ;;  %v1019_v29 = vmul.f32 %v2660_v1, %v506_v12  ;;  %2037 = vst [vmem:[%s2692_s24 + $0x910] sm:$0xff] %v1525_v20  ;;  %2038 = vst [vmem:[%s2692_s24 + $0x918] sm:$0xff] %v1526_v21  ;;  %v528_v16 = vld [vmem:[%s2653_s13 + $0x9f8] sm:$0xff]  ;;  %v529_v21 = vld [vmem:[%s2653_s13 + $0xa00] sm:$0xff] }
 0x101   : > { %2039 = vst [vmem:[%s2692_s24 + $0x920] sm:$0xff] %v1527_v22  ;;  %v1530_v31 = vadd.f32 %v2662_v2, %v1017_v23  ;;  %v1020_v32 = vmul.f32 %v2660_v1, %v507_v17  ;;  %v1021_v33 = vmul.f32 %v2660_v1, %v508_v18  ;;  %v1022_v34 = vmul.f32 %v2660_v1, %v509_v19  ;;  %v530_v22 = vld [vmem:[%s2653_s13 + $0xa08] sm:$0xff] }
 0x102   : > { %2040 = vst [vmem:[%s2692_s24 + $0x928] sm:$0xff] %v1528_v26  ;;  %2041 = vst [vmem:[%s2692_s24 + $0x930] sm:$0xff] %v1529_v27  ;;  %v1531_v37 = vadd.f32 %v2662_v2, %v1018_v28  ;;  %v1532_v38 = vadd.f32 %v2662_v2, %v1019_v29  ;;  %v1023_v39 = vmul.f32 %v2660_v1, %v510_v24  ;;  %v531_v27 = vld [vmem:[%s2653_s13 + $0xa10] sm:$0xff]  ;;  %v532_v28 = vld [vmem:[%s2653_s13 + $0xa18] sm:$0xff] }
 0x103   : > { %v1024_v40 = vmul.f32 %v2660_v1, %v511_v25  ;;  %2042 = vst [vmem:[%s2692_s24 + $0x938] sm:$0xff] %v1530_v31  ;;  %v1533_v44 = vadd.f32 %v2662_v2, %v1020_v32  ;;  %v1534_v45 = vadd.f32 %v2662_v2, %v1021_v33  ;;  %v1535_v46 = vadd.f32 %v2662_v2, %v1022_v34  ;;  %v533_v29 = vld [vmem:[%s2653_s13 + $0xa20] sm:$0xff]  ;;  %v534_v34 = vld [vmem:[%s2653_s13 + $0xa28] sm:$0xff] }
 0x104   : > { %v1025_v47 = vmul.f32 %v2660_v1, %v512_v30  ;;  %2043 = vst [vmem:[%s2692_s24 + $0x940] sm:$0xff] %v1531_v37  ;;  %2044 = vst [vmem:[%s2692_s24 + $0x948] sm:$0xff] %v1532_v38  ;;  %v1536_v50 = vadd.f32 %v2662_v2, %v1023_v39  ;;  %v1026_v52 = vmul.f32 %v2660_v1, %v513_v35  ;;  %v535_v35 = vld [vmem:[%s2653_s13 + $0xa30] sm:$0xff] }
 0x105   : > { %v1537_v51 = vadd.f32 %v2662_v2, %v1024_v40  ;;  %v1027_v53 = vmul.f32 %v2660_v1, %v514_v36  ;;  %2045 = vst [vmem:[%s2692_s24 + $0x950] sm:$0xff] %v1533_v44  ;;  %2046 = vst [vmem:[%s2692_s24 + $0x958] sm:$0xff] %v1534_v45  ;;  %v1028_v56 = vmul.f32 %v2660_v1, %v515_v41  ;;  %v536_v40 = vld [vmem:[%s2653_s13 + $0xa38] sm:$0xff]  ;;  %v537_v45 = vld [vmem:[%s2653_s13 + $0xa40] sm:$0xff] }
 0x106   : > { %2047 = vst [vmem:[%s2692_s24 + $0x960] sm:$0xff] %v1535_v46  ;;  %v1538_v55 = vadd.f32 %v2662_v2, %v1025_v47  ;;  %v1029_v57 = vmul.f32 %v2660_v1, %v516_v42  ;;  %v1030_v58 = vmul.f32 %v2660_v1, %v517_v43  ;;  %2048 = vst [vmem:[%s2692_s24 + $0x968] sm:$0xff] %v1536_v50  ;;  %v538_v46 = vld [vmem:[%s2653_s13 + $0xa48] sm:$0xff] }
 0x107   : > { %2049 = vst [vmem:[%s2692_s24 + $0x970] sm:$0xff] %v1537_v51  ;;  %v1539_v61 = vadd.f32 %v2662_v2, %v1026_v52  ;;  %v1540_v62 = vadd.f32 %v2662_v2, %v1027_v53  ;;  %v1031_v63 = vmul.f32 %v2660_v1, %v518_v48  ;;  %v1032_v0 = vmul.f32 %v2660_v1, %v519_v49  ;;  %v539_v51 = vld [vmem:[%s2653_s13 + $0xa50] sm:$0xff]  ;;  %v540_v52 = vld [vmem:[%s2653_s13 + $0xa58] sm:$0xff]  ;;  %v541_v53 = vld [vmem:[%s2653_s13 + $0xa60] sm:$0xff] }
 0x108   : > { %2050 = vst [vmem:[%s2692_s24 + $0x978] sm:$0xff] %v1538_v55  ;;  %v1541_v6 = vadd.f32 %v2662_v2, %v1028_v56  ;;  %v1542_v7 = vadd.f32 %v2662_v2, %v1029_v57  ;;  %v1543_v8 = vadd.f32 %v2662_v2, %v1030_v58  ;;  %v1033_v9 = vmul.f32 %v2660_v1, %v520_v54  ;;  %v542_v58 = vld [vmem:[%s2653_s13 + $0xa68] sm:$0xff] }
 0x109   : > { %2051 = vst [vmem:[%s2692_s24 + $0x980] sm:$0xff] %v1539_v61  ;;  %2052 = vst [vmem:[%s2692_s24 + $0x988] sm:$0xff] %v1540_v62  ;;  %v1544_v12 = vadd.f32 %v2662_v2, %v1031_v63  ;;  %v1545_v13 = vadd.f32 %v2662_v2, %v1032_v0  ;;  %v1034_v14 = vmul.f32 %v2660_v1, %v521_v59  ;;  %v543_v59 = vld [vmem:[%s2653_s13 + $0xa70] sm:$0xff]  ;;  %v544_v0 = vld [vmem:[%s2653_s13 + $0xa78] sm:$0xff] }
 0x10a   : > { %v1035_v15 = vmul.f32 %v2660_v1, %v522_v60  ;;  %2053 = vst [vmem:[%s2692_s24 + $0x990] sm:$0xff] %v1541_v6  ;;  %2054 = vst [vmem:[%s2692_s24 + $0x998] sm:$0xff] %v1542_v7  ;;  %v1546_v17 = vadd.f32 %v2662_v2, %v1033_v9  ;;  %v1036_v18 = vmul.f32 %v2660_v1, %v523_v3  ;;  %v545_v7 = vld [vmem:[%s2653_s13 + $0xa80] sm:$0xff] }
 0x10b   : > { %2055 = vst [vmem:[%s2692_s24 + $0x9a0] sm:$0xff] %v1543_v8  ;;  %v1037_v19 = vmul.f32 %v2660_v1, %v524_v4  ;;  %v1038_v20 = vmul.f32 %v2660_v1, %v525_v5  ;;  %2056 = vst [vmem:[%s2692_s24 + $0x9a8] sm:$0xff] %v1544_v12  ;;  %v1547_v23 = vadd.f32 %v2662_v2, %v1034_v14  ;;  %v546_v8 = vld [vmem:[%s2653_s13 + $0xa88] sm:$0xff]  ;;  %v548_v14 = vld [vmem:[%s2653_s13 + $0xa98] sm:$0xff] }
 0x10c   : > { %2057 = vst [vmem:[%s2692_s24 + $0x9b0] sm:$0xff] %v1545_v13  ;;  %v1548_v24 = vadd.f32 %v2662_v2, %v1035_v15  ;;  %v1039_v25 = vmul.f32 %v2660_v1, %v526_v10  ;;  %v1040_v26 = vmul.f32 %v2660_v1, %v527_v11  ;;  %2058 = vst [vmem:[%s2692_s24 + $0x9b8] sm:$0xff] %v1546_v17  ;;  %v547_v13 = vld [vmem:[%s2653_s13 + $0xa90] sm:$0xff]  ;;  %v549_v15 = vld [vmem:[%s2653_s13 + $0xaa0] sm:$0xff] }
 0x10d   : > { %v1549_v30 = vadd.f32 %v2662_v2, %v1036_v18  ;;  %v1550_v31 = vadd.f32 %v2662_v2, %v1037_v19  ;;  %v1551_v32 = vadd.f32 %v2662_v2, %v1038_v20  ;;  %v1041_v33 = vmul.f32 %v2660_v1, %v528_v16  ;;  %2059 = vst [vmem:[%s2692_s24 + $0x9c0] sm:$0xff] %v1547_v23  ;;  %v550_v20 = vld [vmem:[%s2653_s13 + $0xaa8] sm:$0xff] }
 0x10e   : > { %2060 = vst [vmem:[%s2692_s24 + $0x9c8] sm:$0xff] %v1548_v24  ;;  %v1552_v36 = vadd.f32 %v2662_v2, %v1039_v25  ;;  %v1553_v37 = vadd.f32 %v2662_v2, %v1040_v26  ;;  %v1042_v38 = vmul.f32 %v2660_v1, %v529_v21  ;;  %v1043_v39 = vmul.f32 %v2660_v1, %v530_v22  ;;  %v551_v21 = vld [vmem:[%s2653_s13 + $0xab0] sm:$0xff]  ;;  %v552_v26 = vld [vmem:[%s2653_s13 + $0xab8] sm:$0xff] }
 0x10f   : > { %2061 = vst [vmem:[%s2692_s24 + $0x9d0] sm:$0xff] %v1549_v30  ;;  %2062 = vst [vmem:[%s2692_s24 + $0x9d8] sm:$0xff] %v1550_v31  ;;  %v1554_v41 = vadd.f32 %v2662_v2, %v1041_v33  ;;  %v1044_v42 = vmul.f32 %v2660_v1, %v531_v27  ;;  %v1045_v43 = vmul.f32 %v2660_v1, %v532_v28  ;;  %v553_v31 = vld [vmem:[%s2653_s13 + $0xac0] sm:$0xff] }
 0x110   : > { %2063 = vst [vmem:[%s2692_s24 + $0x9e0] sm:$0xff] %v1551_v32  ;;  %v1046_v44 = vmul.f32 %v2660_v1, %v533_v29  ;;  %2064 = vst [vmem:[%s2692_s24 + $0x9e8] sm:$0xff] %v1552_v36  ;;  %v1555_v47 = vadd.f32 %v2662_v2, %v1042_v38  ;;  %v1556_v48 = vadd.f32 %v2662_v2, %v1043_v39  ;;  %v554_v32 = vld [vmem:[%s2653_s13 + $0xac8] sm:$0xff]  ;;  %v556_v38 = vld [vmem:[%s2653_s13 + $0xad8] sm:$0xff] }
 0x111   : > { %2065 = vst [vmem:[%s2692_s24 + $0x9f0] sm:$0xff] %v1553_v37  ;;  %v1047_v49 = vmul.f32 %v2660_v1, %v534_v34  ;;  %v1048_v50 = vmul.f32 %v2660_v1, %v535_v35  ;;  %2066 = vst [vmem:[%s2692_s24 + $0x9f8] sm:$0xff] %v1554_v41  ;;  %v1557_v54 = vadd.f32 %v2662_v2, %v1044_v42  ;;  %v555_v37 = vld [vmem:[%s2653_s13 + $0xad0] sm:$0xff]  ;;  %v557_v39 = vld [vmem:[%s2653_s13 + $0xae0] sm:$0xff] }
 0x112   : > { %v1558_v55 = vadd.f32 %v2662_v2, %v1045_v43  ;;  %v1559_v56 = vadd.f32 %v2662_v2, %v1046_v44  ;;  %v1049_v57 = vmul.f32 %v2660_v1, %v536_v40  ;;  %2067 = vst [vmem:[%s2692_s24 + $0xa00] sm:$0xff] %v1555_v47  ;;  %2068 = vst [vmem:[%s2692_s24 + $0xa08] sm:$0xff] %v1556_v48  ;;  %v558_v44 = vld [vmem:[%s2653_s13 + $0xae8] sm:$0xff] }
 0x113   : > { %v1560_v60 = vadd.f32 %v2662_v2, %v1047_v49  ;;  %v1561_v61 = vadd.f32 %v2662_v2, %v1048_v50  ;;  %v1050_v62 = vmul.f32 %v2660_v1, %v537_v45  ;;  %v1051_v63 = vmul.f32 %v2660_v1, %v538_v46  ;;  %2069 = vst [vmem:[%s2692_s24 + $0xa10] sm:$0xff] %v1557_v54  ;;  %v559_v45 = vld [vmem:[%s2653_s13 + $0xaf0] sm:$0xff]  ;;  %v560_v50 = vld [vmem:[%s2653_s13 + $0xaf8] sm:$0xff] }
 0x114   : > { %2070 = vst [vmem:[%s2692_s24 + $0xa18] sm:$0xff] %v1558_v55  ;;  %2071 = vst [vmem:[%s2692_s24 + $0xa20] sm:$0xff] %v1559_v56  ;;  %v1562_v3 = vadd.f32 %v2662_v2, %v1049_v57  ;;  %v1052_v4 = vmul.f32 %v2660_v1, %v539_v51  ;;  %v1053_v5 = vmul.f32 %v2660_v1, %v540_v52  ;;  %v561_v55 = vld [vmem:[%s2653_s13 + $0xb00] sm:$0xff]  ;;  %v562_v56 = vld [vmem:[%s2653_s13 + $0xb08] sm:$0xff] }
 0x115   : > { %v1054_v6 = vmul.f32 %v2660_v1, %v541_v53  ;;  %2072 = vst [vmem:[%s2692_s24 + $0xa28] sm:$0xff] %v1560_v60  ;;  %2073 = vst [vmem:[%s2692_s24 + $0xa30] sm:$0xff] %v1561_v61  ;;  %v1563_v9 = vadd.f32 %v2662_v2, %v1050_v62  ;;  %v1564_v10 = vadd.f32 %v2662_v2, %v1051_v63  ;;  %v563_v61 = vld [vmem:[%s2653_s13 + $0xb10] sm:$0xff]  ;;  %v564_v62 = vld [vmem:[%s2653_s13 + $0xb18] sm:$0xff] }
 0x116   : > { %v1055_v11 = vmul.f32 %v2660_v1, %v542_v58  ;;  %v1056_v12 = vmul.f32 %v2660_v1, %v543_v59  ;;  %2074 = vst [vmem:[%s2692_s24 + $0xa38] sm:$0xff] %v1562_v3  ;;  %v1565_v16 = vadd.f32 %v2662_v2, %v1052_v4  ;;  %v1566_v17 = vadd.f32 %v2662_v2, %v1053_v5  ;;  %v565_v63 = vld [vmem:[%s2653_s13 + $0xb20] sm:$0xff] }
 0x117   : > { %v1567_v18 = vadd.f32 %v2662_v2, %v1054_v6  ;;  %v1057_v19 = vmul.f32 %v2660_v1, %v544_v0  ;;  %2075 = vst [vmem:[%s2692_s24 + $0xa40] sm:$0xff] %v1563_v9  ;;  %2076 = vst [vmem:[%s2692_s24 + $0xa48] sm:$0xff] %v1564_v10  ;;  %v1058_v24 = vmul.f32 %v2660_v1, %v545_v7  ;;  %v566_v6 = vld [vmem:[%s2653_s13 + $0xb28] sm:$0xff]  ;;  %v567_v7 = vld [vmem:[%s2653_s13 + $0xb30] sm:$0xff] }
 0x118   : > { %v1568_v22 = vadd.f32 %v2662_v2, %v1055_v11  ;;  %v1569_v23 = vadd.f32 %v2662_v2, %v1056_v12  ;;  %v1059_v25 = vmul.f32 %v2660_v1, %v546_v8  ;;  %2077 = vst [vmem:[%s2692_s24 + $0xa50] sm:$0xff] %v1565_v16  ;;  %2078 = vst [vmem:[%s2692_s24 + $0xa58] sm:$0xff] %v1566_v17  ;;  %v568_v12 = vld [vmem:[%s2653_s13 + $0xb38] sm:$0xff]  ;;  %v569_v17 = vld [vmem:[%s2653_s13 + $0xb40] sm:$0xff] }
 0x119   : > { %2079 = vst [vmem:[%s2692_s24 + $0xa60] sm:$0xff] %v1567_v18  ;;  %v1570_v27 = vadd.f32 %v2662_v2, %v1057_v19  ;;  %v1060_v28 = vmul.f32 %v2660_v1, %v547_v13  ;;  %v1061_v29 = vmul.f32 %v2660_v1, %v548_v14  ;;  %v1062_v30 = vmul.f32 %v2660_v1, %v549_v15  ;;  %v570_v18 = vld [vmem:[%s2653_s13 + $0xb48] sm:$0xff] }
 0x11a   : > { %2080 = vst [vmem:[%s2692_s24 + $0xa68] sm:$0xff] %v1568_v22  ;;  %2081 = vst [vmem:[%s2692_s24 + $0xa70] sm:$0xff] %v1569_v23  ;;  %v1571_v33 = vadd.f32 %v2662_v2, %v1058_v24  ;;  %v1572_v34 = vadd.f32 %v2662_v2, %v1059_v25  ;;  %v1063_v35 = vmul.f32 %v2660_v1, %v550_v20  ;;  %v571_v23 = vld [vmem:[%s2653_s13 + $0xb50] sm:$0xff]  ;;  %v572_v24 = vld [vmem:[%s2653_s13 + $0xb58] sm:$0xff] }
 0x11b   : > { %v1064_v36 = vmul.f32 %v2660_v1, %v551_v21  ;;  %2082 = vst [vmem:[%s2692_s24 + $0xa78] sm:$0xff] %v1570_v27  ;;  %v1573_v40 = vadd.f32 %v2662_v2, %v1060_v28  ;;  %v1574_v41 = vadd.f32 %v2662_v2, %v1061_v29  ;;  %v1575_v42 = vadd.f32 %v2662_v2, %v1062_v30  ;;  %v573_v25 = vld [vmem:[%s2653_s13 + $0xb60] sm:$0xff]  ;;  %v574_v30 = vld [vmem:[%s2653_s13 + $0xb68] sm:$0xff] }
 0x11c   : > { %v1065_v43 = vmul.f32 %v2660_v1, %v552_v26  ;;  %2083 = vst [vmem:[%s2692_s24 + $0xa80] sm:$0xff] %v1571_v33  ;;  %2084 = vst [vmem:[%s2692_s24 + $0xa88] sm:$0xff] %v1572_v34  ;;  %v1576_v46 = vadd.f32 %v2662_v2, %v1063_v35  ;;  %v1066_v48 = vmul.f32 %v2660_v1, %v553_v31  ;;  %v575_v31 = vld [vmem:[%s2653_s13 + $0xb70] sm:$0xff] }
 0x11d   : > { %v1577_v47 = vadd.f32 %v2662_v2, %v1064_v36  ;;  %v1067_v49 = vmul.f32 %v2660_v1, %v554_v32  ;;  %2085 = vst [vmem:[%s2692_s24 + $0xa90] sm:$0xff] %v1573_v40  ;;  %2086 = vst [vmem:[%s2692_s24 + $0xa98] sm:$0xff] %v1574_v41  ;;  %v1068_v52 = vmul.f32 %v2660_v1, %v555_v37  ;;  %v576_v36 = vld [vmem:[%s2653_s13 + $0xb78] sm:$0xff]  ;;  %v577_v41 = vld [vmem:[%s2653_s13 + $0xb80] sm:$0xff] }
 0x11e   : > { %2087 = vst [vmem:[%s2692_s24 + $0xaa0] sm:$0xff] %v1575_v42  ;;  %v1578_v51 = vadd.f32 %v2662_v2, %v1065_v43  ;;  %v1069_v53 = vmul.f32 %v2660_v1, %v556_v38  ;;  %v1070_v54 = vmul.f32 %v2660_v1, %v557_v39  ;;  %2088 = vst [vmem:[%s2692_s24 + $0xaa8] sm:$0xff] %v1576_v46  ;;  %v578_v42 = vld [vmem:[%s2653_s13 + $0xb88] sm:$0xff] }
 0x11f   : > { %2089 = vst [vmem:[%s2692_s24 + $0xab0] sm:$0xff] %v1577_v47  ;;  %v1579_v57 = vadd.f32 %v2662_v2, %v1066_v48  ;;  %v1580_v58 = vadd.f32 %v2662_v2, %v1067_v49  ;;  %v1071_v59 = vmul.f32 %v2660_v1, %v558_v44  ;;  %v1072_v60 = vmul.f32 %v2660_v1, %v559_v45  ;;  %v579_v47 = vld [vmem:[%s2653_s13 + $0xb90] sm:$0xff]  ;;  %v580_v48 = vld [vmem:[%s2653_s13 + $0xb98] sm:$0xff]  ;;  %v581_v49 = vld [vmem:[%s2653_s13 + $0xba0] sm:$0xff] }
 0x120   : > { %2090 = vst [vmem:[%s2692_s24 + $0xab8] sm:$0xff] %v1578_v51  ;;  %v1581_v0 = vadd.f32 %v2662_v2, %v1068_v52  ;;  %v1582_v3 = vadd.f32 %v2662_v2, %v1069_v53  ;;  %v1583_v4 = vadd.f32 %v2662_v2, %v1070_v54  ;;  %v1073_v5 = vmul.f32 %v2660_v1, %v560_v50  ;;  %v582_v54 = vld [vmem:[%s2653_s13 + $0xba8] sm:$0xff] }
 0x121   : > { %2091 = vst [vmem:[%s2692_s24 + $0xac0] sm:$0xff] %v1579_v57  ;;  %2092 = vst [vmem:[%s2692_s24 + $0xac8] sm:$0xff] %v1580_v58  ;;  %v1584_v8 = vadd.f32 %v2662_v2, %v1071_v59  ;;  %v1585_v9 = vadd.f32 %v2662_v2, %v1072_v60  ;;  %v1074_v10 = vmul.f32 %v2660_v1, %v561_v55  ;;  %v583_v55 = vld [vmem:[%s2653_s13 + $0xbb0] sm:$0xff]  ;;  %v584_v60 = vld [vmem:[%s2653_s13 + $0xbb8] sm:$0xff] }
 0x122   : > { %v1075_v11 = vmul.f32 %v2660_v1, %v562_v56  ;;  %2093 = vst [vmem:[%s2692_s24 + $0xad0] sm:$0xff] %v1581_v0  ;;  %2094 = vst [vmem:[%s2692_s24 + $0xad8] sm:$0xff] %v1582_v3  ;;  %v1586_v13 = vadd.f32 %v2662_v2, %v1073_v5  ;;  %v1076_v14 = vmul.f32 %v2660_v1, %v563_v61  ;;  %v585_v3 = vld [vmem:[%s2653_s13 + $0xbc0] sm:$0xff] }
 0x123   : > { %2095 = vst [vmem:[%s2692_s24 + $0xae0] sm:$0xff] %v1583_v4  ;;  %v1077_v15 = vmul.f32 %v2660_v1, %v564_v62  ;;  %v1078_v16 = vmul.f32 %v2660_v1, %v565_v63  ;;  %2096 = vst [vmem:[%s2692_s24 + $0xae8] sm:$0xff] %v1584_v8  ;;  %v1587_v19 = vadd.f32 %v2662_v2, %v1074_v10  ;;  %v586_v4 = vld [vmem:[%s2653_s13 + $0xbc8] sm:$0xff]  ;;  %v588_v10 = vld [vmem:[%s2653_s13 + $0xbd8] sm:$0xff] }
 0x124   : > { %2097 = vst [vmem:[%s2692_s24 + $0xaf0] sm:$0xff] %v1585_v9  ;;  %v1588_v20 = vadd.f32 %v2662_v2, %v1075_v11  ;;  %v1079_v21 = vmul.f32 %v2660_v1, %v566_v6  ;;  %v1080_v22 = vmul.f32 %v2660_v1, %v567_v7  ;;  %2098 = vst [vmem:[%s2692_s24 + $0xaf8] sm:$0xff] %v1586_v13  ;;  %v587_v9 = vld [vmem:[%s2653_s13 + $0xbd0] sm:$0xff]  ;;  %v589_v11 = vld [vmem:[%s2653_s13 + $0xbe0] sm:$0xff] }
 0x125   : > { %v1589_v26 = vadd.f32 %v2662_v2, %v1076_v14  ;;  %v1590_v27 = vadd.f32 %v2662_v2, %v1077_v15  ;;  %v1591_v28 = vadd.f32 %v2662_v2, %v1078_v16  ;;  %v1081_v29 = vmul.f32 %v2660_v1, %v568_v12  ;;  %2099 = vst [vmem:[%s2692_s24 + $0xb00] sm:$0xff] %v1587_v19  ;;  %v590_v16 = vld [vmem:[%s2653_s13 + $0xbe8] sm:$0xff] }
 0x126   : > { %2100 = vst [vmem:[%s2692_s24 + $0xb08] sm:$0xff] %v1588_v20  ;;  %v1592_v32 = vadd.f32 %v2662_v2, %v1079_v21  ;;  %v1593_v33 = vadd.f32 %v2662_v2, %v1080_v22  ;;  %v1082_v34 = vmul.f32 %v2660_v1, %v569_v17  ;;  %v1083_v35 = vmul.f32 %v2660_v1, %v570_v18  ;;  %v591_v17 = vld [vmem:[%s2653_s13 + $0xbf0] sm:$0xff]  ;;  %v592_v22 = vld [vmem:[%s2653_s13 + $0xbf8] sm:$0xff] }
 0x127   : > { %2101 = vst [vmem:[%s2692_s24 + $0xb10] sm:$0xff] %v1589_v26  ;;  %2102 = vst [vmem:[%s2692_s24 + $0xb18] sm:$0xff] %v1590_v27  ;;  %v1594_v37 = vadd.f32 %v2662_v2, %v1081_v29  ;;  %v1084_v38 = vmul.f32 %v2660_v1, %v571_v23  ;;  %v1085_v39 = vmul.f32 %v2660_v1, %v572_v24  ;;  %v593_v27 = vld [vmem:[%s2653_s13 + $0xc00] sm:$0xff] }
 0x128   : > { %2103 = vst [vmem:[%s2692_s24 + $0xb20] sm:$0xff] %v1591_v28  ;;  %v1086_v40 = vmul.f32 %v2660_v1, %v573_v25  ;;  %2104 = vst [vmem:[%s2692_s24 + $0xb28] sm:$0xff] %v1592_v32  ;;  %v1595_v43 = vadd.f32 %v2662_v2, %v1082_v34  ;;  %v1596_v44 = vadd.f32 %v2662_v2, %v1083_v35  ;;  %v594_v28 = vld [vmem:[%s2653_s13 + $0xc08] sm:$0xff]  ;;  %v596_v34 = vld [vmem:[%s2653_s13 + $0xc18] sm:$0xff] }
 0x129   : > { %2105 = vst [vmem:[%s2692_s24 + $0xb30] sm:$0xff] %v1593_v33  ;;  %v1087_v45 = vmul.f32 %v2660_v1, %v574_v30  ;;  %v1088_v46 = vmul.f32 %v2660_v1, %v575_v31  ;;  %2106 = vst [vmem:[%s2692_s24 + $0xb38] sm:$0xff] %v1594_v37  ;;  %v1597_v50 = vadd.f32 %v2662_v2, %v1084_v38  ;;  %v595_v33 = vld [vmem:[%s2653_s13 + $0xc10] sm:$0xff]  ;;  %v597_v35 = vld [vmem:[%s2653_s13 + $0xc20] sm:$0xff] }
 0x12a   : > { %v1598_v51 = vadd.f32 %v2662_v2, %v1085_v39  ;;  %v1599_v52 = vadd.f32 %v2662_v2, %v1086_v40  ;;  %v1089_v53 = vmul.f32 %v2660_v1, %v576_v36  ;;  %2107 = vst [vmem:[%s2692_s24 + $0xb40] sm:$0xff] %v1595_v43  ;;  %2108 = vst [vmem:[%s2692_s24 + $0xb48] sm:$0xff] %v1596_v44  ;;  %v598_v40 = vld [vmem:[%s2653_s13 + $0xc28] sm:$0xff] }
 0x12b   : > { %v1600_v56 = vadd.f32 %v2662_v2, %v1087_v45  ;;  %v1601_v57 = vadd.f32 %v2662_v2, %v1088_v46  ;;  %v1090_v58 = vmul.f32 %v2660_v1, %v577_v41  ;;  %v1091_v59 = vmul.f32 %v2660_v1, %v578_v42  ;;  %2109 = vst [vmem:[%s2692_s24 + $0xb50] sm:$0xff] %v1597_v50  ;;  %v599_v41 = vld [vmem:[%s2653_s13 + $0xc30] sm:$0xff]  ;;  %v600_v46 = vld [vmem:[%s2653_s13 + $0xc38] sm:$0xff] }
 0x12c   : > { %2110 = vst [vmem:[%s2692_s24 + $0xb58] sm:$0xff] %v1598_v51  ;;  %2111 = vst [vmem:[%s2692_s24 + $0xb60] sm:$0xff] %v1599_v52  ;;  %v1602_v61 = vadd.f32 %v2662_v2, %v1089_v53  ;;  %v1092_v62 = vmul.f32 %v2660_v1, %v579_v47  ;;  %v1093_v63 = vmul.f32 %v2660_v1, %v580_v48  ;;  %v601_v51 = vld [vmem:[%s2653_s13 + $0xc40] sm:$0xff]  ;;  %v602_v52 = vld [vmem:[%s2653_s13 + $0xc48] sm:$0xff] }
 0x12d   : > { %v1094_v0 = vmul.f32 %v2660_v1, %v581_v49  ;;  %2112 = vst [vmem:[%s2692_s24 + $0xb68] sm:$0xff] %v1600_v56  ;;  %2113 = vst [vmem:[%s2692_s24 + $0xb70] sm:$0xff] %v1601_v57  ;;  %v1603_v5 = vadd.f32 %v2662_v2, %v1090_v58  ;;  %v1604_v6 = vadd.f32 %v2662_v2, %v1091_v59  ;;  %v603_v57 = vld [vmem:[%s2653_s13 + $0xc50] sm:$0xff]  ;;  %v604_v58 = vld [vmem:[%s2653_s13 + $0xc58] sm:$0xff] }
 0x12e   : > { %v1095_v7 = vmul.f32 %v2660_v1, %v582_v54  ;;  %v1096_v8 = vmul.f32 %v2660_v1, %v583_v55  ;;  %2114 = vst [vmem:[%s2692_s24 + $0xb78] sm:$0xff] %v1602_v61  ;;  %v1605_v12 = vadd.f32 %v2662_v2, %v1092_v62  ;;  %v1606_v13 = vadd.f32 %v2662_v2, %v1093_v63  ;;  %v605_v59 = vld [vmem:[%s2653_s13 + $0xc60] sm:$0xff] }
 0x12f   : > { %v1607_v14 = vadd.f32 %v2662_v2, %v1094_v0  ;;  %v1097_v15 = vmul.f32 %v2660_v1, %v584_v60  ;;  %2115 = vst [vmem:[%s2692_s24 + $0xb80] sm:$0xff] %v1603_v5  ;;  %2116 = vst [vmem:[%s2692_s24 + $0xb88] sm:$0xff] %v1604_v6  ;;  %v1098_v20 = vmul.f32 %v2660_v1, %v585_v3  ;;  %v606_v0 = vld [vmem:[%s2653_s13 + $0xc68] sm:$0xff]  ;;  %v607_v3 = vld [vmem:[%s2653_s13 + $0xc70] sm:$0xff] }
 0x130   : > { %v1608_v18 = vadd.f32 %v2662_v2, %v1095_v7  ;;  %v1609_v19 = vadd.f32 %v2662_v2, %v1096_v8  ;;  %v1099_v21 = vmul.f32 %v2660_v1, %v586_v4  ;;  %2117 = vst [vmem:[%s2692_s24 + $0xb90] sm:$0xff] %v1605_v12  ;;  %2118 = vst [vmem:[%s2692_s24 + $0xb98] sm:$0xff] %v1606_v13  ;;  %v608_v8 = vld [vmem:[%s2653_s13 + $0xc78] sm:$0xff]  ;;  %v609_v13 = vld [vmem:[%s2653_s13 + $0xc80] sm:$0xff] }
 0x131   : > { %2119 = vst [vmem:[%s2692_s24 + $0xba0] sm:$0xff] %v1607_v14  ;;  %v1610_v23 = vadd.f32 %v2662_v2, %v1097_v15  ;;  %v1100_v24 = vmul.f32 %v2660_v1, %v587_v9  ;;  %v1101_v25 = vmul.f32 %v2660_v1, %v588_v10  ;;  %v1102_v26 = vmul.f32 %v2660_v1, %v589_v11  ;;  %v610_v14 = vld [vmem:[%s2653_s13 + $0xc88] sm:$0xff] }
 0x132   : > { %2120 = vst [vmem:[%s2692_s24 + $0xba8] sm:$0xff] %v1608_v18  ;;  %2121 = vst [vmem:[%s2692_s24 + $0xbb0] sm:$0xff] %v1609_v19  ;;  %v1611_v29 = vadd.f32 %v2662_v2, %v1098_v20  ;;  %v1612_v30 = vadd.f32 %v2662_v2, %v1099_v21  ;;  %v1103_v31 = vmul.f32 %v2660_v1, %v590_v16  ;;  %v611_v19 = vld [vmem:[%s2653_s13 + $0xc90] sm:$0xff]  ;;  %v612_v20 = vld [vmem:[%s2653_s13 + $0xc98] sm:$0xff] }
 0x133   : > { %v1104_v32 = vmul.f32 %v2660_v1, %v591_v17  ;;  %2122 = vst [vmem:[%s2692_s24 + $0xbb8] sm:$0xff] %v1610_v23  ;;  %v1613_v36 = vadd.f32 %v2662_v2, %v1100_v24  ;;  %v1614_v37 = vadd.f32 %v2662_v2, %v1101_v25  ;;  %v1615_v38 = vadd.f32 %v2662_v2, %v1102_v26  ;;  %v613_v21 = vld [vmem:[%s2653_s13 + $0xca0] sm:$0xff]  ;;  %v614_v26 = vld [vmem:[%s2653_s13 + $0xca8] sm:$0xff] }
 0x134   : > { %v1105_v39 = vmul.f32 %v2660_v1, %v592_v22  ;;  %2123 = vst [vmem:[%s2692_s24 + $0xbc0] sm:$0xff] %v1611_v29  ;;  %2124 = vst [vmem:[%s2692_s24 + $0xbc8] sm:$0xff] %v1612_v30  ;;  %v1616_v42 = vadd.f32 %v2662_v2, %v1103_v31  ;;  %v1106_v44 = vmul.f32 %v2660_v1, %v593_v27  ;;  %v615_v27 = vld [vmem:[%s2653_s13 + $0xcb0] sm:$0xff] }
 0x135   : > { %v1617_v43 = vadd.f32 %v2662_v2, %v1104_v32  ;;  %v1107_v45 = vmul.f32 %v2660_v1, %v594_v28  ;;  %2125 = vst [vmem:[%s2692_s24 + $0xbd0] sm:$0xff] %v1613_v36  ;;  %2126 = vst [vmem:[%s2692_s24 + $0xbd8] sm:$0xff] %v1614_v37  ;;  %v1108_v48 = vmul.f32 %v2660_v1, %v595_v33  ;;  %v616_v32 = vld [vmem:[%s2653_s13 + $0xcb8] sm:$0xff]  ;;  %v617_v37 = vld [vmem:[%s2653_s13 + $0xcc0] sm:$0xff] }
 0x136   : > { %2127 = vst [vmem:[%s2692_s24 + $0xbe0] sm:$0xff] %v1615_v38  ;;  %v1618_v47 = vadd.f32 %v2662_v2, %v1105_v39  ;;  %v1109_v49 = vmul.f32 %v2660_v1, %v596_v34  ;;  %v1110_v50 = vmul.f32 %v2660_v1, %v597_v35  ;;  %2128 = vst [vmem:[%s2692_s24 + $0xbe8] sm:$0xff] %v1616_v42  ;;  %v618_v38 = vld [vmem:[%s2653_s13 + $0xcc8] sm:$0xff] }
 0x137   : > { %2129 = vst [vmem:[%s2692_s24 + $0xbf0] sm:$0xff] %v1617_v43  ;;  %v1619_v53 = vadd.f32 %v2662_v2, %v1106_v44  ;;  %v1620_v54 = vadd.f32 %v2662_v2, %v1107_v45  ;;  %v1111_v55 = vmul.f32 %v2660_v1, %v598_v40  ;;  %v1112_v56 = vmul.f32 %v2660_v1, %v599_v41  ;;  %v619_v43 = vld [vmem:[%s2653_s13 + $0xcd0] sm:$0xff]  ;;  %v620_v44 = vld [vmem:[%s2653_s13 + $0xcd8] sm:$0xff]  ;;  %v621_v45 = vld [vmem:[%s2653_s13 + $0xce0] sm:$0xff] }
 0x138   : > { %2130 = vst [vmem:[%s2692_s24 + $0xbf8] sm:$0xff] %v1618_v47  ;;  %v1621_v60 = vadd.f32 %v2662_v2, %v1108_v48  ;;  %v1622_v61 = vadd.f32 %v2662_v2, %v1109_v49  ;;  %v1623_v62 = vadd.f32 %v2662_v2, %v1110_v50  ;;  %v1113_v63 = vmul.f32 %v2660_v1, %v600_v46  ;;  %v622_v50 = vld [vmem:[%s2653_s13 + $0xce8] sm:$0xff] }
 0x139   : > { %2131 = vst [vmem:[%s2692_s24 + $0xc00] sm:$0xff] %v1619_v53  ;;  %2132 = vst [vmem:[%s2692_s24 + $0xc08] sm:$0xff] %v1620_v54  ;;  %v1624_v4 = vadd.f32 %v2662_v2, %v1111_v55  ;;  %v1625_v5 = vadd.f32 %v2662_v2, %v1112_v56  ;;  %v1114_v6 = vmul.f32 %v2660_v1, %v601_v51  ;;  %v623_v51 = vld [vmem:[%s2653_s13 + $0xcf0] sm:$0xff]  ;;  %v624_v56 = vld [vmem:[%s2653_s13 + $0xcf8] sm:$0xff] }
 0x13a   : > { %v1115_v7 = vmul.f32 %v2660_v1, %v602_v52  ;;  %2133 = vst [vmem:[%s2692_s24 + $0xc10] sm:$0xff] %v1621_v60  ;;  %2134 = vst [vmem:[%s2692_s24 + $0xc18] sm:$0xff] %v1622_v61  ;;  %v1626_v9 = vadd.f32 %v2662_v2, %v1113_v63  ;;  %v1116_v10 = vmul.f32 %v2660_v1, %v603_v57  ;;  %v625_v61 = vld [vmem:[%s2653_s13 + $0xd00] sm:$0xff] }
 0x13b   : > { %2135 = vst [vmem:[%s2692_s24 + $0xc20] sm:$0xff] %v1623_v62  ;;  %v1117_v11 = vmul.f32 %v2660_v1, %v604_v58  ;;  %v1118_v12 = vmul.f32 %v2660_v1, %v605_v59  ;;  %2136 = vst [vmem:[%s2692_s24 + $0xc28] sm:$0xff] %v1624_v4  ;;  %v1627_v15 = vadd.f32 %v2662_v2, %v1114_v6  ;;  %v626_v62 = vld [vmem:[%s2653_s13 + $0xd08] sm:$0xff]  ;;  %v628_v6 = vld [vmem:[%s2653_s13 + $0xd18] sm:$0xff] }
 0x13c   : > { %2137 = vst [vmem:[%s2692_s24 + $0xc30] sm:$0xff] %v1625_v5  ;;  %v1628_v16 = vadd.f32 %v2662_v2, %v1115_v7  ;;  %v1119_v17 = vmul.f32 %v2660_v1, %v606_v0  ;;  %v1120_v18 = vmul.f32 %v2660_v1, %v607_v3  ;;  %2138 = vst [vmem:[%s2692_s24 + $0xc38] sm:$0xff] %v1626_v9  ;;  %v627_v5 = vld [vmem:[%s2653_s13 + $0xd10] sm:$0xff]  ;;  %v629_v7 = vld [vmem:[%s2653_s13 + $0xd20] sm:$0xff] }
 0x13d   : > { %v1629_v22 = vadd.f32 %v2662_v2, %v1116_v10  ;;  %v1630_v23 = vadd.f32 %v2662_v2, %v1117_v11  ;;  %v1631_v24 = vadd.f32 %v2662_v2, %v1118_v12  ;;  %v1121_v25 = vmul.f32 %v2660_v1, %v608_v8  ;;  %2139 = vst [vmem:[%s2692_s24 + $0xc40] sm:$0xff] %v1627_v15  ;;  %v630_v12 = vld [vmem:[%s2653_s13 + $0xd28] sm:$0xff] }
 0x13e   : > { %2140 = vst [vmem:[%s2692_s24 + $0xc48] sm:$0xff] %v1628_v16  ;;  %v1632_v28 = vadd.f32 %v2662_v2, %v1119_v17  ;;  %v1633_v29 = vadd.f32 %v2662_v2, %v1120_v18  ;;  %v1122_v30 = vmul.f32 %v2660_v1, %v609_v13  ;;  %v1123_v31 = vmul.f32 %v2660_v1, %v610_v14  ;;  %v631_v13 = vld [vmem:[%s2653_s13 + $0xd30] sm:$0xff]  ;;  %v632_v18 = vld [vmem:[%s2653_s13 + $0xd38] sm:$0xff] }
 0x13f   : > { %2141 = vst [vmem:[%s2692_s24 + $0xc50] sm:$0xff] %v1629_v22  ;;  %2142 = vst [vmem:[%s2692_s24 + $0xc58] sm:$0xff] %v1630_v23  ;;  %v1634_v33 = vadd.f32 %v2662_v2, %v1121_v25  ;;  %v1124_v34 = vmul.f32 %v2660_v1, %v611_v19  ;;  %v1125_v35 = vmul.f32 %v2660_v1, %v612_v20  ;;  %v633_v23 = vld [vmem:[%s2653_s13 + $0xd40] sm:$0xff] }
 0x140   : > { %2143 = vst [vmem:[%s2692_s24 + $0xc60] sm:$0xff] %v1631_v24  ;;  %v1126_v36 = vmul.f32 %v2660_v1, %v613_v21  ;;  %2144 = vst [vmem:[%s2692_s24 + $0xc68] sm:$0xff] %v1632_v28  ;;  %v1635_v39 = vadd.f32 %v2662_v2, %v1122_v30  ;;  %v1636_v40 = vadd.f32 %v2662_v2, %v1123_v31  ;;  %v634_v24 = vld [vmem:[%s2653_s13 + $0xd48] sm:$0xff]  ;;  %v636_v30 = vld [vmem:[%s2653_s13 + $0xd58] sm:$0xff] }
 0x141   : > { %2145 = vst [vmem:[%s2692_s24 + $0xc70] sm:$0xff] %v1633_v29  ;;  %v1127_v41 = vmul.f32 %v2660_v1, %v614_v26  ;;  %v1128_v42 = vmul.f32 %v2660_v1, %v615_v27  ;;  %2146 = vst [vmem:[%s2692_s24 + $0xc78] sm:$0xff] %v1634_v33  ;;  %v1637_v46 = vadd.f32 %v2662_v2, %v1124_v34  ;;  %v635_v29 = vld [vmem:[%s2653_s13 + $0xd50] sm:$0xff]  ;;  %v637_v31 = vld [vmem:[%s2653_s13 + $0xd60] sm:$0xff] }
 0x142   : > { %v1638_v47 = vadd.f32 %v2662_v2, %v1125_v35  ;;  %v1639_v48 = vadd.f32 %v2662_v2, %v1126_v36  ;;  %v1129_v49 = vmul.f32 %v2660_v1, %v616_v32  ;;  %2147 = vst [vmem:[%s2692_s24 + $0xc80] sm:$0xff] %v1635_v39  ;;  %2148 = vst [vmem:[%s2692_s24 + $0xc88] sm:$0xff] %v1636_v40  ;;  %v638_v36 = vld [vmem:[%s2653_s13 + $0xd68] sm:$0xff] }
 0x143   : > { %v1640_v52 = vadd.f32 %v2662_v2, %v1127_v41  ;;  %v1641_v53 = vadd.f32 %v2662_v2, %v1128_v42  ;;  %v1130_v54 = vmul.f32 %v2660_v1, %v617_v37  ;;  %v1131_v55 = vmul.f32 %v2660_v1, %v618_v38  ;;  %2149 = vst [vmem:[%s2692_s24 + $0xc90] sm:$0xff] %v1637_v46  ;;  %v639_v37 = vld [vmem:[%s2653_s13 + $0xd70] sm:$0xff]  ;;  %v640_v42 = vld [vmem:[%s2653_s13 + $0xd78] sm:$0xff] }
 0x144   : > { %2150 = vst [vmem:[%s2692_s24 + $0xc98] sm:$0xff] %v1638_v47  ;;  %2151 = vst [vmem:[%s2692_s24 + $0xca0] sm:$0xff] %v1639_v48  ;;  %v1642_v57 = vadd.f32 %v2662_v2, %v1129_v49  ;;  %v1132_v58 = vmul.f32 %v2660_v1, %v619_v43  ;;  %v1133_v59 = vmul.f32 %v2660_v1, %v620_v44  ;;  %v641_v47 = vld [vmem:[%s2653_s13 + $0xd80] sm:$0xff]  ;;  %v642_v48 = vld [vmem:[%s2653_s13 + $0xd88] sm:$0xff] }
 0x145   : > { %v1134_v60 = vmul.f32 %v2660_v1, %v621_v45  ;;  %2152 = vst [vmem:[%s2692_s24 + $0xca8] sm:$0xff] %v1640_v52  ;;  %2153 = vst [vmem:[%s2692_s24 + $0xcb0] sm:$0xff] %v1641_v53  ;;  %v1643_v63 = vadd.f32 %v2662_v2, %v1130_v54  ;;  %v1644_v0 = vadd.f32 %v2662_v2, %v1131_v55  ;;  %v643_v53 = vld [vmem:[%s2653_s13 + $0xd90] sm:$0xff]  ;;  %v644_v54 = vld [vmem:[%s2653_s13 + $0xd98] sm:$0xff] }
 0x146   : > { %v1135_v3 = vmul.f32 %v2660_v1, %v622_v50  ;;  %v1136_v4 = vmul.f32 %v2660_v1, %v623_v51  ;;  %2154 = vst [vmem:[%s2692_s24 + $0xcb8] sm:$0xff] %v1642_v57  ;;  %v1645_v8 = vadd.f32 %v2662_v2, %v1132_v58  ;;  %v1646_v9 = vadd.f32 %v2662_v2, %v1133_v59  ;;  %v645_v55 = vld [vmem:[%s2653_s13 + $0xda0] sm:$0xff] }
 0x147   : > { %v1647_v10 = vadd.f32 %v2662_v2, %v1134_v60  ;;  %v1137_v11 = vmul.f32 %v2660_v1, %v624_v56  ;;  %2155 = vst [vmem:[%s2692_s24 + $0xcc0] sm:$0xff] %v1643_v63  ;;  %2156 = vst [vmem:[%s2692_s24 + $0xcc8] sm:$0xff] %v1644_v0  ;;  %v1138_v16 = vmul.f32 %v2660_v1, %v625_v61  ;;  %v646_v60 = vld [vmem:[%s2653_s13 + $0xda8] sm:$0xff]  ;;  %v647_v61 = vld [vmem:[%s2653_s13 + $0xdb0] sm:$0xff] }
 0x148   : > { %v1648_v14 = vadd.f32 %v2662_v2, %v1135_v3  ;;  %v1649_v15 = vadd.f32 %v2662_v2, %v1136_v4  ;;  %v1139_v17 = vmul.f32 %v2660_v1, %v626_v62  ;;  %2157 = vst [vmem:[%s2692_s24 + $0xcd0] sm:$0xff] %v1645_v8  ;;  %2158 = vst [vmem:[%s2692_s24 + $0xcd8] sm:$0xff] %v1646_v9  ;;  %v648_v4 = vld [vmem:[%s2653_s13 + $0xdb8] sm:$0xff]  ;;  %v649_v9 = vld [vmem:[%s2653_s13 + $0xdc0] sm:$0xff] }
 0x149   : > { %2159 = vst [vmem:[%s2692_s24 + $0xce0] sm:$0xff] %v1647_v10  ;;  %v1650_v19 = vadd.f32 %v2662_v2, %v1137_v11  ;;  %v1140_v20 = vmul.f32 %v2660_v1, %v627_v5  ;;  %v1141_v21 = vmul.f32 %v2660_v1, %v628_v6  ;;  %v1142_v22 = vmul.f32 %v2660_v1, %v629_v7  ;;  %v650_v10 = vld [vmem:[%s2653_s13 + $0xdc8] sm:$0xff] }
 0x14a   : > { %2160 = vst [vmem:[%s2692_s24 + $0xce8] sm:$0xff] %v1648_v14  ;;  %2161 = vst [vmem:[%s2692_s24 + $0xcf0] sm:$0xff] %v1649_v15  ;;  %v1651_v25 = vadd.f32 %v2662_v2, %v1138_v16  ;;  %v1652_v26 = vadd.f32 %v2662_v2, %v1139_v17  ;;  %v1143_v27 = vmul.f32 %v2660_v1, %v630_v12  ;;  %v651_v15 = vld [vmem:[%s2653_s13 + $0xdd0] sm:$0xff]  ;;  %v652_v16 = vld [vmem:[%s2653_s13 + $0xdd8] sm:$0xff] }
 0x14b   : > { %v1144_v28 = vmul.f32 %v2660_v1, %v631_v13  ;;  %2162 = vst [vmem:[%s2692_s24 + $0xcf8] sm:$0xff] %v1650_v19  ;;  %v1653_v32 = vadd.f32 %v2662_v2, %v1140_v20  ;;  %v1654_v33 = vadd.f32 %v2662_v2, %v1141_v21  ;;  %v1655_v34 = vadd.f32 %v2662_v2, %v1142_v22  ;;  %v653_v17 = vld [vmem:[%s2653_s13 + $0xde0] sm:$0xff]  ;;  %v654_v22 = vld [vmem:[%s2653_s13 + $0xde8] sm:$0xff] }
 0x14c   : > { %v1145_v35 = vmul.f32 %v2660_v1, %v632_v18  ;;  %2163 = vst [vmem:[%s2692_s24 + $0xd00] sm:$0xff] %v1651_v25  ;;  %2164 = vst [vmem:[%s2692_s24 + $0xd08] sm:$0xff] %v1652_v26  ;;  %v1656_v38 = vadd.f32 %v2662_v2, %v1143_v27  ;;  %v1146_v40 = vmul.f32 %v2660_v1, %v633_v23  ;;  %v655_v23 = vld [vmem:[%s2653_s13 + $0xdf0] sm:$0xff] }
 0x14d   : > { %v1657_v39 = vadd.f32 %v2662_v2, %v1144_v28  ;;  %v1147_v41 = vmul.f32 %v2660_v1, %v634_v24  ;;  %2165 = vst [vmem:[%s2692_s24 + $0xd10] sm:$0xff] %v1653_v32  ;;  %2166 = vst [vmem:[%s2692_s24 + $0xd18] sm:$0xff] %v1654_v33  ;;  %v1148_v44 = vmul.f32 %v2660_v1, %v635_v29  ;;  %v656_v28 = vld [vmem:[%s2653_s13 + $0xdf8] sm:$0xff]  ;;  %v657_v33 = vld [vmem:[%s2653_s13 + $0xe00] sm:$0xff] }
 0x14e   : > { %2167 = vst [vmem:[%s2692_s24 + $0xd20] sm:$0xff] %v1655_v34  ;;  %v1658_v43 = vadd.f32 %v2662_v2, %v1145_v35  ;;  %v1149_v45 = vmul.f32 %v2660_v1, %v636_v30  ;;  %v1150_v46 = vmul.f32 %v2660_v1, %v637_v31  ;;  %2168 = vst [vmem:[%s2692_s24 + $0xd28] sm:$0xff] %v1656_v38  ;;  %v658_v34 = vld [vmem:[%s2653_s13 + $0xe08] sm:$0xff] }
 0x14f   : > { %2169 = vst [vmem:[%s2692_s24 + $0xd30] sm:$0xff] %v1657_v39  ;;  %v1659_v49 = vadd.f32 %v2662_v2, %v1146_v40  ;;  %v1660_v50 = vadd.f32 %v2662_v2, %v1147_v41  ;;  %v1151_v51 = vmul.f32 %v2660_v1, %v638_v36  ;;  %v1152_v52 = vmul.f32 %v2660_v1, %v639_v37  ;;  %v659_v39 = vld [vmem:[%s2653_s13 + $0xe10] sm:$0xff]  ;;  %v660_v40 = vld [vmem:[%s2653_s13 + $0xe18] sm:$0xff]  ;;  %v661_v41 = vld [vmem:[%s2653_s13 + $0xe20] sm:$0xff] }
 0x150   : > { %2170 = vst [vmem:[%s2692_s24 + $0xd38] sm:$0xff] %v1658_v43  ;;  %v1661_v56 = vadd.f32 %v2662_v2, %v1148_v44  ;;  %v1662_v57 = vadd.f32 %v2662_v2, %v1149_v45  ;;  %v1663_v58 = vadd.f32 %v2662_v2, %v1150_v46  ;;  %v1153_v59 = vmul.f32 %v2660_v1, %v640_v42  ;;  %v662_v46 = vld [vmem:[%s2653_s13 + $0xe28] sm:$0xff] }
 0x151   : > { %2171 = vst [vmem:[%s2692_s24 + $0xd40] sm:$0xff] %v1659_v49  ;;  %2172 = vst [vmem:[%s2692_s24 + $0xd48] sm:$0xff] %v1660_v50  ;;  %v1664_v62 = vadd.f32 %v2662_v2, %v1151_v51  ;;  %v1665_v63 = vadd.f32 %v2662_v2, %v1152_v52  ;;  %v1154_v0 = vmul.f32 %v2660_v1, %v641_v47  ;;  %v663_v47 = vld [vmem:[%s2653_s13 + $0xe30] sm:$0xff]  ;;  %v664_v52 = vld [vmem:[%s2653_s13 + $0xe38] sm:$0xff] }
 0x152   : > { %v1155_v3 = vmul.f32 %v2660_v1, %v642_v48  ;;  %2173 = vst [vmem:[%s2692_s24 + $0xd50] sm:$0xff] %v1661_v56  ;;  %2174 = vst [vmem:[%s2692_s24 + $0xd58] sm:$0xff] %v1662_v57  ;;  %v1666_v5 = vadd.f32 %v2662_v2, %v1153_v59  ;;  %v1156_v6 = vmul.f32 %v2660_v1, %v643_v53  ;;  %v665_v57 = vld [vmem:[%s2653_s13 + $0xe40] sm:$0xff] }
 0x153   : > { %2175 = vst [vmem:[%s2692_s24 + $0xd60] sm:$0xff] %v1663_v58  ;;  %v1157_v7 = vmul.f32 %v2660_v1, %v644_v54  ;;  %v1158_v8 = vmul.f32 %v2660_v1, %v645_v55  ;;  %2176 = vst [vmem:[%s2692_s24 + $0xd68] sm:$0xff] %v1664_v62  ;;  %v1667_v11 = vadd.f32 %v2662_v2, %v1154_v0  ;;  %v666_v58 = vld [vmem:[%s2653_s13 + $0xe48] sm:$0xff]  ;;  %v668_v0 = vld [vmem:[%s2653_s13 + $0xe58] sm:$0xff] }
 0x154   : > { %2177 = vst [vmem:[%s2692_s24 + $0xd70] sm:$0xff] %v1665_v63  ;;  %v1668_v12 = vadd.f32 %v2662_v2, %v1155_v3  ;;  %v1159_v13 = vmul.f32 %v2660_v1, %v646_v60  ;;  %v1160_v14 = vmul.f32 %v2660_v1, %v647_v61  ;;  %2178 = vst [vmem:[%s2692_s24 + $0xd78] sm:$0xff] %v1666_v5  ;;  %v667_v63 = vld [vmem:[%s2653_s13 + $0xe50] sm:$0xff]  ;;  %v669_v3 = vld [vmem:[%s2653_s13 + $0xe60] sm:$0xff] }
 0x155   : > { %v1669_v18 = vadd.f32 %v2662_v2, %v1156_v6  ;;  %v1670_v19 = vadd.f32 %v2662_v2, %v1157_v7  ;;  %v1671_v20 = vadd.f32 %v2662_v2, %v1158_v8  ;;  %v1161_v21 = vmul.f32 %v2660_v1, %v648_v4  ;;  %2179 = vst [vmem:[%s2692_s24 + $0xd80] sm:$0xff] %v1667_v11  ;;  %v670_v8 = vld [vmem:[%s2653_s13 + $0xe68] sm:$0xff] }
 0x156   : > { %2180 = vst [vmem:[%s2692_s24 + $0xd88] sm:$0xff] %v1668_v12  ;;  %v1672_v24 = vadd.f32 %v2662_v2, %v1159_v13  ;;  %v1673_v25 = vadd.f32 %v2662_v2, %v1160_v14  ;;  %v1162_v26 = vmul.f32 %v2660_v1, %v649_v9  ;;  %v1163_v27 = vmul.f32 %v2660_v1, %v650_v10  ;;  %v671_v9 = vld [vmem:[%s2653_s13 + $0xe70] sm:$0xff]  ;;  %v672_v14 = vld [vmem:[%s2653_s13 + $0xe78] sm:$0xff] }
 0x157   : > { %2181 = vst [vmem:[%s2692_s24 + $0xd90] sm:$0xff] %v1669_v18  ;;  %2182 = vst [vmem:[%s2692_s24 + $0xd98] sm:$0xff] %v1670_v19  ;;  %v1674_v29 = vadd.f32 %v2662_v2, %v1161_v21  ;;  %v1164_v30 = vmul.f32 %v2660_v1, %v651_v15  ;;  %v1165_v31 = vmul.f32 %v2660_v1, %v652_v16  ;;  %v673_v19 = vld [vmem:[%s2653_s13 + $0xe80] sm:$0xff] }
 0x158   : > { %2183 = vst [vmem:[%s2692_s24 + $0xda0] sm:$0xff] %v1671_v20  ;;  %v1166_v32 = vmul.f32 %v2660_v1, %v653_v17  ;;  %2184 = vst [vmem:[%s2692_s24 + $0xda8] sm:$0xff] %v1672_v24  ;;  %v1675_v35 = vadd.f32 %v2662_v2, %v1162_v26  ;;  %v1676_v36 = vadd.f32 %v2662_v2, %v1163_v27  ;;  %v674_v20 = vld [vmem:[%s2653_s13 + $0xe88] sm:$0xff]  ;;  %v676_v26 = vld [vmem:[%s2653_s13 + $0xe98] sm:$0xff] }
 0x159   : > { %2185 = vst [vmem:[%s2692_s24 + $0xdb0] sm:$0xff] %v1673_v25  ;;  %v1167_v37 = vmul.f32 %v2660_v1, %v654_v22  ;;  %v1168_v38 = vmul.f32 %v2660_v1, %v655_v23  ;;  %2186 = vst [vmem:[%s2692_s24 + $0xdb8] sm:$0xff] %v1674_v29  ;;  %v1677_v42 = vadd.f32 %v2662_v2, %v1164_v30  ;;  %v675_v25 = vld [vmem:[%s2653_s13 + $0xe90] sm:$0xff]  ;;  %v677_v27 = vld [vmem:[%s2653_s13 + $0xea0] sm:$0xff] }
 0x15a   : > { %v1678_v43 = vadd.f32 %v2662_v2, %v1165_v31  ;;  %v1679_v44 = vadd.f32 %v2662_v2, %v1166_v32  ;;  %v1169_v45 = vmul.f32 %v2660_v1, %v656_v28  ;;  %2187 = vst [vmem:[%s2692_s24 + $0xdc0] sm:$0xff] %v1675_v35  ;;  %2188 = vst [vmem:[%s2692_s24 + $0xdc8] sm:$0xff] %v1676_v36  ;;  %v678_v32 = vld [vmem:[%s2653_s13 + $0xea8] sm:$0xff] }
 0x15b   : > { %v1680_v48 = vadd.f32 %v2662_v2, %v1167_v37  ;;  %v1681_v49 = vadd.f32 %v2662_v2, %v1168_v38  ;;  %v1170_v50 = vmul.f32 %v2660_v1, %v657_v33  ;;  %v1171_v51 = vmul.f32 %v2660_v1, %v658_v34  ;;  %2189 = vst [vmem:[%s2692_s24 + $0xdd0] sm:$0xff] %v1677_v42  ;;  %v679_v33 = vld [vmem:[%s2653_s13 + $0xeb0] sm:$0xff]  ;;  %v680_v38 = vld [vmem:[%s2653_s13 + $0xeb8] sm:$0xff] }
 0x15c   : > { %2190 = vst [vmem:[%s2692_s24 + $0xdd8] sm:$0xff] %v1678_v43  ;;  %2191 = vst [vmem:[%s2692_s24 + $0xde0] sm:$0xff] %v1679_v44  ;;  %v1682_v53 = vadd.f32 %v2662_v2, %v1169_v45  ;;  %v1172_v54 = vmul.f32 %v2660_v1, %v659_v39  ;;  %v1173_v55 = vmul.f32 %v2660_v1, %v660_v40  ;;  %v681_v43 = vld [vmem:[%s2653_s13 + $0xec0] sm:$0xff]  ;;  %v682_v44 = vld [vmem:[%s2653_s13 + $0xec8] sm:$0xff] }
 0x15d   : > { %v1174_v56 = vmul.f32 %v2660_v1, %v661_v41  ;;  %2192 = vst [vmem:[%s2692_s24 + $0xde8] sm:$0xff] %v1680_v48  ;;  %2193 = vst [vmem:[%s2692_s24 + $0xdf0] sm:$0xff] %v1681_v49  ;;  %v1683_v59 = vadd.f32 %v2662_v2, %v1170_v50  ;;  %v1684_v60 = vadd.f32 %v2662_v2, %v1171_v51  ;;  %v683_v49 = vld [vmem:[%s2653_s13 + $0xed0] sm:$0xff]  ;;  %v684_v50 = vld [vmem:[%s2653_s13 + $0xed8] sm:$0xff] }
 0x15e   : > { %v1175_v61 = vmul.f32 %v2660_v1, %v662_v46  ;;  %v1176_v62 = vmul.f32 %v2660_v1, %v663_v47  ;;  %2194 = vst [vmem:[%s2692_s24 + $0xdf8] sm:$0xff] %v1682_v53  ;;  %v1685_v4 = vadd.f32 %v2662_v2, %v1172_v54  ;;  %v1686_v5 = vadd.f32 %v2662_v2, %v1173_v55  ;;  %v685_v51 = vld [vmem:[%s2653_s13 + $0xee0] sm:$0xff] }
 0x15f   : > { %v1687_v6 = vadd.f32 %v2662_v2, %v1174_v56  ;;  %v1177_v7 = vmul.f32 %v2660_v1, %v664_v52  ;;  %2195 = vst [vmem:[%s2692_s24 + $0xe00] sm:$0xff] %v1683_v59  ;;  %2196 = vst [vmem:[%s2692_s24 + $0xe08] sm:$0xff] %v1684_v60  ;;  %v1178_v12 = vmul.f32 %v2660_v1, %v665_v57  ;;  %v686_v56 = vld [vmem:[%s2653_s13 + $0xee8] sm:$0xff]  ;;  %v687_v57 = vld [vmem:[%s2653_s13 + $0xef0] sm:$0xff] }
 0x160   : > { %v1688_v10 = vadd.f32 %v2662_v2, %v1175_v61  ;;  %v1689_v11 = vadd.f32 %v2662_v2, %v1176_v62  ;;  %v1179_v13 = vmul.f32 %v2660_v1, %v666_v58  ;;  %2197 = vst [vmem:[%s2692_s24 + $0xe10] sm:$0xff] %v1685_v4  ;;  %2198 = vst [vmem:[%s2692_s24 + $0xe18] sm:$0xff] %v1686_v5  ;;  %v688_v62 = vld [vmem:[%s2653_s13 + $0xef8] sm:$0xff]  ;;  %v689_v5 = vld [vmem:[%s2653_s13 + $0xf00] sm:$0xff] }
 0x161   : > { %2199 = vst [vmem:[%s2692_s24 + $0xe20] sm:$0xff] %v1687_v6  ;;  %v1690_v15 = vadd.f32 %v2662_v2, %v1177_v7  ;;  %v1180_v16 = vmul.f32 %v2660_v1, %v667_v63  ;;  %v1181_v17 = vmul.f32 %v2660_v1, %v668_v0  ;;  %v1182_v18 = vmul.f32 %v2660_v1, %v669_v3  ;;  %v690_v6 = vld [vmem:[%s2653_s13 + $0xf08] sm:$0xff] }
 0x162   : > { %2200 = vst [vmem:[%s2692_s24 + $0xe28] sm:$0xff] %v1688_v10  ;;  %2201 = vst [vmem:[%s2692_s24 + $0xe30] sm:$0xff] %v1689_v11  ;;  %v1691_v21 = vadd.f32 %v2662_v2, %v1178_v12  ;;  %v1692_v22 = vadd.f32 %v2662_v2, %v1179_v13  ;;  %v1183_v23 = vmul.f32 %v2660_v1, %v670_v8  ;;  %v691_v11 = vld [vmem:[%s2653_s13 + $0xf10] sm:$0xff]  ;;  %v692_v12 = vld [vmem:[%s2653_s13 + $0xf18] sm:$0xff] }
 0x163   : > { %v1184_v24 = vmul.f32 %v2660_v1, %v671_v9  ;;  %2202 = vst [vmem:[%s2692_s24 + $0xe38] sm:$0xff] %v1690_v15  ;;  %v1693_v28 = vadd.f32 %v2662_v2, %v1180_v16  ;;  %v1694_v29 = vadd.f32 %v2662_v2, %v1181_v17  ;;  %v1695_v30 = vadd.f32 %v2662_v2, %v1182_v18  ;;  %v693_v13 = vld [vmem:[%s2653_s13 + $0xf20] sm:$0xff]  ;;  %v694_v18 = vld [vmem:[%s2653_s13 + $0xf28] sm:$0xff] }
 0x164   : > { %v1185_v31 = vmul.f32 %v2660_v1, %v672_v14  ;;  %2203 = vst [vmem:[%s2692_s24 + $0xe40] sm:$0xff] %v1691_v21  ;;  %2204 = vst [vmem:[%s2692_s24 + $0xe48] sm:$0xff] %v1692_v22  ;;  %v1696_v34 = vadd.f32 %v2662_v2, %v1183_v23  ;;  %v1186_v36 = vmul.f32 %v2660_v1, %v673_v19  ;;  %v695_v19 = vld [vmem:[%s2653_s13 + $0xf30] sm:$0xff] }
 0x165   : > { %v1697_v35 = vadd.f32 %v2662_v2, %v1184_v24  ;;  %v1187_v37 = vmul.f32 %v2660_v1, %v674_v20  ;;  %2205 = vst [vmem:[%s2692_s24 + $0xe50] sm:$0xff] %v1693_v28  ;;  %2206 = vst [vmem:[%s2692_s24 + $0xe58] sm:$0xff] %v1694_v29  ;;  %v1188_v40 = vmul.f32 %v2660_v1, %v675_v25  ;;  %v696_v24 = vld [vmem:[%s2653_s13 + $0xf38] sm:$0xff]  ;;  %v697_v29 = vld [vmem:[%s2653_s13 + $0xf40] sm:$0xff] }
 0x166   : > { %2207 = vst [vmem:[%s2692_s24 + $0xe60] sm:$0xff] %v1695_v30  ;;  %v1698_v39 = vadd.f32 %v2662_v2, %v1185_v31  ;;  %v1189_v41 = vmul.f32 %v2660_v1, %v676_v26  ;;  %v1190_v42 = vmul.f32 %v2660_v1, %v677_v27  ;;  %2208 = vst [vmem:[%s2692_s24 + $0xe68] sm:$0xff] %v1696_v34  ;;  %v698_v30 = vld [vmem:[%s2653_s13 + $0xf48] sm:$0xff] }
 0x167   : > { %2209 = vst [vmem:[%s2692_s24 + $0xe70] sm:$0xff] %v1697_v35  ;;  %v1699_v45 = vadd.f32 %v2662_v2, %v1186_v36  ;;  %v1700_v46 = vadd.f32 %v2662_v2, %v1187_v37  ;;  %v1191_v47 = vmul.f32 %v2660_v1, %v678_v32  ;;  %v1192_v48 = vmul.f32 %v2660_v1, %v679_v33  ;;  %v699_v35 = vld [vmem:[%s2653_s13 + $0xf50] sm:$0xff]  ;;  %v700_v36 = vld [vmem:[%s2653_s13 + $0xf58] sm:$0xff]  ;;  %v701_v37 = vld [vmem:[%s2653_s13 + $0xf60] sm:$0xff] }
 0x168   : > { %2210 = vst [vmem:[%s2692_s24 + $0xe78] sm:$0xff] %v1698_v39  ;;  %v1701_v52 = vadd.f32 %v2662_v2, %v1188_v40  ;;  %v1702_v53 = vadd.f32 %v2662_v2, %v1189_v41  ;;  %v1703_v54 = vadd.f32 %v2662_v2, %v1190_v42  ;;  %v1193_v55 = vmul.f32 %v2660_v1, %v680_v38  ;;  %v702_v42 = vld [vmem:[%s2653_s13 + $0xf68] sm:$0xff] }
 0x169   : > { %2211 = vst [vmem:[%s2692_s24 + $0xe80] sm:$0xff] %v1699_v45  ;;  %2212 = vst [vmem:[%s2692_s24 + $0xe88] sm:$0xff] %v1700_v46  ;;  %v1704_v58 = vadd.f32 %v2662_v2, %v1191_v47  ;;  %v1705_v59 = vadd.f32 %v2662_v2, %v1192_v48  ;;  %v1194_v60 = vmul.f32 %v2660_v1, %v681_v43  ;;  %v703_v43 = vld [vmem:[%s2653_s13 + $0xf70] sm:$0xff]  ;;  %v704_v48 = vld [vmem:[%s2653_s13 + $0xf78] sm:$0xff] }
 0x16a   : > { %v1195_v61 = vmul.f32 %v2660_v1, %v682_v44  ;;  %2213 = vst [vmem:[%s2692_s24 + $0xe90] sm:$0xff] %v1701_v52  ;;  %2214 = vst [vmem:[%s2692_s24 + $0xe98] sm:$0xff] %v1702_v53  ;;  %v1706_v63 = vadd.f32 %v2662_v2, %v1193_v55  ;;  %v1196_v0 = vmul.f32 %v2660_v1, %v683_v49  ;;  %v705_v53 = vld [vmem:[%s2653_s13 + $0xf80] sm:$0xff] }
 0x16b   : > { %2215 = vst [vmem:[%s2692_s24 + $0xea0] sm:$0xff] %v1703_v54  ;;  %v1197_v3 = vmul.f32 %v2660_v1, %v684_v50  ;;  %v1198_v4 = vmul.f32 %v2660_v1, %v685_v51  ;;  %2216 = vst [vmem:[%s2692_s24 + $0xea8] sm:$0xff] %v1704_v58  ;;  %v1707_v7 = vadd.f32 %v2662_v2, %v1194_v60  ;;  %v706_v54 = vld [vmem:[%s2653_s13 + $0xf88] sm:$0xff]  ;;  %v708_v60 = vld [vmem:[%s2653_s13 + $0xf98] sm:$0xff] }
 0x16c   : > { %2217 = vst [vmem:[%s2692_s24 + $0xeb0] sm:$0xff] %v1705_v59  ;;  %v1708_v8 = vadd.f32 %v2662_v2, %v1195_v61  ;;  %v1199_v9 = vmul.f32 %v2660_v1, %v686_v56  ;;  %v1200_v10 = vmul.f32 %v2660_v1, %v687_v57  ;;  %2218 = vst [vmem:[%s2692_s24 + $0xeb8] sm:$0xff] %v1706_v63  ;;  %v707_v59 = vld [vmem:[%s2653_s13 + $0xf90] sm:$0xff]  ;;  %v709_v61 = vld [vmem:[%s2653_s13 + $0xfa0] sm:$0xff] }
 0x16d   : > { %v1709_v14 = vadd.f32 %v2662_v2, %v1196_v0  ;;  %v1710_v15 = vadd.f32 %v2662_v2, %v1197_v3  ;;  %v1711_v16 = vadd.f32 %v2662_v2, %v1198_v4  ;;  %v1201_v17 = vmul.f32 %v2660_v1, %v688_v62  ;;  %2219 = vst [vmem:[%s2692_s24 + $0xec0] sm:$0xff] %v1707_v7  ;;  %v710_v4 = vld [vmem:[%s2653_s13 + $0xfa8] sm:$0xff] }
 0x16e   : > { %2220 = vst [vmem:[%s2692_s24 + $0xec8] sm:$0xff] %v1708_v8  ;;  %v1712_v20 = vadd.f32 %v2662_v2, %v1199_v9  ;;  %v1713_v21 = vadd.f32 %v2662_v2, %v1200_v10  ;;  %v1202_v22 = vmul.f32 %v2660_v1, %v689_v5  ;;  %v1203_v23 = vmul.f32 %v2660_v1, %v690_v6  ;;  %v711_v5 = vld [vmem:[%s2653_s13 + $0xfb0] sm:$0xff]  ;;  %v712_v10 = vld [vmem:[%s2653_s13 + $0xfb8] sm:$0xff] }
 0x16f   : > { %2221 = vst [vmem:[%s2692_s24 + $0xed0] sm:$0xff] %v1709_v14  ;;  %2222 = vst [vmem:[%s2692_s24 + $0xed8] sm:$0xff] %v1710_v15  ;;  %v1714_v25 = vadd.f32 %v2662_v2, %v1201_v17  ;;  %v1204_v26 = vmul.f32 %v2660_v1, %v691_v11  ;;  %v1205_v27 = vmul.f32 %v2660_v1, %v692_v12  ;;  %v713_v15 = vld [vmem:[%s2653_s13 + $0xfc0] sm:$0xff] }
 0x170   : > { %2223 = vst [vmem:[%s2692_s24 + $0xee0] sm:$0xff] %v1711_v16  ;;  %v1206_v28 = vmul.f32 %v2660_v1, %v693_v13  ;;  %2224 = vst [vmem:[%s2692_s24 + $0xee8] sm:$0xff] %v1712_v20  ;;  %v1715_v31 = vadd.f32 %v2662_v2, %v1202_v22  ;;  %v1716_v32 = vadd.f32 %v2662_v2, %v1203_v23  ;;  %v714_v16 = vld [vmem:[%s2653_s13 + $0xfc8] sm:$0xff]  ;;  %v716_v22 = vld [vmem:[%s2653_s13 + $0xfd8] sm:$0xff] }
 0x171   : > { %2225 = vst [vmem:[%s2692_s24 + $0xef0] sm:$0xff] %v1713_v21  ;;  %v1207_v33 = vmul.f32 %v2660_v1, %v694_v18  ;;  %v1208_v34 = vmul.f32 %v2660_v1, %v695_v19  ;;  %2226 = vst [vmem:[%s2692_s24 + $0xef8] sm:$0xff] %v1714_v25  ;;  %v1717_v38 = vadd.f32 %v2662_v2, %v1204_v26  ;;  %v715_v21 = vld [vmem:[%s2653_s13 + $0xfd0] sm:$0xff]  ;;  %v717_v23 = vld [vmem:[%s2653_s13 + $0xfe0] sm:$0xff] }
 0x172   : > { %v1718_v39 = vadd.f32 %v2662_v2, %v1205_v27  ;;  %v1719_v40 = vadd.f32 %v2662_v2, %v1206_v28  ;;  %v1209_v41 = vmul.f32 %v2660_v1, %v696_v24  ;;  %2227 = vst [vmem:[%s2692_s24 + $0xf00] sm:$0xff] %v1715_v31  ;;  %2228 = vst [vmem:[%s2692_s24 + $0xf08] sm:$0xff] %v1716_v32  ;;  %v718_v28 = vld [vmem:[%s2653_s13 + $0xfe8] sm:$0xff] }
 0x173   : > { %v1720_v44 = vadd.f32 %v2662_v2, %v1207_v33  ;;  %v1721_v45 = vadd.f32 %v2662_v2, %v1208_v34  ;;  %v1210_v46 = vmul.f32 %v2660_v1, %v697_v29  ;;  %v1211_v47 = vmul.f32 %v2660_v1, %v698_v30  ;;  %2229 = vst [vmem:[%s2692_s24 + $0xf10] sm:$0xff] %v1717_v38  ;;  %v719_v29 = vld [vmem:[%s2653_s13 + $0xff0] sm:$0xff]  ;;  %v720_v34 = vld [vmem:[%s2653_s13 + $0xff8] sm:$0xff] }
 0x174   : > { %2230 = vst [vmem:[%s2692_s24 + $0xf18] sm:$0xff] %v1718_v39  ;;  %2231 = vst [vmem:[%s2692_s24 + $0xf20] sm:$0xff] %v1719_v40  ;;  %v1722_v49 = vadd.f32 %v2662_v2, %v1209_v41  ;;  %v1212_v50 = vmul.f32 %v2660_v1, %v699_v35  ;;  %v1213_v51 = vmul.f32 %v2660_v1, %v700_v36 }
 0x175   : > { %v1214_v52 = vmul.f32 %v2660_v1, %v701_v37  ;;  %2232 = vst [vmem:[%s2692_s24 + $0xf28] sm:$0xff] %v1720_v44  ;;  %2233 = vst [vmem:[%s2692_s24 + $0xf30] sm:$0xff] %v1721_v45  ;;  %v1723_v55 = vadd.f32 %v2662_v2, %v1210_v46  ;;  %v1724_v56 = vadd.f32 %v2662_v2, %v1211_v47 }
 0x176   : > { %v1215_v57 = vmul.f32 %v2660_v1, %v702_v42  ;;  %v1216_v58 = vmul.f32 %v2660_v1, %v703_v43  ;;  %2234 = vst [vmem:[%s2692_s24 + $0xf38] sm:$0xff] %v1722_v49  ;;  %v1725_v62 = vadd.f32 %v2662_v2, %v1212_v50  ;;  %v1726_v63 = vadd.f32 %v2662_v2, %v1213_v51 }
 0x177   : > { %v1727_v0 = vadd.f32 %v2662_v2, %v1214_v52  ;;  %v1217_v3 = vmul.f32 %v2660_v1, %v704_v48  ;;  %2235 = vst [vmem:[%s2692_s24 + $0xf40] sm:$0xff] %v1723_v55  ;;  %2236 = vst [vmem:[%s2692_s24 + $0xf48] sm:$0xff] %v1724_v56  ;;  %v1218_v8 = vmul.f32 %v2660_v1, %v705_v53 }
 0x178   : > { %v1728_v6 = vadd.f32 %v2662_v2, %v1215_v57  ;;  %v1729_v7 = vadd.f32 %v2662_v2, %v1216_v58  ;;  %v1219_v9 = vmul.f32 %v2660_v1, %v706_v54  ;;  %2237 = vst [vmem:[%s2692_s24 + $0xf50] sm:$0xff] %v1725_v62  ;;  %2238 = vst [vmem:[%s2692_s24 + $0xf58] sm:$0xff] %v1726_v63 }
 0x179   : > { %2239 = vst [vmem:[%s2692_s24 + $0xf60] sm:$0xff] %v1727_v0  ;;  %v1730_v11 = vadd.f32 %v2662_v2, %v1217_v3  ;;  %v1220_v12 = vmul.f32 %v2660_v1, %v707_v59  ;;  %v1221_v13 = vmul.f32 %v2660_v1, %v708_v60  ;;  %v1222_v14 = vmul.f32 %v2660_v1, %v709_v61 }
 0x17a   : > { %2240 = vst [vmem:[%s2692_s24 + $0xf68] sm:$0xff] %v1728_v6  ;;  %2241 = vst [vmem:[%s2692_s24 + $0xf70] sm:$0xff] %v1729_v7  ;;  %v1731_v17 = vadd.f32 %v2662_v2, %v1218_v8  ;;  %v1732_v18 = vadd.f32 %v2662_v2, %v1219_v9  ;;  %v1223_v19 = vmul.f32 %v2660_v1, %v710_v4 }
 0x17b   : > { %v1224_v20 = vmul.f32 %v2660_v1, %v711_v5  ;;  %2242 = vst [vmem:[%s2692_s24 + $0xf78] sm:$0xff] %v1730_v11  ;;  %v1733_v24 = vadd.f32 %v2662_v2, %v1220_v12  ;;  %v1734_v25 = vadd.f32 %v2662_v2, %v1221_v13  ;;  %v1735_v26 = vadd.f32 %v2662_v2, %v1222_v14 }
 0x17c   : > { %v1225_v27 = vmul.f32 %v2660_v1, %v712_v10  ;;  %2243 = vst [vmem:[%s2692_s24 + $0xf80] sm:$0xff] %v1731_v17  ;;  %2244 = vst [vmem:[%s2692_s24 + $0xf88] sm:$0xff] %v1732_v18  ;;  %v1736_v30 = vadd.f32 %v2662_v2, %v1223_v19  ;;  %v1226_v32 = vmul.f32 %v2660_v1, %v713_v15 }
 0x17d   : > { %v1737_v31 = vadd.f32 %v2662_v2, %v1224_v20  ;;  %v1227_v33 = vmul.f32 %v2660_v1, %v714_v16  ;;  %2245 = vst [vmem:[%s2692_s24 + $0xf90] sm:$0xff] %v1733_v24  ;;  %2246 = vst [vmem:[%s2692_s24 + $0xf98] sm:$0xff] %v1734_v25  ;;  %v1228_v36 = vmul.f32 %v2660_v1, %v715_v21 }
 0x17e   : > { %2247 = vst [vmem:[%s2692_s24 + $0xfa0] sm:$0xff] %v1735_v26  ;;  %v1738_v35 = vadd.f32 %v2662_v2, %v1225_v27  ;;  %v1229_v37 = vmul.f32 %v2660_v1, %v716_v22  ;;  %v1230_v38 = vmul.f32 %v2660_v1, %v717_v23  ;;  %2248 = vst [vmem:[%s2692_s24 + $0xfa8] sm:$0xff] %v1736_v30  ;;  %2266 = sbr.rel (!%p2591_p9) target bundleno = 417 (0x1a1), region = 40 }
 0x17f   : > { %2249 = vst [vmem:[%s2692_s24 + $0xfb0] sm:$0xff] %v1737_v31  ;;  %v1739_v39 = vadd.f32 %v2662_v2, %v1226_v32  ;;  %v1740_v40 = vadd.f32 %v2662_v2, %v1227_v33  ;;  %v1231_v41 = vmul.f32 %v2660_v1, %v718_v28  ;;  %v1232_v42 = vmul.f32 %v2660_v1, %v719_v29 }
 0x180   : > { %2250 = vst [vmem:[%s2692_s24 + $0xfb8] sm:$0xff] %v1738_v35  ;;  %v1741_v43 = vadd.f32 %v2662_v2, %v1228_v36  ;;  %v1742_v44 = vadd.f32 %v2662_v2, %v1229_v37  ;;  %v1743_v45 = vadd.f32 %v2662_v2, %v1230_v38  ;;  %v1233_v46 = vmul.f32 %v2660_v1, %v720_v34 }
 0x181   : > { %2251 = vst [vmem:[%s2692_s24 + $0xfc0] sm:$0xff] %v1739_v39  ;;  %2252 = vst [vmem:[%s2692_s24 + $0xfc8] sm:$0xff] %v1740_v40  ;;  %v1744_v47 = vadd.f32 %v2662_v2, %v1231_v41  ;;  %v1745_v48 = vadd.f32 %v2662_v2, %v1232_v42 }
 0x182   : > { %2253 = vst [vmem:[%s2692_s24 + $0xfd0] sm:$0xff] %v1741_v43  ;;  %2254 = vst [vmem:[%s2692_s24 + $0xfd8] sm:$0xff] %v1742_v44  ;;  %v1746_v49 = vadd.f32 %v2662_v2, %v1233_v46 }
 0x183   : > { %2255 = vst [vmem:[%s2692_s24 + $0xfe0] sm:$0xff] %v1743_v45  ;;  %2256 = vst [vmem:[%s2692_s24 + $0xfe8] sm:$0xff] %v1744_v47 }
 0x184   : > { %2257 = vst [vmem:[%s2692_s24 + $0xff0] sm:$0xff] %v1745_v48  ;;  %2258 = vst [vmem:[%s2692_s24 + $0xff8] sm:$0xff] %v1746_v49 }
 0x185   : > { %s4795_s14 = smov (!%p2269_p6, %s2268_s14), 512 }
 0x186   : > { %s4719_s15 = sshll.u32 %s4795_s14, 7 }
 0x187   : > { %s2273_s1 = ssub.s32 65536, %s4719_s15 }
 0x188   : > { %2274 = vsyncadd %s2260_s11, %s2273_s1  ;;  %p2368_p10 = scmp.ne.s32.totalorder %s4719_s15, 0  ;;  %s2375_s25 = sshll.u32 %s2568_s0, 16 }
 0x189   : > { %s4729_s27 = scalar_lea.hbm %s4781_s3, %s2375_s25  ;;  %s2279_s28 = sshll.u32 %s2692_s24, 4  ;;  %s4732_s28 = int_to_ptr.vmem [resolvable:$true] %s2279_s28 }
 0x18a   : > { %s2447_s29 = scalar_lea.vmem %s4732_s28, %s4719_s15  ;;  %s2518_s30 = smov [#allocation7]  }
 0x18b   : > { %p2448_p9 = scmp.ne.s32.totalorder %s4732_s28, %s2447_s29  ;;  %s2451_s5 = sshll.u32 %s2518_s30, 4  ;;  %s2452_s5 = int_to_ptr.vmem [resolvable:$false] %s2451_s5 }
 0x18c   : > { %s2453_s0 = scalar_lea.vmem %s2452_s5, 131072  ;;  %p2454_p12 = scmp.lt.s32.totalorder %s4732_s28, %s2452_s5 }
 0x18d   : > { %p2449_p11 = pnand %p2448_p9, %p2368_p10  ;;  %p2455_p0 = scmp.lt.s32.totalorder %s2453_s0, %s2447_s29 }
 0x18f   : > { %p2450_p13 = pneg %p2449_p11  ;;  %p2456_p1 = por %p2455_p0, %p2454_p12 }
 0x191   : > { %p2457_p3 = pnand %p2456_p1, %p2450_p13 }
 0x193   : > { %2460 = shalt.err (!%p2457_p3)
}
 0x194   : > { %s2461_s7 = scalar_lea.hbm %s4729_s27, %s4719_s15  ;;  %s2465_s13 = scalar_lea.hbm %s4781_s3, 81920 }
 0x195   : > { %p2462_p4 = scmp.ne.s32.totalorder %s4729_s27, %s2461_s7  ;;  %p2466_p7 = scmp.lt.u32.totalorder %s4729_s27, %s4781_s3 }
 0x196   : > { %p2467_p8 = scmp.lt.u32.totalorder %s2465_s13, %s2461_s7  ;;  %p2469_p9 = scmp.lt.u32.totalorder %s2461_s7, %s4729_s27 }
 0x197   : > { %p2463_p5 = pnand %p2462_p4, %p2368_p10 }
 0x198   : > { %p2468_p6 = por %p2467_p8, %p2466_p7 }
 0x199   : > { %p2464_p2 = pneg %p2463_p5 }
 0x19a   : > { %p2470_p11 = por %p2469_p9, %p2468_p6 }
 0x19c   : > { %p2471_p13 = pnand %p2470_p11, %p2464_p2 }
 0x19e   : > { %2474 = shalt.err (!%p2471_p13)
}
 0x19f   : > { %s2519_s24 = smov 128   ;;  %s2520_s12 = smov 8  }
 0x1a0   : > { %2285 = dma.vmem_to_hbm [thread:$0]  (%p2368_p10), %s4732_s28, %s4719_s15, %s4729_s27, %s2260_s11, %s2519_s24, %s2519_s24, %s2520_s12  }
 0x1a1 PF: > { %s2294_s14 = sand.u32 1, %s2501_s16   ;;  %p4786_p12 = scmp.ne.s32.totalorder %s4785_s26, 0 }
 0x1a2   : > { %p4787_p0 = scmp.ge.s32.totalorder %s2513_s19, 2  ;;  %s2295_s1 = scalar_lea.sflag [#allocation6], %s2294_s14 }
 0x1a4   : > { %p2379_p1 = pnand %p4787_p0, %p4786_p12 }
 0x1a6   : > { %2496 = dma.done.wait (!%p2379_p1), %s2295_s1, 65536  }
 0x1a7   : > { %2498 = vsyncadd (!%p2379_p1), %s2295_s1, 4294901760  ;;  %p18_p3 = scmp.ge.s32.totalorder %s2572_s20, 4   ;;  %s4788_s16 = smov %s2505_s17 }
 0x1a8   : > { %s4789_s17 = smov %s2509_s18  ;;  %s4790_s18 = smov %s2584_s23 }
 0x1a9   : > { %s4791_s19 = smov %s2572_s20  ;;  %20 = sbr.rel (!%p18_p3) target bundleno = 8 (0x8), region = 77 }
 0x1b0   :  { %2300 = vsyncpa [#allocation5], 1 }
 0x1b1   :  { %2302 = vsyncpa [#allocation5 + $0x1], 1 }
 0x1b2   :  { %2303 = vsyncpa [#allocation6], 1 }
 0x1b3   :  { %2305 = vsyncpa [#allocation6 + $0x1], 1 }

</bundles_post_ra>
